<compile_context>
chip_gen: v5e
topology: v5e:2x2
jax: 0.10.0
libtpu: 0.0.40
codegen_flags: <defaults>
</compile_context>

<pallas_src>
import functools

import numpy as np
import jax
import jax.numpy as jnp
from jax import lax
from jax.experimental import pallas as pl
from jax.experimental.pallas import tpu as pltpu

EPS = 1e-5  # PyTorch GroupNorm default eps


def _hardswish(x):
    # F.hardswish: x * relu6(x + 3) / 6
    return x * jnp.clip(x + 3.0, 0.0, 6.0) * (1.0 / 6.0)


# ----------------------------------------------------------------------------
# In-kernel helpers.  All operate on (C, L) f32 tiles: channels on sublanes,
# flattened spatial (H*W) on lanes -> lane-dense vregs and stores.
# ----------------------------------------------------------------------------
def _gn_hswish(h, g, b):
    """GroupNorm(num_groups=1) + hardswish.  One-pass stats (sum, sum-of-sq)."""
    n = h.shape[0] * h.shape[1]
    s1 = jnp.sum(h)
    s2 = jnp.sum(h * h)
    mean = s1 / n
    var = s2 / n - mean * mean           # f32 accumulation; fine at these sizes
    y = (h - mean) * lax.rsqrt(var + EPS) * g + b
    return _hardswish(y)


def _conv3x3_flat(h, w_flat, bias, mask_l, mask_r, sW):
    """3x3 conv (stride 1, pad 1) on a (Cin, sH*sW) flattened tile.

    Zero padding is materialized in VMEM only; the 9 shifted patches are
    stacked into a single im2col matrix so the conv is ONE
    (Cout, 9*Cin) x (9*Cin, sH*sW) MXU matmul.  mask_l / mask_r zero the
    output columns whose dx shift would wrap across a row boundary of the
    flattened layout (they also cover the corner cases of the dy padding).
    """
    cin, sHW = h.shape
    zpad = jnp.zeros((cin, sW + 1), jnp.float32)
    hp = jnp.concatenate([zpad, h, zpad], axis=1)      # (cin, sHW + 2*sW + 2)
    patches = []
    for dy in range(3):
        for dx in range(3):
            # patch[:, i] == h[:, i + (dy-1)*sW + (dx-1)]  (zero outside rows)
            start = dy * sW + dx
            p = hp[:, start:start + sHW]
            if dx == 0:
                p = p * mask_l
            elif dx == 2:
                p = p * mask_r
            patches.append(p)
    patch_mat = jnp.concatenate(patches, axis=0)       # (9*cin, sHW)
    return jnp.dot(w_flat, patch_mat, preferred_element_type=jnp.float32) + bias


# ----------------------------------------------------------------------------
# The fused kernel: the whole DeepRes block, one sample per grid step.
# ----------------------------------------------------------------------------
def _deepres_kernel(x_ref, s_ref, m_ref,
                    g1_ref, be1_ref, w11_ref, cb11_ref,
                    g2_ref, be2_ref,
                    w31_ref, cb31_ref, g3_ref, be3_ref,
                    w32_ref, cb32_ref, g4_ref, be4_ref,
                    w12_ref, cb12_ref,
                    o_ref, *, sW):
    x = x_ref[0].astype(jnp.float32)                   # (Cin, HW)
    S = s_ref[...]                                     # (HW, sHW) 0/1 selector

    # Residual branch: nearest-neighbour upsample of the raw input (fused).
    res = jnp.dot(x, S, preferred_element_type=jnp.float32)           # (Cin, sHW)

    masks = m_ref[...]                                 # (2, sHW) f32 0/1
    mask_l = masks[0:1, :]                             # valid for dx == 0
    mask_r = masks[1:2, :]                             # valid for dx == 2

    # norm1 + hardswish -> conv1_1 (1x1) -> norm2 + hardswish
    h = _gn_hswish(x, g1_ref[...], be1_ref[...])
    h = jnp.dot(w11_ref[...], h, preferred_element_type=jnp.float32) + cb11_ref[...]
    h = _gn_hswish(h, g2_ref[...], be2_ref[...])

    # nearest-neighbour upsample (fused selector matmul, stays in VMEM)
    h = jnp.dot(h, S, preferred_element_type=jnp.float32)             # (F, sHW)

    # conv3_1 -> norm3 + hardswish
    h = _conv3x3_flat(h, w31_ref[...], cb31_ref[...], mask_l, mask_r, sW)
    h = _gn_hswish(h, g3_ref[...], be3_ref[...])

    # conv3_2 -> norm4 + hardswish
    h = _conv3x3_flat(h, w32_ref[...], cb32_ref[...], mask_l, mask_r, sW)
    h = _gn_hswish(h, g4_ref[...], be4_ref[...])

    # conv1_2 (1x1) + residual add
    out = jnp.dot(w12_ref[...], h, preferred_element_type=jnp.float32)
    out = out + cb12_ref[...] + res
    o_ref[...] = out[None, :, :].astype(o_ref.dtype)


# ----------------------------------------------------------------------------
# Host-side constant builders (numpy -> compile-time constants under jit).
# ----------------------------------------------------------------------------
def _upsample_selector(H, W, scale):
    """0/1 matrix S (H*W, sH*sW): flat_up = flat @ S == nearest upsample."""
    sH, sW = H * scale, W * scale
    j = np.arange(sH * sW)
    src = (j // sW // scale) * W + (j % sW) // scale
    S = np.zeros((H * W, sH * sW), np.float32)
    S[src, j] = 1.0
    return jnp.asarray(S)


def _wrap_masks(sH, sW):
    """(2, sH*sW) f32 masks for dx=-1 / dx=+1 row-wrap in flattened layout."""
    w = np.arange(sH * sW) % sW
    m = np.stack([(w >= 1), (w <= sW - 2)]).astype(np.float32)
    return jnp.asarray(m)


# ----------------------------------------------------------------------------
# Full DeepRes forward (NCHW in/out, matches the PyTorch module).
# ----------------------------------------------------------------------------
def deepres_forward(x_nchw, p, scale):
    N, Cin, H, W = x_nchw.shape
    F = p["w11"].shape[1]
    sH, sW = H * scale, W * scale
    HW, sHW = H * W, sH * sW

    x = x_nchw.reshape(N, Cin, HW)                 # row-major: free reshape
    S = _upsample_selector(H, W, scale)            # compile-time constant
    M = _wrap_masks(sH, sW)                        # compile-time constant

    as_col = lambda v: v.reshape(-1, 1)
    # kernel-layout weights (tiny, transposed once per call)
    w11 = p["w11"].T                                               # (F, Cin)
    w12 = p["w12"].T                                               # (Cin, F)
    w31 = jnp.transpose(p["w31"], (3, 0, 1, 2)).reshape(F, 9 * F)  # (O, kh*kw*I)
    w32 = jnp.transpose(p["w32"], (3, 0, 1, 2)).reshape(F, 9 * F)

    def _full_spec(shape):
        return pl.BlockSpec(shape, lambda n, _s=shape: (0,) * len(_s))

    out = pl.pallas_call(
        functools.partial(_deepres_kernel, sW=sW),
        out_shape=jax.ShapeDtypeStruct((N, Cin, sHW), x_nchw.dtype),
        grid=(N,),
        in_specs=[
            pl.BlockSpec((1, Cin, HW), lambda n: (n, 0, 0)),   # x (per sample)
            _full_spec((HW, sHW)),                             # upsample selector
            _full_spec((2, sHW)),                              # wrap masks
            _full_spec((Cin, 1)), _full_spec((Cin, 1)),        # g1, b1
            _full_spec((F, Cin)), _full_spec((F, 1)),          # w11, bias
            _full_spec((F, 1)), _full_spec((F, 1)),            # g2, b2
            _full_spec((F, 9 * F)), _full_spec((F, 1)),        # w31, bias
            _full_spec((F, 1)), _full_spec((F, 1)),            # g3, b3
            _full_spec((F, 9 * F)), _full_spec((F, 1)),        # w32, bias
            _full_spec((F, 1)), _full_spec((F, 1)),            # g4, b4
            _full_spec((Cin, F)), _full_spec((Cin, 1)),        # w12, bias
        ],
        out_specs=pl.BlockSpec((1, Cin, sHW), lambda n: (n, 0, 0)),
        compiler_params=pltpu.CompilerParams(
            dimension_semantics=("parallel",)),
    )(x, S, M,
      as_col(p["g1"]), as_col(p["b1"]), w11, as_col(p["bw11"]),
      as_col(p["g2"]), as_col(p["b2"]),
      w31, as_col(p["bw31"]), as_col(p["g3"]), as_col(p["b3"]),
      w32, as_col(p["bw32"]), as_col(p["g4"]), as_col(p["b4"]),
      w12, as_col(p["bw12"]))

    return out.reshape(N, Cin, sH, sW)             # free reshape back to NCHW


# ----------------------------------------------------------------------------
# Pure-JAX reference (NHWC) for correctness checking.
# ----------------------------------------------------------------------------
def upsample_nearest(x, scale):
    x = jnp.repeat(x, scale, axis=1)
    x = jnp.repeat(x, scale, axis=2)
    return x


def _ref_gn_hs(x, g, b):
    mean = jnp.mean(x, axis=(1, 2, 3), keepdims=True)
    var = jnp.mean((x - mean) ** 2, axis=(1, 2, 3), keepdims=True)
    y = (x - mean) * lax.rsqrt(var + EPS) * g.reshape(1, 1, 1, -1) + b.reshape(1, 1, 1, -1)
    return _hardswish(y)


def _ref_conv(x, w, b, pad):
    # w: (kh, kw, Cin, Cout)
    y = lax.conv_general_dilated(
        x, w, window_strides=(1, 1), padding=pad,
        dimension_numbers=("NHWC", "HWIO", "NHWC"))
    return y + b.reshape(1, 1, 1, -1)


def deepres_reference(x_nchw, p, scale):
    x = jnp.transpose(x_nchw, (0, 2, 3, 1))
    _x = upsample_nearest(x, scale)
    x = _ref_gn_hs(x, p["g1"], p["b1"])
    x = _ref_conv(x, p["w11"].reshape(1, 1, *p["w11"].shape), p["bw11"], "VALID")
    x = _ref_gn_hs(x, p["g2"], p["b2"])
    x = upsample_nearest(x, scale)
    x = _ref_conv(x, p["w31"], p["bw31"], "SAME")
    x = _ref_gn_hs(x, p["g3"], p["b3"])
    x = _ref_conv(x, p["w32"], p["bw32"], "SAME")
    x = _ref_gn_hs(x, p["g4"], p["b4"])
    x = _ref_conv(x, p["w12"].reshape(1, 1, *p["w12"].shape), p["bw12"], "VALID")
    return jnp.transpose(x + _x, (0, 3, 1, 2))


def init_params(key, in_ch, feature):
    ks = jax.random.split(key, 16)

    def unif(k, shape, fan_in):
        bound = 1.0 / jnp.sqrt(float(fan_in))
        return jax.random.uniform(k, shape, jnp.float32, -bound, bound)

    return {
        # conv1_1: in_ch -> feature, 1x1     (stored as (Cin, Cout))
        "w11": unif(ks[0], (in_ch, feature), in_ch),
        "bw11": unif(ks[1], (feature,), in_ch),
        # conv1_2: feature -> in_ch, 1x1
        "w12": unif(ks[2], (feature, in_ch), feature),
        "bw12": unif(ks[3], (in_ch,), feature),
        # conv3_1 / conv3_2: feature -> feature, 3x3 (stored HWIO (3,3,Cin,Cout))
        "w31": unif(ks[4], (3, 3, feature, feature), feature * 9),
        "bw31": unif(ks[5], (feature,), feature * 9),
        "w32": unif(ks[6], (3, 3, feature, feature), feature * 9),
        "bw32": unif(ks[7], (feature,), feature * 9),
        # GroupNorm affine params (perturbed from default so the test is non-trivial)
        "g1": 1.0 + 0.1 * jax.random.normal(ks[8], (in_ch,), jnp.float32),
        "b1": 0.1 * jax.random.normal(ks[9], (in_ch,), jnp.float32),
        "g2": 1.0 + 0.1 * jax.random.normal(ks[10], (feature,), jnp.float32),
        "b2": 0.1 * jax.random.normal(ks[11], (feature,), jnp.float32),
        "g3": 1.0 + 0.1 * jax.random.normal(ks[12], (feature,), jnp.float32),
        "b3": 0.1 * jax.random.normal(ks[13], (feature,), jnp.float32),
        "g4": 1.0 + 0.1 * jax.random.normal(ks[14], (feature,), jnp.float32),
        "b4": 0.1 * jax.random.normal(ks[15], (feature,), jnp.float32),
    }


if __name__ == "__main__":
    N, in_ch, feature, H, W, scale = 2, 4, 8, 16, 16, 2

    key = jax.random.PRNGKey(0)
    kx, kp = jax.random.split(key)
    x = jax.random.normal(kx, (N, in_ch, H, W), jnp.float32)   # NCHW, like PyTorch
    params = init_params(kp, in_ch, feature)

    fwd = jax.jit(lambda a: deepres_forward(a, params, scale))
    out = jax.block_until_ready(fwd(x))

    assert out.shape == (N, in_ch, H * scale, W * scale), out.shape

    ref = jax.block_until_ready(
        jax.jit(lambda a: deepres_reference(a, params, scale))(x))
    max_err = float(jnp.max(jnp.abs(out - ref)))
    assert max_err < 2e-3, f"mismatch vs reference: {max_err}"

    print("KERNEL_OK")
</pallas_src>

<mosaic_0001>
module attributes {stable_mosaic.version = 11 : i64} {
  func.func @_deepres_kernel(%arg0: i32, %arg1: memref<1x4x256xf32, #tpu.memory_space<vmem>>, %arg2: memref<256x1024xf32, #tpu.memory_space<vmem>>, %arg3: memref<2x1024xf32, #tpu.memory_space<vmem>>, %arg4: memref<4x1xf32, #tpu.memory_space<vmem>>, %arg5: memref<4x1xf32, #tpu.memory_space<vmem>>, %arg6: memref<8x4xf32, #tpu.memory_space<vmem>>, %arg7: memref<8x1xf32, #tpu.memory_space<vmem>>, %arg8: memref<8x1xf32, #tpu.memory_space<vmem>>, %arg9: memref<8x1xf32, #tpu.memory_space<vmem>>, %arg10: memref<8x72xf32, #tpu.memory_space<vmem>>, %arg11: memref<8x1xf32, #tpu.memory_space<vmem>>, %arg12: memref<8x1xf32, #tpu.memory_space<vmem>>, %arg13: memref<8x1xf32, #tpu.memory_space<vmem>>, %arg14: memref<8x72xf32, #tpu.memory_space<vmem>>, %arg15: memref<8x1xf32, #tpu.memory_space<vmem>>, %arg16: memref<8x1xf32, #tpu.memory_space<vmem>>, %arg17: memref<8x1xf32, #tpu.memory_space<vmem>>, %arg18: memref<4x8xf32, #tpu.memory_space<vmem>>, %arg19: memref<4x1xf32, #tpu.memory_space<vmem>>, %arg20: memref<1x4x1024xf32, #tpu.memory_space<vmem>>) attributes {dimension_semantics = [#tpu.dimension_semantics<parallel>], iteration_bounds = array<i64: 2>, scalar_prefetch = 0 : i64, scratch_operands = 0 : i64, tpu.core_type = #tpu.core_type<tc>, window_params = [{transform_indices = @transform_0, window_bounds = array<i64: 1, 4, 256>}, {pipeline_mode = #tpu.pipeline_mode<synchronous>, transform_indices = @transform_1, window_bounds = array<i64: 256, 1024>}, {pipeline_mode = #tpu.pipeline_mode<synchronous>, transform_indices = @transform_2, window_bounds = array<i64: 2, 1024>}, {pipeline_mode = #tpu.pipeline_mode<synchronous>, transform_indices = @transform_3, window_bounds = array<i64: 4, 1>}, {pipeline_mode = #tpu.pipeline_mode<synchronous>, transform_indices = @transform_4, window_bounds = array<i64: 4, 1>}, {pipeline_mode = #tpu.pipeline_mode<synchronous>, transform_indices = @transform_5, window_bounds = array<i64: 8, 4>}, {pipeline_mode = #tpu.pipeline_mode<synchronous>, transform_indices = @transform_6, window_bounds = array<i64: 8, 1>}, {pipeline_mode = #tpu.pipeline_mode<synchronous>, transform_indices = @transform_7, window_bounds = array<i64: 8, 1>}, {pipeline_mode = #tpu.pipeline_mode<synchronous>, transform_indices = @transform_8, window_bounds = array<i64: 8, 1>}, {pipeline_mode = #tpu.pipeline_mode<synchronous>, transform_indices = @transform_9, window_bounds = array<i64: 8, 72>}, {pipeline_mode = #tpu.pipeline_mode<synchronous>, transform_indices = @transform_10, window_bounds = array<i64: 8, 1>}, {pipeline_mode = #tpu.pipeline_mode<synchronous>, transform_indices = @transform_11, window_bounds = array<i64: 8, 1>}, {pipeline_mode = #tpu.pipeline_mode<synchronous>, transform_indices = @transform_12, window_bounds = array<i64: 8, 1>}, {pipeline_mode = #tpu.pipeline_mode<synchronous>, transform_indices = @transform_13, window_bounds = array<i64: 8, 72>}, {pipeline_mode = #tpu.pipeline_mode<synchronous>, transform_indices = @transform_14, window_bounds = array<i64: 8, 1>}, {pipeline_mode = #tpu.pipeline_mode<synchronous>, transform_indices = @transform_15, window_bounds = array<i64: 8, 1>}, {pipeline_mode = #tpu.pipeline_mode<synchronous>, transform_indices = @transform_16, window_bounds = array<i64: 8, 1>}, {pipeline_mode = #tpu.pipeline_mode<synchronous>, transform_indices = @transform_17, window_bounds = array<i64: 4, 8>}, {pipeline_mode = #tpu.pipeline_mode<synchronous>, transform_indices = @transform_18, window_bounds = array<i64: 4, 1>}, {transform_indices = @transform_19, window_bounds = array<i64: 1, 4, 1024>}]} {
    %c0 = arith.constant 0 : index
    %c0_0 = arith.constant 0 : index
    %c0_1 = arith.constant 0 : index
    %0 = vector.load %arg1[%c0, %c0_0, %c0_1] : memref<1x4x256xf32, #tpu.memory_space<vmem>>, vector<1x4x256xf32>
    %1 = vector.shape_cast %0 : vector<1x4x256xf32> to vector<4x256xf32>
    %c0_2 = arith.constant 0 : index
    %c0_3 = arith.constant 0 : index
    %2 = vector.load %arg2[%c0_2, %c0_3] : memref<256x1024xf32, #tpu.memory_space<vmem>>, vector<256x1024xf32>
    %cst = arith.constant dense<0.000000e+00> : vector<4x1024xf32>
    %3 = tpu.matmul %1, %2, %cst {dimension_numbers = #tpu.dot_dimension_numbers<[1], [0], [0], [1], [0, 0, 1, 1], [], []>} : vector<4x256xf32>, vector<256x1024xf32>, vector<4x1024xf32> -> vector<4x1024xf32>
    %c0_4 = arith.constant 0 : index
    %c0_5 = arith.constant 0 : index
    %4 = vector.load %arg3[%c0_4, %c0_5] : memref<2x1024xf32, #tpu.memory_space<vmem>>, vector<2x1024xf32>
    %5 = vector.extract_strided_slice %4 {offsets = [0, 0], sizes = [1, 1024], strides = [1, 1]} : vector<2x1024xf32> to vector<1x1024xf32>
    %6 = vector.extract_strided_slice %4 {offsets = [1, 0], sizes = [1, 1024], strides = [1, 1]} : vector<2x1024xf32> to vector<1x1024xf32>
    %c0_6 = arith.constant 0 : index
    %c0_7 = arith.constant 0 : index
    %7 = vector.load %arg4[%c0_6, %c0_7] : memref<4x1xf32, #tpu.memory_space<vmem>>, vector<4x1xf32>
    %c0_8 = arith.constant 0 : index
    %c0_9 = arith.constant 0 : index
    %8 = vector.load %arg5[%c0_8, %c0_9] : memref<4x1xf32, #tpu.memory_space<vmem>>, vector<4x1xf32>
    %9 = vector.shape_cast %1 : vector<4x256xf32> to vector<1x4x256xf32>
    %cst_10 = arith.constant dense<0.000000e+00> : vector<1xf32>
    %10 = vector.multi_reduction <add>, %9, %cst_10 [1, 2] : vector<1x4x256xf32> to vector<1xf32>
    %11 = vector.shape_cast %10 : vector<1xf32> to vector<1x1x1xf32>
    %12 = vector.extract %11[0, 0, 0] : f32 from vector<1x1x1xf32>
    %13 = arith.mulf %1, %1 : vector<4x256xf32>
    %14 = vector.shape_cast %13 : vector<4x256xf32> to vector<1x4x256xf32>
    %cst_11 = arith.constant dense<0.000000e+00> : vector<1xf32>
    %15 = vector.multi_reduction <add>, %14, %cst_11 [1, 2] : vector<1x4x256xf32> to vector<1xf32>
    %16 = vector.shape_cast %15 : vector<1xf32> to vector<1x1x1xf32>
    %17 = vector.extract %16[0, 0, 0] : f32 from vector<1x1x1xf32>
    %cst_12 = arith.constant 1.024000e+03 : f32
    %18 = arith.divf %12, %cst_12 : f32
    %cst_13 = arith.constant 1.024000e+03 : f32
    %19 = arith.divf %17, %cst_13 : f32
    %20 = arith.mulf %18, %18 : f32
    %21 = arith.subf %19, %20 : f32
    %22 = vector.broadcast %18 : f32 to vector<4x256xf32>
    %23 = arith.subf %1, %22 : vector<4x256xf32>
    %cst_14 = arith.constant 9.99999974E-6 : f32
    %24 = arith.addf %21, %cst_14 : f32
    %25 = math.rsqrt %24 : f32
    %26 = vector.broadcast %25 : f32 to vector<4x256xf32>
    %27 = arith.mulf %23, %26 : vector<4x256xf32>
    %28 = vector.broadcast %7 : vector<4x1xf32> to vector<4x256xf32>
    %29 = arith.mulf %27, %28 : vector<4x256xf32>
    %30 = vector.broadcast %8 : vector<4x1xf32> to vector<4x256xf32>
    %31 = arith.addf %29, %30 : vector<4x256xf32>
    %cst_15 = arith.constant 3.000000e+00 : f32
    %32 = vector.broadcast %cst_15 : f32 to vector<4x256xf32>
    %33 = arith.addf %31, %32 : vector<4x256xf32>
    %cst_16 = arith.constant 0.000000e+00 : f32
    %cst_17 = arith.constant 6.000000e+00 : f32
    %34 = vector.broadcast %cst_16 : f32 to vector<4x256xf32>
    %35 = arith.maximumf %34, %33 : vector<4x256xf32>
    %36 = vector.broadcast %cst_17 : f32 to vector<4x256xf32>
    %37 = arith.minimumf %36, %35 : vector<4x256xf32>
    %38 = arith.mulf %31, %37 : vector<4x256xf32>
    %cst_18 = arith.constant 0.166666672 : f32
    %39 = vector.broadcast %cst_18 : f32 to vector<4x256xf32>
    %40 = arith.mulf %38, %39 : vector<4x256xf32>
    %c0_19 = arith.constant 0 : index
    %c0_20 = arith.constant 0 : index
    %41 = vector.load %arg6[%c0_19, %c0_20] : memref<8x4xf32, #tpu.memory_space<vmem>>, vector<8x4xf32>
    %cst_21 = arith.constant dense<0.000000e+00> : vector<8x256xf32>
    %42 = tpu.matmul %41, %40, %cst_21 {dimension_numbers = #tpu.dot_dimension_numbers<[1], [0], [0], [1], [0, 0, 1, 1], [], []>} : vector<8x4xf32>, vector<4x256xf32>, vector<8x256xf32> -> vector<8x256xf32>
    %c0_22 = arith.constant 0 : index
    %c0_23 = arith.constant 0 : index
    %43 = vector.load %arg7[%c0_22, %c0_23] : memref<8x1xf32, #tpu.memory_space<vmem>>, vector<8x1xf32>
    %44 = vector.broadcast %43 : vector<8x1xf32> to vector<8x256xf32>
    %45 = arith.addf %42, %44 : vector<8x256xf32>
    %c0_24 = arith.constant 0 : index
    %c0_25 = arith.constant 0 : index
    %46 = vector.load %arg8[%c0_24, %c0_25] : memref<8x1xf32, #tpu.memory_space<vmem>>, vector<8x1xf32>
    %c0_26 = arith.constant 0 : index
    %c0_27 = arith.constant 0 : index
    %47 = vector.load %arg9[%c0_26, %c0_27] : memref<8x1xf32, #tpu.memory_space<vmem>>, vector<8x1xf32>
    %48 = vector.shape_cast %45 : vector<8x256xf32> to vector<1x8x256xf32>
    %cst_28 = arith.constant dense<0.000000e+00> : vector<1xf32>
    %49 = vector.multi_reduction <add>, %48, %cst_28 [1, 2] : vector<1x8x256xf32> to vector<1xf32>
    %50 = vector.shape_cast %49 : vector<1xf32> to vector<1x1x1xf32>
    %51 = vector.extract %50[0, 0, 0] : f32 from vector<1x1x1xf32>
    %52 = arith.mulf %45, %45 : vector<8x256xf32>
    %53 = vector.shape_cast %52 : vector<8x256xf32> to vector<1x8x256xf32>
    %cst_29 = arith.constant dense<0.000000e+00> : vector<1xf32>
    %54 = vector.multi_reduction <add>, %53, %cst_29 [1, 2] : vector<1x8x256xf32> to vector<1xf32>
    %55 = vector.shape_cast %54 : vector<1xf32> to vector<1x1x1xf32>
    %56 = vector.extract %55[0, 0, 0] : f32 from vector<1x1x1xf32>
    %cst_30 = arith.constant 2.048000e+03 : f32
    %57 = arith.divf %51, %cst_30 : f32
    %cst_31 = arith.constant 2.048000e+03 : f32
    %58 = arith.divf %56, %cst_31 : f32
    %59 = arith.mulf %57, %57 : f32
    %60 = arith.subf %58, %59 : f32
    %61 = vector.broadcast %57 : f32 to vector<8x256xf32>
    %62 = arith.subf %45, %61 : vector<8x256xf32>
    %cst_32 = arith.constant 9.99999974E-6 : f32
    %63 = arith.addf %60, %cst_32 : f32
    %64 = math.rsqrt %63 : f32
    %65 = vector.broadcast %64 : f32 to vector<8x256xf32>
    %66 = arith.mulf %62, %65 : vector<8x256xf32>
    %67 = vector.broadcast %46 : vector<8x1xf32> to vector<8x256xf32>
    %68 = arith.mulf %66, %67 : vector<8x256xf32>
    %69 = vector.broadcast %47 : vector<8x1xf32> to vector<8x256xf32>
    %70 = arith.addf %68, %69 : vector<8x256xf32>
    %cst_33 = arith.constant 3.000000e+00 : f32
    %71 = vector.broadcast %cst_33 : f32 to vector<8x256xf32>
    %72 = arith.addf %70, %71 : vector<8x256xf32>
    %cst_34 = arith.constant 0.000000e+00 : f32
    %cst_35 = arith.constant 6.000000e+00 : f32
    %73 = vector.broadcast %cst_34 : f32 to vector<8x256xf32>
    %74 = arith.maximumf %73, %72 : vector<8x256xf32>
    %75 = vector.broadcast %cst_35 : f32 to vector<8x256xf32>
    %76 = arith.minimumf %75, %74 : vector<8x256xf32>
    %77 = arith.mulf %70, %76 : vector<8x256xf32>
    %cst_36 = arith.constant 0.166666672 : f32
    %78 = vector.broadcast %cst_36 : f32 to vector<8x256xf32>
    %79 = arith.mulf %77, %78 : vector<8x256xf32>
    %cst_37 = arith.constant dense<0.000000e+00> : vector<8x1024xf32>
    %80 = tpu.matmul %79, %2, %cst_37 {dimension_numbers = #tpu.dot_dimension_numbers<[1], [0], [0], [1], [0, 0, 1, 1], [], []>} : vector<8x256xf32>, vector<256x1024xf32>, vector<8x1024xf32> -> vector<8x1024xf32>
    %c0_38 = arith.constant 0 : index
    %c0_39 = arith.constant 0 : index
    %81 = vector.load %arg10[%c0_38, %c0_39] : memref<8x72xf32, #tpu.memory_space<vmem>>, vector<8x72xf32>
    %c0_40 = arith.constant 0 : index
    %c0_41 = arith.constant 0 : index
    %82 = vector.load %arg11[%c0_40, %c0_41] : memref<8x1xf32, #tpu.memory_space<vmem>>, vector<8x1xf32>
    %cst_42 = arith.constant 0.000000e+00 : f32
    %83 = vector.broadcast %cst_42 : f32 to vector<8x33xf32>
    %84 = tpu.concatenate %83, %80, %83 in 1 : vector<8x33xf32>, vector<8x1024xf32>, vector<8x33xf32> -> vector<8x1090xf32>
    %85 = vector.extract_strided_slice %84 {offsets = [0, 0], sizes = [8, 1024], strides = [1, 1]} : vector<8x1090xf32> to vector<8x1024xf32>
    %86 = vector.broadcast %5 : vector<1x1024xf32> to vector<8x1024xf32>
    %87 = arith.mulf %85, %86 : vector<8x1024xf32>
    %88 = vector.extract_strided_slice %84 {offsets = [0, 1], sizes = [8, 1024], strides = [1, 1]} : vector<8x1090xf32> to vector<8x1024xf32>
    %89 = vector.extract_strided_slice %84 {offsets = [0, 2], sizes = [8, 1024], strides = [1, 1]} : vector<8x1090xf32> to vector<8x1024xf32>
    %90 = vector.broadcast %6 : vector<1x1024xf32> to vector<8x1024xf32>
    %91 = arith.mulf %89, %90 : vector<8x1024xf32>
    %92 = vector.extract_strided_slice %84 {offsets = [0, 32], sizes = [8, 1024], strides = [1, 1]} : vector<8x1090xf32> to vector<8x1024xf32>
    %93 = vector.broadcast %5 : vector<1x1024xf32> to vector<8x1024xf32>
    %94 = arith.mulf %92, %93 : vector<8x1024xf32>
    %95 = vector.extract_strided_slice %84 {offsets = [0, 33], sizes = [8, 1024], strides = [1, 1]} : vector<8x1090xf32> to vector<8x1024xf32>
    %96 = vector.extract_strided_slice %84 {offsets = [0, 34], sizes = [8, 1024], strides = [1, 1]} : vector<8x1090xf32> to vector<8x1024xf32>
    %97 = vector.broadcast %6 : vector<1x1024xf32> to vector<8x1024xf32>
    %98 = arith.mulf %96, %97 : vector<8x1024xf32>
    %99 = vector.extract_strided_slice %84 {offsets = [0, 64], sizes = [8, 1024], strides = [1, 1]} : vector<8x1090xf32> to vector<8x1024xf32>
    %100 = vector.broadcast %5 : vector<1x1024xf32> to vector<8x1024xf32>
    %101 = arith.mulf %99, %100 : vector<8x1024xf32>
    %102 = vector.extract_strided_slice %84 {offsets = [0, 65], sizes = [8, 1024], strides = [1, 1]} : vector<8x1090xf32> to vector<8x1024xf32>
    %103 = vector.extract_strided_slice %84 {offsets = [0, 66], sizes = [8, 1024], strides = [1, 1]} : vector<8x1090xf32> to vector<8x1024xf32>
    %104 = vector.broadcast %6 : vector<1x1024xf32> to vector<8x1024xf32>
    %105 = arith.mulf %103, %104 : vector<8x1024xf32>
    %106 = tpu.concatenate %87, %88, %91, %94, %95, %98, %101, %102, %105 in 0 : vector<8x1024xf32>, vector<8x1024xf32>, vector<8x1024xf32>, vector<8x1024xf32>, vector<8x1024xf32>, vector<8x1024xf32>, vector<8x1024xf32>, vector<8x1024xf32>, vector<8x1024xf32> -> vector<72x1024xf32>
    %cst_43 = arith.constant dense<0.000000e+00> : vector<8x1024xf32>
    %107 = tpu.matmul %81, %106, %cst_43 {dimension_numbers = #tpu.dot_dimension_numbers<[1], [0], [0], [1], [0, 0, 1, 1], [], []>} : vector<8x72xf32>, vector<72x1024xf32>, vector<8x1024xf32> -> vector<8x1024xf32>
    %108 = vector.broadcast %82 : vector<8x1xf32> to vector<8x1024xf32>
    %109 = arith.addf %107, %108 : vector<8x1024xf32>
    %c0_44 = arith.constant 0 : index
    %c0_45 = arith.constant 0 : index
    %110 = vector.load %arg12[%c0_44, %c0_45] : memref<8x1xf32, #tpu.memory_space<vmem>>, vector<8x1xf32>
    %c0_46 = arith.constant 0 : index
    %c0_47 = arith.constant 0 : index
    %111 = vector.load %arg13[%c0_46, %c0_47] : memref<8x1xf32, #tpu.memory_space<vmem>>, vector<8x1xf32>
    %112 = vector.shape_cast %109 : vector<8x1024xf32> to vector<1x8x1024xf32>
    %cst_48 = arith.constant dense<0.000000e+00> : vector<1xf32>
    %113 = vector.multi_reduction <add>, %112, %cst_48 [1, 2] : vector<1x8x1024xf32> to vector<1xf32>
    %114 = vector.shape_cast %113 : vector<1xf32> to vector<1x1x1xf32>
    %115 = vector.extract %114[0, 0, 0] : f32 from vector<1x1x1xf32>
    %116 = arith.mulf %109, %109 : vector<8x1024xf32>
    %117 = vector.shape_cast %116 : vector<8x1024xf32> to vector<1x8x1024xf32>
    %cst_49 = arith.constant dense<0.000000e+00> : vector<1xf32>
    %118 = vector.multi_reduction <add>, %117, %cst_49 [1, 2] : vector<1x8x1024xf32> to vector<1xf32>
    %119 = vector.shape_cast %118 : vector<1xf32> to vector<1x1x1xf32>
    %120 = vector.extract %119[0, 0, 0] : f32 from vector<1x1x1xf32>
    %cst_50 = arith.constant 8.192000e+03 : f32
    %121 = arith.divf %115, %cst_50 : f32
    %cst_51 = arith.constant 8.192000e+03 : f32
    %122 = arith.divf %120, %cst_51 : f32
    %123 = arith.mulf %121, %121 : f32
    %124 = arith.subf %122, %123 : f32
    %125 = vector.broadcast %121 : f32 to vector<8x1024xf32>
    %126 = arith.subf %109, %125 : vector<8x1024xf32>
    %cst_52 = arith.constant 9.99999974E-6 : f32
    %127 = arith.addf %124, %cst_52 : f32
    %128 = math.rsqrt %127 : f32
    %129 = vector.broadcast %128 : f32 to vector<8x1024xf32>
    %130 = arith.mulf %126, %129 : vector<8x1024xf32>
    %131 = vector.broadcast %110 : vector<8x1xf32> to vector<8x1024xf32>
    %132 = arith.mulf %130, %131 : vector<8x1024xf32>
    %133 = vector.broadcast %111 : vector<8x1xf32> to vector<8x1024xf32>
    %134 = arith.addf %132, %133 : vector<8x1024xf32>
    %cst_53 = arith.constant 3.000000e+00 : f32
    %135 = vector.broadcast %cst_53 : f32 to vector<8x1024xf32>
    %136 = arith.addf %134, %135 : vector<8x1024xf32>
    %cst_54 = arith.constant 0.000000e+00 : f32
    %cst_55 = arith.constant 6.000000e+00 : f32
    %137 = vector.broadcast %cst_54 : f32 to vector<8x1024xf32>
    %138 = arith.maximumf %137, %136 : vector<8x1024xf32>
    %139 = vector.broadcast %cst_55 : f32 to vector<8x1024xf32>
    %140 = arith.minimumf %139, %138 : vector<8x1024xf32>
    %141 = arith.mulf %134, %140 : vector<8x1024xf32>
    %cst_56 = arith.constant 0.166666672 : f32
    %142 = vector.broadcast %cst_56 : f32 to vector<8x1024xf32>
    %143 = arith.mulf %141, %142 : vector<8x1024xf32>
    %c0_57 = arith.constant 0 : index
    %c0_58 = arith.constant 0 : index
    %144 = vector.load %arg14[%c0_57, %c0_58] : memref<8x72xf32, #tpu.memory_space<vmem>>, vector<8x72xf32>
    %c0_59 = arith.constant 0 : index
    %c0_60 = arith.constant 0 : index
    %145 = vector.load %arg15[%c0_59, %c0_60] : memref<8x1xf32, #tpu.memory_space<vmem>>, vector<8x1xf32>
    %cst_61 = arith.constant 0.000000e+00 : f32
    %146 = vector.broadcast %cst_61 : f32 to vector<8x33xf32>
    %147 = tpu.concatenate %146, %143, %146 in 1 : vector<8x33xf32>, vector<8x1024xf32>, vector<8x33xf32> -> vector<8x1090xf32>
    %148 = vector.extract_strided_slice %147 {offsets = [0, 0], sizes = [8, 1024], strides = [1, 1]} : vector<8x1090xf32> to vector<8x1024xf32>
    %149 = vector.broadcast %5 : vector<1x1024xf32> to vector<8x1024xf32>
    %150 = arith.mulf %148, %149 : vector<8x1024xf32>
    %151 = vector.extract_strided_slice %147 {offsets = [0, 1], sizes = [8, 1024], strides = [1, 1]} : vector<8x1090xf32> to vector<8x1024xf32>
    %152 = vector.extract_strided_slice %147 {offsets = [0, 2], sizes = [8, 1024], strides = [1, 1]} : vector<8x1090xf32> to vector<8x1024xf32>
    %153 = vector.broadcast %6 : vector<1x1024xf32> to vector<8x1024xf32>
    %154 = arith.mulf %152, %153 : vector<8x1024xf32>
    %155 = vector.extract_strided_slice %147 {offsets = [0, 32], sizes = [8, 1024], strides = [1, 1]} : vector<8x1090xf32> to vector<8x1024xf32>
    %156 = vector.broadcast %5 : vector<1x1024xf32> to vector<8x1024xf32>
    %157 = arith.mulf %155, %156 : vector<8x1024xf32>
    %158 = vector.extract_strided_slice %147 {offsets = [0, 33], sizes = [8, 1024], strides = [1, 1]} : vector<8x1090xf32> to vector<8x1024xf32>
    %159 = vector.extract_strided_slice %147 {offsets = [0, 34], sizes = [8, 1024], strides = [1, 1]} : vector<8x1090xf32> to vector<8x1024xf32>
    %160 = vector.broadcast %6 : vector<1x1024xf32> to vector<8x1024xf32>
    %161 = arith.mulf %159, %160 : vector<8x1024xf32>
    %162 = vector.extract_strided_slice %147 {offsets = [0, 64], sizes = [8, 1024], strides = [1, 1]} : vector<8x1090xf32> to vector<8x1024xf32>
    %163 = vector.broadcast %5 : vector<1x1024xf32> to vector<8x1024xf32>
    %164 = arith.mulf %162, %163 : vector<8x1024xf32>
    %165 = vector.extract_strided_slice %147 {offsets = [0, 65], sizes = [8, 1024], strides = [1, 1]} : vector<8x1090xf32> to vector<8x1024xf32>
    %166 = vector.extract_strided_slice %147 {offsets = [0, 66], sizes = [8, 1024], strides = [1, 1]} : vector<8x1090xf32> to vector<8x1024xf32>
    %167 = vector.broadcast %6 : vector<1x1024xf32> to vector<8x1024xf32>
    %168 = arith.mulf %166, %167 : vector<8x1024xf32>
    %169 = tpu.concatenate %150, %151, %154, %157, %158, %161, %164, %165, %168 in 0 : vector<8x1024xf32>, vector<8x1024xf32>, vector<8x1024xf32>, vector<8x1024xf32>, vector<8x1024xf32>, vector<8x1024xf32>, vector<8x1024xf32>, vector<8x1024xf32>, vector<8x1024xf32> -> vector<72x1024xf32>
    %cst_62 = arith.constant dense<0.000000e+00> : vector<8x1024xf32>
    %170 = tpu.matmul %144, %169, %cst_62 {dimension_numbers = #tpu.dot_dimension_numbers<[1], [0], [0], [1], [0, 0, 1, 1], [], []>} : vector<8x72xf32>, vector<72x1024xf32>, vector<8x1024xf32> -> vector<8x1024xf32>
    %171 = vector.broadcast %145 : vector<8x1xf32> to vector<8x1024xf32>
    %172 = arith.addf %170, %171 : vector<8x1024xf32>
    %c0_63 = arith.constant 0 : index
    %c0_64 = arith.constant 0 : index
    %173 = vector.load %arg16[%c0_63, %c0_64] : memref<8x1xf32, #tpu.memory_space<vmem>>, vector<8x1xf32>
    %c0_65 = arith.constant 0 : index
    %c0_66 = arith.constant 0 : index
    %174 = vector.load %arg17[%c0_65, %c0_66] : memref<8x1xf32, #tpu.memory_space<vmem>>, vector<8x1xf32>
    %175 = vector.shape_cast %172 : vector<8x1024xf32> to vector<1x8x1024xf32>
    %cst_67 = arith.constant dense<0.000000e+00> : vector<1xf32>
    %176 = vector.multi_reduction <add>, %175, %cst_67 [1, 2] : vector<1x8x1024xf32> to vector<1xf32>
    %177 = vector.shape_cast %176 : vector<1xf32> to vector<1x1x1xf32>
    %178 = vector.extract %177[0, 0, 0] : f32 from vector<1x1x1xf32>
    %179 = arith.mulf %172, %172 : vector<8x1024xf32>
    %180 = vector.shape_cast %179 : vector<8x1024xf32> to vector<1x8x1024xf32>
    %cst_68 = arith.constant dense<0.000000e+00> : vector<1xf32>
    %181 = vector.multi_reduction <add>, %180, %cst_68 [1, 2] : vector<1x8x1024xf32> to vector<1xf32>
    %182 = vector.shape_cast %181 : vector<1xf32> to vector<1x1x1xf32>
    %183 = vector.extract %182[0, 0, 0] : f32 from vector<1x1x1xf32>
    %cst_69 = arith.constant 8.192000e+03 : f32
    %184 = arith.divf %178, %cst_69 : f32
    %cst_70 = arith.constant 8.192000e+03 : f32
    %185 = arith.divf %183, %cst_70 : f32
    %186 = arith.mulf %184, %184 : f32
    %187 = arith.subf %185, %186 : f32
    %188 = vector.broadcast %184 : f32 to vector<8x1024xf32>
    %189 = arith.subf %172, %188 : vector<8x1024xf32>
    %cst_71 = arith.constant 9.99999974E-6 : f32
    %190 = arith.addf %187, %cst_71 : f32
    %191 = math.rsqrt %190 : f32
    %192 = vector.broadcast %191 : f32 to vector<8x1024xf32>
    %193 = arith.mulf %189, %192 : vector<8x1024xf32>
    %194 = vector.broadcast %173 : vector<8x1xf32> to vector<8x1024xf32>
    %195 = arith.mulf %193, %194 : vector<8x1024xf32>
    %196 = vector.broadcast %174 : vector<8x1xf32> to vector<8x1024xf32>
    %197 = arith.addf %195, %196 : vector<8x1024xf32>
    %cst_72 = arith.constant 3.000000e+00 : f32
    %198 = vector.broadcast %cst_72 : f32 to vector<8x1024xf32>
    %199 = arith.addf %197, %198 : vector<8x1024xf32>
    %cst_73 = arith.constant 0.000000e+00 : f32
    %cst_74 = arith.constant 6.000000e+00 : f32
    %200 = vector.broadcast %cst_73 : f32 to vector<8x1024xf32>
    %201 = arith.maximumf %200, %199 : vector<8x1024xf32>
    %202 = vector.broadcast %cst_74 : f32 to vector<8x1024xf32>
    %203 = arith.minimumf %202, %201 : vector<8x1024xf32>
    %204 = arith.mulf %197, %203 : vector<8x1024xf32>
    %cst_75 = arith.constant 0.166666672 : f32
    %205 = vector.broadcast %cst_75 : f32 to vector<8x1024xf32>
    %206 = arith.mulf %204, %205 : vector<8x1024xf32>
    %c0_76 = arith.constant 0 : index
    %c0_77 = arith.constant 0 : index
    %207 = vector.load %arg18[%c0_76, %c0_77] : memref<4x8xf32, #tpu.memory_space<vmem>>, vector<4x8xf32>
    %cst_78 = arith.constant dense<0.000000e+00> : vector<4x1024xf32>
    %208 = tpu.matmul %207, %206, %cst_78 {dimension_numbers = #tpu.dot_dimension_numbers<[1], [0], [0], [1], [0, 0, 1, 1], [], []>} : vector<4x8xf32>, vector<8x1024xf32>, vector<4x1024xf32> -> vector<4x1024xf32>
    %c0_79 = arith.constant 0 : index
    %c0_80 = arith.constant 0 : index
    %209 = vector.load %arg19[%c0_79, %c0_80] : memref<4x1xf32, #tpu.memory_space<vmem>>, vector<4x1xf32>
    %210 = vector.broadcast %209 : vector<4x1xf32> to vector<4x1024xf32>
    %211 = arith.addf %208, %210 : vector<4x1024xf32>
    %212 = arith.addf %211, %3 : vector<4x1024xf32>
    %213 = vector.shape_cast %212 : vector<4x1024xf32> to vector<1x4x1024xf32>
    %c0_81 = arith.constant 0 : index
    %c0_82 = arith.constant 0 : index
    %c0_83 = arith.constant 0 : index
    %214 = vector.load %arg20[%c0_81, %c0_82, %c0_83] : memref<1x4x1024xf32, #tpu.memory_space<vmem>>, vector<1x4x1024xf32>
    tpu.vector_store %arg20[%c0_81, %c0_82, %c0_83], %213 {strides = array<i32>} : memref<1x4x1024xf32, #tpu.memory_space<vmem>>, vector<1x4x1024xf32>,
    return
  }
  func.func @transform_0(%arg0: i32) -> (i32, i32, i32) {
    %c0_i32 = arith.constant 0 : i32
    %c0_i32_0 = arith.constant 0 : i32
    %c0_i32_1 = arith.constant 0 : i32
    return %arg0, %c0_i32, %c0_i32_0 : i32, i32, i32
  }
  func.func @transform_1(%arg0: i32) -> (i32, i32) {
    %c0_i32 = arith.constant 0 : i32
    %c0_i32_0 = arith.constant 0 : i32
    %c0_i32_1 = arith.constant 0 : i32
    return %c0_i32, %c0_i32_0 : i32, i32
  }
  func.func @transform_2(%arg0: i32) -> (i32, i32) {
    %c0_i32 = arith.constant 0 : i32
    %c0_i32_0 = arith.constant 0 : i32
    %c0_i32_1 = arith.constant 0 : i32
    return %c0_i32, %c0_i32_0 : i32, i32
  }
  func.func @transform_3(%arg0: i32) -> (i32, i32) {
    %c0_i32 = arith.constant 0 : i32
    %c0_i32_0 = arith.constant 0 : i32
    %c0_i32_1 = arith.constant 0 : i32
    return %c0_i32, %c0_i32_0 : i32, i32
  }
  func.func @transform_4(%arg0: i32) -> (i32, i32) {
    %c0_i32 = arith.constant 0 : i32
    %c0_i32_0 = arith.constant 0 : i32
    %c0_i32_1 = arith.constant 0 : i32
    return %c0_i32, %c0_i32_0 : i32, i32
  }
  func.func @transform_5(%arg0: i32) -> (i32, i32) {
    %c0_i32 = arith.constant 0 : i32
    %c0_i32_0 = arith.constant 0 : i32
    %c0_i32_1 = arith.constant 0 : i32
    return %c0_i32, %c0_i32_0 : i32, i32
  }
  func.func @transform_6(%arg0: i32) -> (i32, i32) {
    %c0_i32 = arith.constant 0 : i32
    %c0_i32_0 = arith.constant 0 : i32
    %c0_i32_1 = arith.constant 0 : i32
    return %c0_i32, %c0_i32_0 : i32, i32
  }
  func.func @transform_7(%arg0: i32) -> (i32, i32) {
    %c0_i32 = arith.constant 0 : i32
    %c0_i32_0 = arith.constant 0 : i32
    %c0_i32_1 = arith.constant 0 : i32
    return %c0_i32, %c0_i32_0 : i32, i32
  }
  func.func @transform_8(%arg0: i32) -> (i32, i32) {
    %c0_i32 = arith.constant 0 : i32
    %c0_i32_0 = arith.constant 0 : i32
    %c0_i32_1 = arith.constant 0 : i32
    return %c0_i32, %c0_i32_0 : i32, i32
  }
  func.func @transform_9(%arg0: i32) -> (i32, i32) {
    %c0_i32 = arith.constant 0 : i32
    %c0_i32_0 = arith.constant 0 : i32
    %c0_i32_1 = arith.constant 0 : i32
    return %c0_i32, %c0_i32_0 : i32, i32
  }
  func.func @transform_10(%arg0: i32) -> (i32, i32) {
    %c0_i32 = arith.constant 0 : i32
    %c0_i32_0 = arith.constant 0 : i32
    %c0_i32_1 = arith.constant 0 : i32
    return %c0_i32, %c0_i32_0 : i32, i32
  }
  func.func @transform_11(%arg0: i32) -> (i32, i32) {
    %c0_i32 = arith.constant 0 : i32
    %c0_i32_0 = arith.constant 0 : i32
    %c0_i32_1 = arith.constant 0 : i32
    return %c0_i32, %c0_i32_0 : i32, i32
  }
  func.func @transform_12(%arg0: i32) -> (i32, i32) {
    %c0_i32 = arith.constant 0 : i32
    %c0_i32_0 = arith.constant 0 : i32
    %c0_i32_1 = arith.constant 0 : i32
    return %c0_i32, %c0_i32_0 : i32, i32
  }
  func.func @transform_13(%arg0: i32) -> (i32, i32) {
    %c0_i32 = arith.constant 0 : i32
    %c0_i32_0 = arith.constant 0 : i32
    %c0_i32_1 = arith.constant 0 : i32
    return %c0_i32, %c0_i32_0 : i32, i32
  }
  func.func @transform_14(%arg0: i32) -> (i32, i32) {
    %c0_i32 = arith.constant 0 : i32
    %c0_i32_0 = arith.constant 0 : i32
    %c0_i32_1 = arith.constant 0 : i32
    return %c0_i32, %c0_i32_0 : i32, i32
  }
  func.func @transform_15(%arg0: i32) -> (i32, i32) {
    %c0_i32 = arith.constant 0 : i32
    %c0_i32_0 = arith.constant 0 : i32
    %c0_i32_1 = arith.constant 0 : i32
    return %c0_i32, %c0_i32_0 : i32, i32
  }
  func.func @transform_16(%arg0: i32) -> (i32, i32) {
    %c0_i32 = arith.constant 0 : i32
    %c0_i32_0 = arith.constant 0 : i32
    %c0_i32_1 = arith.constant 0 : i32
    return %c0_i32, %c0_i32_0 : i32, i32
  }
  func.func @transform_17(%arg0: i32) -> (i32, i32) {
    %c0_i32 = arith.constant 0 : i32
    %c0_i32_0 = arith.constant 0 : i32
    %c0_i32_1 = arith.constant 0 : i32
    return %c0_i32, %c0_i32_0 : i32, i32
  }
  func.func @transform_18(%arg0: i32) -> (i32, i32) {
    %c0_i32 = arith.constant 0 : i32
    %c0_i32_0 = arith.constant 0 : i32
    %c0_i32_1 = arith.constant 0 : i32
    return %c0_i32, %c0_i32_0 : i32, i32
  }
  func.func @transform_19(%arg0: i32) -> (i32, i32, i32) {
    %c0_i32 = arith.constant 0 : i32
    %c0_i32_0 = arith.constant 0 : i32
    %c0_i32_1 = arith.constant 0 : i32
    return %arg0, %c0_i32, %c0_i32_0 : i32, i32, i32
  }
}

</mosaic_0001>

<bundles_post_ra>
// kernel: _lambda_.1
= control target key start
LH: loop header
LB: loop body
LE: loop exit
PB: predicated region body
PF: predicated region fallthrough
CT: control target
= control target key end

     0   :  { %s6286_s0 = inlined_call_operand.vmem [shape: f32[2,4,256], index: 0, kind: input, shape index: {}]   ;;  %s6287_s1 = inlined_call_operand.hbm [shape: f32[256,1024], index: 1, kind: input, shape index: {}]   ;;  %s6288_s2 = inlined_call_operand.vmem [shape: f32[2,1024], index: 2, kind: input, shape index: {}]   ;;  %s6289_s3 = inlined_call_operand.vmem [shape: f32[4,1], index: 3, kind: input, shape index: {}]   ;;  %s6290_s4 = inlined_call_operand.vmem [shape: f32[4,1], index: 4, kind: input, shape index: {}]   ;;  %s6291_s5 = inlined_call_operand.vmem [shape: f32[8,4], index: 5, kind: input, shape index: {}]   ;;  %s6292_s6 = inlined_call_operand.vmem [shape: f32[8,1], index: 6, kind: input, shape index: {}]   ;;  %s6293_s7 = inlined_call_operand.vmem [shape: f32[8,1], index: 7, kind: input, shape index: {}]   ;;  %s6294_s8 = inlined_call_operand.vmem [shape: f32[8,1], index: 8, kind: input, shape index: {}]   ;;  %s6295_s9 = inlined_call_operand.vmem [shape: f32[8,72], index: 9, kind: input, shape index: {}]   ;;  %s6296_s10 = inlined_call_operand.vmem [shape: f32[8,1], index: 10, kind: input, shape index: {}]   ;;  %s6297_s11 = inlined_call_operand.vmem [shape: f32[8,1], index: 11, kind: input, shape index: {}]   ;;  %s6298_s12 = inlined_call_operand.vmem [shape: f32[8,1], index: 12, kind: input, shape index: {}]   ;;  %s6299_s13 = inlined_call_operand.vmem [shape: f32[8,72], index: 13, kind: input, shape index: {}]   ;;  %s6300_s14 = inlined_call_operand.vmem [shape: f32[8,1], index: 14, kind: input, shape index: {}]   ;;  %s6301_s15 = inlined_call_operand.vmem [shape: f32[8,1], index: 15, kind: input, shape index: {}]   ;;  %s6302_s16 = inlined_call_operand.vmem [shape: f32[8,1], index: 16, kind: input, shape index: {}]   ;;  %s6303_s17 = inlined_call_operand.vmem [shape: f32[4,8], index: 17, kind: input, shape index: {}]   ;;  %s6304_s18 = inlined_call_operand.vmem [shape: f32[4,1], index: 18, kind: input, shape index: {}]   ;;  %s6305_s19 = inlined_call_operand.vmem [shape: f32[2,4,1024], index: 19, kind: output, shape index: {}]  }
   0x1   :  { %6379 = sst [smem:[#allocation45_spill]] %s6286_s0 }
   0x2   :  { %6380 = sst [smem:[#allocation46_spill]] %s6287_s1 }
   0x3   :  { %6381 = sst [smem:[#allocation47_spill]] %s6288_s2 }
   0x4   :  { %6382 = sst [smem:[#allocation48_spill]] %s6289_s3 }
   0x5   :  { %24 = vsyncpa [#allocation3], 0  ;;  %s4508_s0 = smov 0  }
   0x6 LB: > { %s6383_s21 = sld [smem:[#allocation46_spill]]  ;;  %s3768_s22 = sadd.s32 4294967295, %s4385_s0   ;;  %s4385_s0 = sphi %s4508_s0, %s30_s0  }
   0x7   : > { %p3770_p0 = scmp.ge.s32.totalorder %s4385_s0, 1  ;;  %p465_p1 = scmp.lt.s32.totalorder %s4385_s0, 3 }
   0x8   : > { %p3849_p2 = scmp.eq.s32.totalorder %s3768_s22, 0  ;;  %s4387_s2 = smov [#allocation2]  }
   0x9   : > { %p466_p3 = pnand %p3770_p0, %p465_p1  ;;  %s478_s23 = sshll.u32 %s4387_s2, 4  ;;  %s479_s23 = int_to_ptr.vmem [resolvable:$true] %s478_s23 }
   0xa   : > { %s4388_s24 = smov 1024   ;;  %s4389_s25 = smov 64  }
   0xb   : > { %p3845_p4 = pneg %p466_p3  ;;  %553 = sbr.rel (%p466_p3) target bundleno = 2543 (0x9ef), region = 96 }
   0xc   : > { %s476_s1 = sshll.u32 %s6383_s21, 4  ;;  %s477_s1 = int_to_ptr.hbm [resolvable:$true] %s476_s1 }
   0xd   : > { %p3846_p5 = pnand %p3849_p2, %p3845_p4 }
   0xf   : > { %3848 = dma.hbm_to_vmem [thread:$0]  (!%p3846_p5), %s477_s1, 32768, %s479_s23, [#allocation3], %s4388_s24, %s4388_s24, %s4389_s25  }
  0x10   : > { %4380 = dma.done.wait (%p3849_p2), [#allocation3], 32768  }
  0x11   : > { %4382 = vsyncadd (%p3849_p2), [#allocation3], 4294934528  ;;  %p610_p6 = scmp.lt.s32.totalorder %s3768_s22, 1  ;;  %s6384_s28 = sld [smem:[#allocation45_spill]]  ;;  %vm1212_vm0 = vcmask 1043456   ;;  %v4390_v14 = vmov 0  }
  0x12   : > { %3880 = vset.pattern.permute.xlu1 %v4390_v14  ;;  %s6385_s21 = sld [smem:[#allocation48_spill]]  ;;  %3881 = vset.pattern.permute.xlu2 %v4390_v14  ;;  %v1206_v16 = vld [vmem:[%s6290_s4] sm:$0xf]  ;;  %v741_v17 = vld [vmem:[#allocation2 + $0x3c0] sm:$0xff]  ;;  %v4391_v24 = vmov 1024.0   ;;  %vm1317_vm5 = vcmask 31744  }
  0x13   : > { %s6532_s22 = smov (!%p610_p6, %s3768_s22), 1  ;;  %3882 = vset.pattern.permute.xlu0 %v4390_v14  ;;  %v869_v18 = vld [vmem:[#allocation2 + $0x7c0] sm:$0xff]  ;;  %883 = vmatpush.msra.mxu0 %v741_v17  ;;  %v1365_v23 = vld [vmem:[%s6293_s7] sm:$0xff]  ;;  %4203 = vrcp.f32 %v4391_v24  ;;  %v727_v14 = vld [vmem:[#allocation2 + $0x350] sm:$0xff]  ;;  %s6410_s24 = sld [smem:[#allocation47_spill]]  ;;  %vm2075_vm10 = vcmask 539648  }
  0x14   : > { %s3809_s3 = sshll.u32 %s6532_s22, 3  ;;  %903 = vmatpush.msra.mxu1 %v869_v18  ;;  %v733_v19 = vld [vmem:[#allocation2 + $0x380] sm:$0xff]  ;;  %v847_v17 = vld [vmem:[#allocation2 + $0x710] sm:$0xff]  ;;  %vm1991_vm11 = vcmask 277504   ;;  %vm1949_vm12 = vcmask 261120   ;;  %vm2033_vm13 = vcmask 523264  }
  0x15   : > { %v861_v20 = vld [vmem:[#allocation2 + $0x780] sm:$0xff]  ;;  %884 = vmatpush.msra.mxu0 %v733_v19  ;;  %v711_v18 = vld [vmem:[#allocation2 + $0x2d0] sm:$0xff]  ;;  %vm1899_vm14 = vcmask 15360   ;;  %vm1798_vm15 = vcmask 269312   ;;  %s6343_s23 = smov 94  }
  0x16   : > { %v725_v21 = vld [vmem:[#allocation2 + $0x340] sm:$0xff]  ;;  %904 = vmatpush.msra.mxu1 %v861_v20  ;;  %v839_v19 = vld [vmem:[#allocation2 + $0x6d0] sm:$0xff] }
  0x17   : > { %s614_s29 = scalar_lea.vmem %s6384_s28, %s3809_s3  ;;  %v853_v22 = vld [vmem:[#allocation2 + $0x740] sm:$0xff]  ;;  %885 = vmatpush.msra.mxu0 %v725_v21  ;;  %v703_v20 = vld [vmem:[#allocation2 + $0x290] sm:$0xff] }
  0x18   : > { %v4525_v0 = vld [vmem:[%s614_s29] sm:$0xff]  ;;  %v717_v25 = vld [vmem:[#allocation2 + $0x300] sm:$0xff]  ;;  %905 = vmatpush.msra.mxu1 %v853_v22  ;;  %v831_v21 = vld [vmem:[#allocation2 + $0x690] sm:$0xff] }
  0x19   : > { %878 = vst [vmem:[#allocation1] ss:$2 sm:$0xff] %v4525_v0  ;;  %v1225_v3 = vmul.f32 %v4525_v0, %v4525_v0  ;;  %v1205_v15 = vld [vmem:[%s6385_s21] sm:$0xf]  ;;  %v845_v26 = vld [vmem:[#allocation2 + $0x700] sm:$0xff]  ;;  %886 = vmatpush.msra.mxu0 %v717_v25  ;;  %v4204_v31 = vpop.eup %4203  ;;  %v695_v22 = vld [vmem:[#allocation2 + $0x250] sm:$0xff] }
  0x1a   : > { %1283 = vperm.xlu1 %3880, %v1205_v15   ;;  %v709_v27 = vld [vmem:[#allocation2 + $0x2c0] sm:$0xff]  ;;  %906 = vmatpush.msra.mxu1 %v845_v26  ;;  %v1245_v39 = vmul.f32 1024.0, %v4204_v31  ;;  %vm1249_vm1 = vweird.f32 %v4204_v31  ;;  %v855_v15 = vld [vmem:[#allocation2 + $0x750] sm:$0xff] }
  0x1b   : > { %v837_v28 = vld [vmem:[#allocation2 + $0x6c0] sm:$0xff]  ;;  %887 = vmatpush.msra.mxu0 %v709_v27  ;;  %v687_v24 = vld [vmem:[#allocation2 + $0x210] sm:$0xff] }
  0x1c   : > { %v701_v29 = vld [vmem:[#allocation2 + $0x280] sm:$0xff]  ;;  %907 = vmatpush.msra.mxu1 %v837_v28  ;;  %v1246_v46 = vsub.f32 1.0, %v1245_v39  ;;  %v815_v25 = vld [vmem:[#allocation2 + $0x610] sm:$0xff] }
  0x1d   : > { %v829_v30 = vld [vmem:[#allocation2 + $0x680] sm:$0xff]  ;;  %888 = vmatpush.msra.mxu0 %v701_v29  ;;  %v679_v26 = vld [vmem:[#allocation2 + $0x1d0] sm:$0xff] }
  0x1e   : > { %v693_v33 = vld [vmem:[#allocation2 + $0x240] sm:$0xff]  ;;  %908 = vmatpush.msra.mxu1 %v829_v30  ;;  %v1247_v54 = vmul.f32 %v4204_v31, %v1246_v46  ;;  %v807_v27 = vld [vmem:[#allocation2 + $0x5d0] sm:$0xff] }
  0x1f   : > { %v821_v34 = vld [vmem:[#allocation2 + $0x640] sm:$0xff]  ;;  %889 = vmatpush.msra.mxu0 %v693_v33  ;;  %v671_v28 = vld [vmem:[#allocation2 + $0x190] sm:$0xff] }
  0x20   : > { %v4528_v1 = vld.sshfl [vmem:[#allocation1] sm:$0xff pattern:$0x75316420]  ;;  %v4530_v2 = vld.sshfl [vmem:[#allocation1 + $0x8] sm:$0xff pattern:$0x75316420]  ;;  %909 = vmatpush.msra.mxu1 %v821_v34  ;;  %v1248_v57 = vadd.f32 %v4204_v31, %v1247_v54 }
  0x21   : > { %1207 = vst [vmem:[#allocation1] ss:$2 sm:$0xff] %v4525_v0  ;;  %v685_v36 = vld [vmem:[#allocation2 + $0x200] sm:$0xff]  ;;  %v799_v29 = vld [vmem:[#allocation2 + $0x590] sm:$0xff] }
  0x22   : > { %1293 = vperm.xlu1 %3880, %v1206_v16   ;;  %v813_v37 = vld [vmem:[#allocation2 + $0x600] sm:$0xff]  ;;  %890 = vmatpush.msra.mxu0 %v685_v36  ;;  %v1250_v60 = vsel %vm1249_vm1, %v4204_v31, %v1248_v57  ;;  %v719_v16 = vld [vmem:[#allocation2 + $0x310] sm:$0xff]  ;;  %vm2410_vm1 = vcmask 506880  }
  0x23   : > { %v677_v40 = vld [vmem:[#allocation2 + $0x1c0] sm:$0xff]  ;;  %910 = vmatpush.msra.mxu1 %v813_v37  ;;  %v663_v30 = vld [vmem:[#allocation2 + $0x150] sm:$0xff] }
  0x24   : > { %v805_v41 = vld [vmem:[#allocation2 + $0x5c0] sm:$0xff]  ;;  %891 = vmatpush.msra.mxu0 %v677_v40  ;;  %v791_v31 = vld [vmem:[#allocation2 + $0x550] sm:$0xff] }
  0x25   : > { %v669_v43 = vld [vmem:[#allocation2 + $0x180] sm:$0xff]  ;;  %911 = vmatpush.msra.mxu1 %v805_v41  ;;  %v783_v33 = vld [vmem:[#allocation2 + $0x510] sm:$0xff] }
  0x26   : > { %v797_v44 = vld [vmem:[#allocation2 + $0x580] sm:$0xff]  ;;  %892 = vmatpush.msra.mxu0 %v669_v43  ;;  %v647_v34 = vld [vmem:[#allocation2 + $0xd0] sm:$0xff] }
  0x27   : > { %v661_v48 = vld [vmem:[#allocation2 + $0x140] sm:$0xff]  ;;  %912 = vmatpush.msra.mxu1 %v797_v44  ;;  %v639_v36 = vld [vmem:[#allocation2 + $0x90] sm:$0xff] }
  0x28   : > { %v1208_v4 = vld.sshfl [vmem:[#allocation1] sm:$0xff pattern:$0x75316420]  ;;  %v1209_v5 = vld.sshfl [vmem:[#allocation1 + $0x8] sm:$0xff pattern:$0x75316420]  ;;  %893 = vmatpush.msra.mxu0 %v661_v48 }
  0x29   : > { %v1213_v6 = vsel %vm1212_vm0, %v1208_v4, 0.0  ;;  %v1214_v7 = vsel %vm1212_vm0, %v1209_v5, 0.0  ;;  %1227 = vst [vmem:[#allocation1] ss:$2 sm:$0xff] %v1225_v3  ;;  %v789_v49 = vld [vmem:[#allocation2 + $0x540] sm:$0xff]  ;;  %v767_v37 = vld [vmem:[#allocation2 + $0x490] sm:$0xff] }
  0x2a   : > { %v1215_v8 = vadd.f32 %v1214_v7, %v1213_v6  ;;  %1430 = vperm.xlu1 %3880, %v1365_v23   ;;  %913 = vmatpush.msra.mxu1 %v789_v49  ;;  %v653_v61 = vld [vmem:[#allocation2 + $0x100] sm:$0xff]  ;;  %v823_v23 = vld [vmem:[#allocation2 + $0x650] sm:$0xff] }
  0x2b   : > { %v781_v62 = vld [vmem:[#allocation2 + $0x500] sm:$0xff]  ;;  %894 = vmatpush.msra.mxu0 %v653_v61  ;;  %v759_v39 = vld [vmem:[#allocation2 + $0x450] sm:$0xff] }
  0x2c   : > { %1216 = vadd.xlane.f32.xlu0 %v1215_v8  ;;  %v645_v63 = vld [vmem:[#allocation2 + $0xc0] sm:$0xff]  ;;  %914 = vmatpush.msra.mxu1 %v781_v62  ;;  %v623_v40 = vld [vmem:[#allocation2 + $0x10] sm:$0xff] }
  0x2d   : > { %v773_v3 = vld [vmem:[#allocation2 + $0x4c0] sm:$0xff]  ;;  %895 = vmatpush.msra.mxu0 %v645_v63  ;;  %v751_v41 = vld [vmem:[#allocation2 + $0x410] sm:$0xff] }
  0x2e   : > { %v637_v4 = vld [vmem:[#allocation2 + $0x80] sm:$0xff]  ;;  %915 = vmatpush.msra.mxu1 %v773_v3 }
  0x2f   : > { %v765_v5 = vld [vmem:[#allocation2 + $0x480] sm:$0xff]  ;;  %896 = vmatpush.msra.mxu0 %v637_v4 }
  0x30   : > { %v1228_v9 = vld.sshfl [vmem:[#allocation1] sm:$0xff pattern:$0x75316420]  ;;  %v1229_v10 = vld.sshfl [vmem:[#allocation1 + $0x8] sm:$0xff pattern:$0x75316420]  ;;  %916 = vmatpush.msra.mxu1 %v765_v5 }
  0x31   : > { %v1232_v11 = vsel %vm1212_vm0, %v1228_v9, 0.0  ;;  %v1233_v12 = vsel %vm1212_vm0, %v1229_v10, 0.0  ;;  %v629_v6 = vld [vmem:[#allocation2 + $0x40] sm:$0xff]  ;;  %v743_v10 = vld [vmem:[#allocation2 + $0x3d0] sm:$0xff] }
  0x32   : > { %v1234_v13 = vadd.f32 %v1233_v12, %v1232_v11  ;;  %v757_v7 = vld [vmem:[#allocation2 + $0x440] sm:$0xff]  ;;  %897 = vmatpush.msra.mxu0 %v629_v6  ;;  %v871_v11 = vld [vmem:[#allocation2 + $0x7d0] sm:$0xff] }
  0x33   : > { %917 = vmatpush.msra.mxu1 %v757_v7  ;;  %v621_v8 = vld [vmem:[#allocation2] sm:$0xff]  ;;  %v735_v12 = vld [vmem:[#allocation2 + $0x390] sm:$0xff] }
  0x34   : > { %1235 = vadd.xlane.f32.xlu0 %v1234_v13  ;;  %v749_v9 = vld [vmem:[#allocation2 + $0x400] sm:$0xff]  ;;  %898 = vmatpush.msra.mxu0 %v621_v8  ;;  %v863_v13 = vld [vmem:[#allocation2 + $0x790] sm:$0xff] }
  0x35   : > { %918 = vmatpush.msra.mxu1 %v749_v9  ;;  %899 = vmatmul.f32.vlgmr.msra.gmra.mxu0 %v4528_v1  ;;  %v873_v43 = vld [vmem:[#allocation2 + $0x7e0] sm:$0xff] }
  0x36   : > { %963 = vmatpush.msrb.mxu0 %v743_v10  ;;  %919 = vmatmul.f32.vlgmr.msra.gmra.mxu1 %v4530_v2  ;;  %v737_v44 = vld [vmem:[#allocation2 + $0x3a0] sm:$0xff] }
  0x37   : > { %983 = vmatpush.msrb.mxu1 %v871_v11  ;;  %v729_v46 = vld [vmem:[#allocation2 + $0x360] sm:$0xff] }
  0x38   : > { %964 = vmatpush.msrb.mxu0 %v735_v12  ;;  %v721_v48 = vld [vmem:[#allocation2 + $0x320] sm:$0xff] }
  0x39   : > { %984 = vmatpush.msrb.mxu1 %v863_v13  ;;  %v849_v49 = vld [vmem:[#allocation2 + $0x720] sm:$0xff] }
  0x3a   : > { %965 = vmatpush.msrb.mxu0 %v727_v14  ;;  %v833_v54 = vld [vmem:[#allocation2 + $0x6a0] sm:$0xff] }
  0x3b   : > { %985 = vmatpush.msrb.mxu1 %v855_v15  ;;  %v689_v57 = vld [vmem:[#allocation2 + $0x220] sm:$0xff] }
  0x3c   : > { %966 = vmatpush.msrb.mxu0 %v719_v16  ;;  %v809_v61 = vld [vmem:[#allocation2 + $0x5e0] sm:$0xff] }
  0x3d   : > { %986 = vmatpush.msrb.mxu1 %v847_v17  ;;  %v673_v63 = vld [vmem:[#allocation2 + $0x1a0] sm:$0xff] }
  0x3e   : > { %967 = vmatpush.msrb.mxu0 %v711_v18  ;;  %v801_v3 = vld [vmem:[#allocation2 + $0x5a0] sm:$0xff] }
  0x3f   : > { %987 = vmatpush.msrb.mxu1 %v839_v19  ;;  %v665_v5 = vld [vmem:[#allocation2 + $0x160] sm:$0xff] }
  0x40   : > { %968 = vmatpush.msrb.mxu0 %v703_v20  ;;  %v793_v6 = vld [vmem:[#allocation2 + $0x560] sm:$0xff] }
  0x41   : > { %988 = vmatpush.msrb.mxu1 %v831_v21  ;;  %v657_v8 = vld [vmem:[#allocation2 + $0x120] sm:$0xff]  ;;  %v747_v21 = vld [vmem:[#allocation2 + $0x3f0] sm:$0xff] }
  0x42   : > { %969 = vmatpush.msrb.mxu0 %v695_v22  ;;  %v785_v9 = vld [vmem:[#allocation2 + $0x520] sm:$0xff]  ;;  %v875_v22 = vld [vmem:[#allocation2 + $0x7f0] sm:$0xff] }
  0x43   : > { %989 = vmatpush.msrb.mxu1 %v823_v23  ;;  %v649_v11 = vld [vmem:[#allocation2 + $0xe0] sm:$0xff]  ;;  %v739_v23 = vld [vmem:[#allocation2 + $0x3b0] sm:$0xff] }
  0x44   : > { %970 = vmatpush.msrb.mxu0 %v687_v24  ;;  %v777_v12 = vld [vmem:[#allocation2 + $0x4e0] sm:$0xff]  ;;  %v867_v24 = vld [vmem:[#allocation2 + $0x7b0] sm:$0xff] }
  0x45   : > { %990 = vmatpush.msrb.mxu1 %v815_v25  ;;  %v641_v14 = vld [vmem:[#allocation2 + $0xa0] sm:$0xff]  ;;  %v731_v25 = vld [vmem:[#allocation2 + $0x370] sm:$0xff] }
  0x46   : > { %971 = vmatpush.msrb.mxu0 %v679_v26  ;;  %v769_v15 = vld [vmem:[#allocation2 + $0x4a0] sm:$0xff]  ;;  %v859_v26 = vld [vmem:[#allocation2 + $0x770] sm:$0xff] }
  0x47   : > { %991 = vmatpush.msrb.mxu1 %v807_v27  ;;  %v633_v17 = vld [vmem:[#allocation2 + $0x60] sm:$0xff]  ;;  %v723_v27 = vld [vmem:[#allocation2 + $0x330] sm:$0xff] }
  0x48   : > { %972 = vmatpush.msrb.mxu0 %v671_v28  ;;  %v761_v18 = vld [vmem:[#allocation2 + $0x460] sm:$0xff]  ;;  %v851_v28 = vld [vmem:[#allocation2 + $0x730] sm:$0xff] }
  0x49   : > { %992 = vmatpush.msrb.mxu1 %v799_v29  ;;  %v625_v19 = vld [vmem:[#allocation2 + $0x20] sm:$0xff]  ;;  %v715_v29 = vld [vmem:[#allocation2 + $0x2f0] sm:$0xff] }
  0x4a   : > { %973 = vmatpush.msrb.mxu0 %v663_v30  ;;  %v753_v20 = vld [vmem:[#allocation2 + $0x420] sm:$0xff]  ;;  %v843_v30 = vld [vmem:[#allocation2 + $0x6f0] sm:$0xff] }
  0x4b   : > { %993 = vmatpush.msrb.mxu1 %v791_v31  ;;  %v707_v31 = vld [vmem:[#allocation2 + $0x2b0] sm:$0xff] }
  0x4d   : > { %994 = vmatpush.msrb.mxu1 %v783_v33  ;;  %v699_v33 = vld [vmem:[#allocation2 + $0x270] sm:$0xff] }
  0x9f   : > { %v1217_v32 = vpop.xlane.xlu0 %1216 }
  0xa0   : > { %v1218_v35 = vrot.slane %v1217_v32, 4 }
  0xa2   : > { %v1219_v38 = vadd.f32 %v1218_v35, %v1217_v32  ;;  %v655_v32 = vld [vmem:[#allocation2 + $0x110] sm:$0xff] }
  0xa3   : > { %v775_v35 = vld [vmem:[#allocation2 + $0x4d0] sm:$0xff]  ;;  %974 = vmatpush.msrb.mxu0 %v655_v32 }
  0xa4   : > { %v1220_v42 = vrot.slane %v1219_v38, 2  ;;  %995 = vmatpush.msrb.mxu1 %v775_v35  ;;  %v835_v32 = vld [vmem:[#allocation2 + $0x6b0] sm:$0xff] }
  0xa5   : > { %975 = vmatpush.msrb.mxu0 %v647_v34  ;;  %v827_v34 = vld [vmem:[#allocation2 + $0x670] sm:$0xff] }
  0xa6   : > { %v1221_v45 = vadd.f32 %v1220_v42, %v1219_v38  ;;  %v631_v38 = vld [vmem:[#allocation2 + $0x50] sm:$0xff]  ;;  %996 = vmatpush.msrb.mxu1 %v767_v37  ;;  %v745_v42 = vld [vmem:[#allocation2 + $0x3e0] sm:$0xff] }
  0xa7   : > { %v1236_v47 = vpop.xlane.xlu0 %1235  ;;  %976 = vmatpush.msrb.mxu0 %v639_v36  ;;  %v691_v35 = vld [vmem:[#allocation2 + $0x230] sm:$0xff] }
  0xa8   : > { %v1237_v50 = vrot.slane %v1236_v47, 4  ;;  %v1222_v51 = vrot.slane %v1221_v45, 1  ;;  %997 = vmatpush.msrb.mxu1 %v759_v39  ;;  %v819_v36 = vld [vmem:[#allocation2 + $0x630] sm:$0xff] }
  0xa9   : > { %977 = vmatpush.msrb.mxu0 %v631_v38  ;;  %v683_v37 = vld [vmem:[#allocation2 + $0x1f0] sm:$0xff] }
  0xaa   : > { %v1238_v52 = vadd.f32 %v1237_v50, %v1236_v47  ;;  %v1223_v53 = vadd.f32 %v1222_v51, %v1221_v45  ;;  %998 = vmatpush.msrb.mxu1 %v751_v41  ;;  %v865_v45 = vld [vmem:[#allocation2 + $0x7a0] sm:$0xff]  ;;  %v811_v38 = vld [vmem:[#allocation2 + $0x5f0] sm:$0xff] }
  0xab   : > { %978 = vmatpush.msrb.mxu0 %v623_v40  ;;  %v857_v47 = vld [vmem:[#allocation2 + $0x760] sm:$0xff]  ;;  %999 = vmatmul.f32.vlgmr.msrb.gmra.mxu1 %v4530_v2  ;;  %v675_v39 = vld [vmem:[#allocation2 + $0x1b0] sm:$0xff] }
  0xac   : > { %v1239_v55 = vrot.slane %v1238_v52, 2  ;;  %3811 = vpush %v1223_v53  ;;  %1063 = vmatpush.msra.mxu1 %v873_v43  ;;  %979 = vmatmul.f32.vlgmr.msrb.gmra.mxu0 %v4528_v1  ;;  %v713_v50 = vld [vmem:[#allocation2 + $0x2e0] sm:$0xff]  ;;  %v803_v40 = vld [vmem:[#allocation2 + $0x5b0] sm:$0xff] }
  0xad   : > { %1043 = vmatpush.msra.mxu0 %v745_v42  ;;  %v841_v51 = vld [vmem:[#allocation2 + $0x6e0] sm:$0xff]  ;;  %v667_v41 = vld [vmem:[#allocation2 + $0x170] sm:$0xff] }
  0xae   : > { %v1240_v56 = vadd.f32 %v1239_v55, %v1238_v52  ;;  %1064 = vmatpush.msra.mxu1 %v865_v45  ;;  %v705_v53 = vld [vmem:[#allocation2 + $0x2a0] sm:$0xff]  ;;  %v795_v42 = vld [vmem:[#allocation2 + $0x570] sm:$0xff] }
  0xaf   : > { %1044 = vmatpush.msra.mxu0 %v737_v44  ;;  %v697_v55 = vld [vmem:[#allocation2 + $0x260] sm:$0xff]  ;;  %v659_v43 = vld [vmem:[#allocation2 + $0x130] sm:$0xff] }
  0xb0   : > { %v1241_v58 = vrot.slane %v1240_v56, 1  ;;  %1065 = vmatpush.msra.mxu1 %v857_v47  ;;  %v787_v44 = vld [vmem:[#allocation2 + $0x530] sm:$0xff] }
  0xb1   : > { %1045 = vmatpush.msra.mxu0 %v729_v46  ;;  %v651_v45 = vld [vmem:[#allocation2 + $0xf0] sm:$0xff] }
  0xb2   : > { %v1242_v59 = vadd.f32 %v1241_v58, %v1240_v56  ;;  %1066 = vmatpush.msra.mxu1 %v849_v49  ;;  %v825_v56 = vld [vmem:[#allocation2 + $0x660] sm:$0xff]  ;;  %v779_v46 = vld [vmem:[#allocation2 + $0x4f0] sm:$0xff] }
  0xb3   : > { %1046 = vmatpush.msra.mxu0 %v721_v48  ;;  %v817_v58 = vld [vmem:[#allocation2 + $0x620] sm:$0xff]  ;;  %v643_v47 = vld [vmem:[#allocation2 + $0xb0] sm:$0xff] }
  0xb4   : > { %3813 = vpush %v1242_v59  ;;  %1067 = vmatpush.msra.mxu1 %v841_v51  ;;  %v771_v48 = vld [vmem:[#allocation2 + $0x4b0] sm:$0xff] }
  0xb5   : > { %3815 = vpush %v1250_v60  ;;  %1047 = vmatpush.msra.mxu0 %v713_v50  ;;  %v681_v60 = vld [vmem:[#allocation2 + $0x1e0] sm:$0xff]  ;;  %v635_v49 = vld [vmem:[#allocation2 + $0x70] sm:$0xff] }
  0xb6   : > { %1068 = vmatpush.msra.mxu1 %v833_v54  ;;  %v763_v50 = vld [vmem:[#allocation2 + $0x470] sm:$0xff]  ;;  %v4392_v54 = vmov 839922192  }
  0xb7   : > { %1048 = vmatpush.msra.mxu0 %v705_v53  ;;  %v627_v51 = vld [vmem:[#allocation2 + $0x30] sm:$0xff]  ;;  %v1284_v53 = vpop.permute.xlu1 %1283 }
  0xb8   : > { %1069 = vmatpush.msra.mxu1 %v825_v56  ;;  %v1307_v56 = vld [vmem:[%s6292_s6] sm:$0xff] }
  0xb9   : > { %1049 = vmatpush.msra.mxu0 %v697_v55  ;;  %v1286_v55 = vunpack.c.l.s4 %v4392_v54  ;;  %1310 = vperm.xlu2 %3881, %v1307_v56  }
  0xba   : > { %1070 = vmatpush.msra.mxu1 %v817_v58 }
  0xbb   : > { %1050 = vmatpush.msra.mxu0 %v689_v57  ;;  %v1287_v58 = vunpack.c.0.s8 %v1286_v55 }
  0xbc   : > { %1071 = vmatpush.msra.mxu1 %v809_v61 }
  0xbd   : > { %1051 = vmatpush.msra.mxu0 %v681_v60  ;;  %v1288_v61 = vperm.slane %v1284_v53, %v1287_v58  ;;  %v766_v53 = vld [vmem:[#allocation2 + $0x488] sm:$0xff] }
  0xbe   : > { %1072 = vmatpush.msra.mxu1 %v801_v3 }
  0xbf   : > { %1052 = vmatpush.msra.mxu0 %v673_v63  ;;  %v1294_v63 = vpop.permute.xlu1 %1293 }
  0xc0   : > { %1073 = vmatpush.msra.mxu1 %v793_v6  ;;  %v1298_v3 = vperm.slane %v1294_v63, %v1287_v58  ;;  %v758_v63 = vld [vmem:[#allocation2 + $0x448] sm:$0xff] }
  0xc1   : > { %1053 = vmatpush.msra.mxu0 %v665_v5 }
  0xc2   : > { %1074 = vmatpush.msra.mxu1 %v785_v9 }
  0xc3   : > { %1054 = vmatpush.msra.mxu0 %v657_v8 }
  0xc4   : > { %1075 = vmatpush.msra.mxu1 %v777_v12  ;;  %v920_v12 = vpop.f32.mrf.mxu1 }
  0xc5   : > { %1055 = vmatpush.msra.mxu0 %v649_v11  ;;  %v900_v11 = vpop.f32.mrf.mxu0 }
  0xc6   : > { %1076 = vmatpush.msra.mxu1 %v769_v15 }
  0xc7   : > { %1056 = vmatpush.msra.mxu0 %v641_v14 }
  0xc8   : > { %1077 = vmatpush.msra.mxu1 %v761_v18 }
  0xc9   : > { %1057 = vmatpush.msra.mxu0 %v633_v17 }
  0xca   : > { %1078 = vmatpush.msra.mxu1 %v753_v20 }
  0xcb   : > { %1058 = vmatpush.msra.mxu0 %v625_v19  ;;  %1079 = vmatmul.f32.vlgmr.msra.gmra.mxu1 %v4530_v2 }
  0xcc   : > { %1143 = vmatpush.msrb.mxu1 %v875_v22  ;;  %1059 = vmatmul.f32.vlgmr.msra.gmra.mxu0 %v4528_v1 }
  0xcd   : > { %1123 = vmatpush.msrb.mxu0 %v747_v21 }
  0xce   : > { %1144 = vmatpush.msrb.mxu1 %v867_v24 }
  0xcf   : > { %1124 = vmatpush.msrb.mxu0 %v739_v23 }
  0xd0   : > { %1145 = vmatpush.msrb.mxu1 %v859_v26  ;;  %v870_v26 = vld [vmem:[#allocation2 + $0x7c8] sm:$0xff] }
  0xd1   : > { %1125 = vmatpush.msrb.mxu0 %v731_v25  ;;  %v742_v25 = vld [vmem:[#allocation2 + $0x3c8] sm:$0xff]  ;;  %943 = vmatpush.msra.mxu3 %v870_v26 }
  0xd2   : > { %1146 = vmatpush.msrb.mxu1 %v851_v28  ;;  %923 = vmatpush.msra.mxu2 %v742_v25  ;;  %v862_v28 = vld [vmem:[#allocation2 + $0x788] sm:$0xff] }
  0xd3   : > { %1126 = vmatpush.msrb.mxu0 %v723_v27  ;;  %v734_v27 = vld [vmem:[#allocation2 + $0x388] sm:$0xff]  ;;  %944 = vmatpush.msra.mxu3 %v862_v28 }
  0xd4   : > { %1147 = vmatpush.msrb.mxu1 %v843_v30  ;;  %v854_v30 = vld [vmem:[#allocation2 + $0x748] sm:$0xff]  ;;  %924 = vmatpush.msra.mxu2 %v734_v27 }
  0xd5   : > { %1127 = vmatpush.msrb.mxu0 %v715_v29  ;;  %v726_v29 = vld [vmem:[#allocation2 + $0x348] sm:$0xff]  ;;  %945 = vmatpush.msra.mxu3 %v854_v30 }
  0xd6   : > { %1148 = vmatpush.msrb.mxu1 %v835_v32  ;;  %v846_v32 = vld [vmem:[#allocation2 + $0x708] sm:$0xff]  ;;  %925 = vmatpush.msra.mxu2 %v726_v29 }
  0xd7   : > { %1128 = vmatpush.msrb.mxu0 %v707_v31  ;;  %v718_v31 = vld [vmem:[#allocation2 + $0x308] sm:$0xff]  ;;  %946 = vmatpush.msra.mxu3 %v846_v32 }
  0xd8   : > { %1149 = vmatpush.msrb.mxu1 %v827_v34  ;;  %v838_v34 = vld [vmem:[#allocation2 + $0x6c8] sm:$0xff]  ;;  %926 = vmatpush.msra.mxu2 %v718_v31 }
  0xd9   : > { %1129 = vmatpush.msrb.mxu0 %v699_v33  ;;  %v710_v33 = vld [vmem:[#allocation2 + $0x2c8] sm:$0xff]  ;;  %947 = vmatpush.msra.mxu3 %v838_v34 }
  0xda   : > { %1150 = vmatpush.msrb.mxu1 %v819_v36  ;;  %v830_v36 = vld [vmem:[#allocation2 + $0x688] sm:$0xff]  ;;  %927 = vmatpush.msra.mxu2 %v710_v33 }
  0xdb   : > { %1130 = vmatpush.msrb.mxu0 %v691_v35  ;;  %v702_v35 = vld [vmem:[#allocation2 + $0x288] sm:$0xff]  ;;  %948 = vmatpush.msra.mxu3 %v830_v36 }
  0xdc   : > { %1151 = vmatpush.msrb.mxu1 %v811_v38  ;;  %v822_v38 = vld [vmem:[#allocation2 + $0x648] sm:$0xff]  ;;  %928 = vmatpush.msra.mxu2 %v702_v35 }
  0xdd   : > { %s3812_s25 = spop %3811  ;;  %1131 = vmatpush.msrb.mxu0 %v683_v37  ;;  %v694_v37 = vld [vmem:[#allocation2 + $0x248] sm:$0xff]  ;;  %949 = vmatpush.msra.mxu3 %v822_v38 }
  0xde   : > { %1152 = vmatpush.msrb.mxu1 %v803_v40  ;;  %v814_v40 = vld [vmem:[#allocation2 + $0x608] sm:$0xff]  ;;  %929 = vmatpush.msra.mxu2 %v694_v37 }
  0xdf   : > { %1132 = vmatpush.msrb.mxu0 %v675_v39  ;;  %v686_v39 = vld [vmem:[#allocation2 + $0x208] sm:$0xff]  ;;  %950 = vmatpush.msra.mxu3 %v814_v40 }
  0xe0   : > { %1153 = vmatpush.msrb.mxu1 %v795_v42  ;;  %v806_v42 = vld [vmem:[#allocation2 + $0x5c8] sm:$0xff]  ;;  %930 = vmatpush.msra.mxu2 %v686_v39 }
  0xe1   : > { %1133 = vmatpush.msrb.mxu0 %v667_v41  ;;  %v678_v41 = vld [vmem:[#allocation2 + $0x1c8] sm:$0xff]  ;;  %951 = vmatpush.msra.mxu3 %v806_v42 }
  0xe2   : > { %1154 = vmatpush.msrb.mxu1 %v787_v44  ;;  %v798_v44 = vld [vmem:[#allocation2 + $0x588] sm:$0xff]  ;;  %931 = vmatpush.msra.mxu2 %v678_v41 }
  0xe3   : > { %1134 = vmatpush.msrb.mxu0 %v659_v43  ;;  %v670_v43 = vld [vmem:[#allocation2 + $0x188] sm:$0xff]  ;;  %952 = vmatpush.msra.mxu3 %v798_v44 }
  0xe4   : > { %1155 = vmatpush.msrb.mxu1 %v779_v46  ;;  %v790_v46 = vld [vmem:[#allocation2 + $0x548] sm:$0xff]  ;;  %932 = vmatpush.msra.mxu2 %v670_v43 }
  0xe5   : > { %s3814_s3 = spop %3813  ;;  %1135 = vmatpush.msrb.mxu0 %v651_v45  ;;  %v662_v45 = vld [vmem:[#allocation2 + $0x148] sm:$0xff]  ;;  %953 = vmatpush.msra.mxu3 %v790_v46 }
  0xe6   : > { %s3816_s26 = spop %3815  ;;  %1156 = vmatpush.msrb.mxu1 %v771_v48  ;;  %v782_v48 = vld [vmem:[#allocation2 + $0x508] sm:$0xff]  ;;  %933 = vmatpush.msra.mxu2 %v662_v45 }
  0xe7   : > { %s4550_s27 = smul.f32 %s3816_s26, %s3812_s25  ;;  %1136 = vmatpush.msrb.mxu0 %v643_v47  ;;  %v654_v47 = vld [vmem:[#allocation2 + $0x108] sm:$0xff]  ;;  %954 = vmatpush.msra.mxu3 %v782_v48  ;;  %s4394_s25 = smov 66  }
  0xe8   : > { %s1261_s28 = smul.f32 %s3816_s26, %s3814_s3  ;;  %1157 = vmatpush.msrb.mxu1 %v763_v50  ;;  %v774_v50 = vld [vmem:[#allocation2 + $0x4c8] sm:$0xff]  ;;  %934 = vmatpush.msra.mxu2 %v654_v47  ;;  %s6373_s3 = smov 64  }
  0xe9   : > { %s1262_s29 = smul.f32 %s4550_s27, %s4550_s27  ;;  %1137 = vmatpush.msrb.mxu0 %v635_v49  ;;  %v1264_v57 = vstv %s4550_s27  ;;  %v646_v49 = vld [vmem:[#allocation2 + $0xc8] sm:$0xff]  ;;  %955 = vmatpush.msra.mxu3 %v774_v50 }
  0xea   : > { %935 = vmatpush.msra.mxu2 %v646_v49 }
  0xeb   : > { %s1263_s30 = ssub.f32 %s1261_s28, %s1262_s29  ;;  %1138 = vmatpush.msrb.mxu0 %v627_v51  ;;  %956 = vmatpush.msra.mxu3 %v766_v53 }
  0xec   : > { %1139 = vmatmul.f32.vlgmr.msrb.gmra.mxu0 %v4528_v1 }
  0xed   : > { %s1266_s20 = sadd.f32 1e-05, %s1263_s30  ;;  %957 = vmatpush.msra.mxu3 %v758_v63 }
  0xef   : > { %v1267_v52 = vstv %s1266_s20 }
  0xf0   : > { %4205 = vrsqrt.f32 %v1267_v52  ;;  %vm1274_vm3 = vweird.f32 %v1267_v52 }
  0xf6   : > { %v4206_v59 = vpop.eup %4205 }
  0xf7   : > { %v1269_v62 = vmul.f32 %v4206_v59, %v1267_v52  ;;  %vm1275_vm2 = vweird.f32 %v4206_v59  ;;  %v755_v52 = vld [vmem:[#allocation2 + $0x430] sm:$0xff] }
  0xf8   : > { %vm1276_vm4 = vmor %vm1274_vm3, %vm1275_vm2  ;;  %1158 = vmatpush.msrb.mxu1 %v755_v52  ;;  %v638_v52 = vld [vmem:[#allocation2 + $0x88] sm:$0xff]  ;;  %vm2366_vm2 = vcmask 515072   ;;  %vm2288_vm3 = vcmask 769024  }
  0xf9   : > { %v1270_v4 = vmul.f32 %v4206_v59, %v1269_v62  ;;  %1159 = vmatmul.f32.vlgmr.msrb.gmra.mxu1 %v4530_v2  ;;  %936 = vmatpush.msra.mxu2 %v638_v52 }
  0xfb   : > { %v1271_v7 = vmul.f32 0.5, %v1270_v4 }
  0xfd   : > { %v1272_v10 = vsub.f32 1.5, %v1271_v7 }
  0xff   : > { %v1273_v13 = vmul.f32 %v4206_v59, %v1272_v10 }
 0x101   : > { %v1277_v16 = vsel %vm1276_vm4, %v4206_v59, %v1273_v13  ;;  %v1265_v59 = vsub.f32 %v4525_v0, %v1264_v57  ;;  %v4565_v13 = vadd.f32 %v920_v12, %v900_v11  ;;  %v1306_v0 = vld [vmem:[%s6291_s5] sm:$0xff]  ;;  %vm2244_vm4 = vcmask 777216  }
 0x102   : > { %3817 = vpush %v1277_v16  ;;  %v720_v11 = vld [vmem:[#allocation2 + $0x318] sm:$0xff] }
 0x103   : > { %6386 = vst [vmem:[#allocation5_spill] sm:$0xff] %v4565_v13  ;;  %v848_v12 = vld [vmem:[#allocation2 + $0x718] sm:$0xff] }
 0x104   : > { %v4776_v13 = vld [vmem:[#allocation2 + $0xb8] sm:$0xff] }
 0x105   : > { %6404 = vst [vmem:[#allocation23_spill] sm:$0xff] %v4776_v13 }
 0x113   : > { %v1311_v51 = vpop.permute.xlu2 %1310 }
 0x128   : > { %v1000_v17 = vpop.f32.mrf.mxu1 }
 0x129   : > { %v980_v16 = vpop.f32.mrf.mxu0 }
 0x12a   : > { %v4572_v18 = vadd.f32 %v1000_v17, %v980_v16  ;;  %v832_v16 = vld [vmem:[#allocation2 + $0x698] sm:$0xff] }
 0x12b   : > { %v696_v17 = vld [vmem:[#allocation2 + $0x258] sm:$0xff] }
 0x12c   : > { %6387 = vst [vmem:[#allocation6_spill] sm:$0xff] %v4572_v18  ;;  %v4778_v18 = vld [vmem:[#allocation2 + $0x4b8] sm:$0xff] }
 0x12d   : > { %6405 = vst [vmem:[#allocation24_spill] sm:$0xff] %v4778_v18 }
 0x133   : > { %s3818_s2 = spop %3817 }
 0x134   : > { %v1279_v60 = vstv %s3818_s2  ;;  %s4401_s2 = smov 63  }
 0x135   : > { %v1280_v62 = vmul.f32 %v1279_v60, %v1265_v59 }
 0x137   : > { %v1290_v4 = vmul.f32 %v1288_v61, %v1280_v62  ;;  %v630_v62 = vld [vmem:[#allocation2 + $0x48] sm:$0xff] }
 0x138   : > { %937 = vmatpush.msra.mxu2 %v630_v62 }
 0x139   : > { %v1300_v5 = vadd.f32 %v1298_v3, %v1290_v4  ;;  %v622_v3 = vld [vmem:[#allocation2 + $0x8] sm:$0xff] }
 0x13a   : > { %v750_v4 = vld [vmem:[#allocation2 + $0x408] sm:$0xff]  ;;  %938 = vmatpush.msra.mxu2 %v622_v3 }
 0x13b   : > { %v1301_v6 = vadd.f32 3.0, %v1300_v5  ;;  %958 = vmatpush.msra.mxu3 %v750_v4  ;;  %939 = vmatmul.f32.vlgmr.msra.gmra.mxu2 %v4528_v1 }
 0x13c   : > { %959 = vmatmul.f32.vlgmr.msra.gmra.mxu3 %v4530_v2 }
 0x13d   : > { %v1302_v7 = vmax.f32 %v1301_v6, 0.0  ;;  %v872_v6 = vld [vmem:[#allocation2 + $0x7d8] sm:$0xff] }
 0x13e   : > { %1023 = vmatpush.msrb.mxu3 %v872_v6 }
 0x13f   : > { %v1303_v8 = vmin.f32 %v1302_v7, 6.0  ;;  %v736_v7 = vld [vmem:[#allocation2 + $0x398] sm:$0xff] }
 0x141   : > { %v1304_v9 = vmul.f32 %v1303_v8, %v1300_v5  ;;  %v744_v5 = vld [vmem:[#allocation2 + $0x3d8] sm:$0xff] }
 0x142   : > { %1003 = vmatpush.msrb.mxu2 %v744_v5  ;;  %v864_v8 = vld [vmem:[#allocation2 + $0x798] sm:$0xff] }
 0x143   : > { %v1305_v10 = vmul.f32 0.16666667, %v1304_v9  ;;  %1024 = vmatpush.msrb.mxu3 %v864_v8  ;;  %v728_v9 = vld [vmem:[#allocation2 + $0x358] sm:$0xff] }
 0x144   : > { %1004 = vmatpush.msrb.mxu2 %v736_v7 }
 0x145   : > { %1314 = vst [vmem:[#allocation1] ss:$2 sm:$0xff] %v1305_v10  ;;  %v856_v10 = vld [vmem:[#allocation2 + $0x758] sm:$0xff] }
 0x146   : > { %1005 = vmatpush.msrb.mxu2 %v728_v9  ;;  %1025 = vmatpush.msrb.mxu3 %v856_v10 }
 0x148   : > { %v1080_v20 = vpop.f32.mrf.mxu1  ;;  %1006 = vmatpush.msrb.mxu2 %v720_v11  ;;  %1026 = vmatpush.msrb.mxu3 %v848_v12 }
 0x149   : > { %v1060_v19 = vpop.f32.mrf.mxu0 }
 0x14a   : > { %v4574_v21 = vadd.f32 %v1080_v20, %v1060_v19  ;;  %v824_v19 = vld [vmem:[#allocation2 + $0x658] sm:$0xff] }
 0x14b   : > { %v688_v20 = vld [vmem:[#allocation2 + $0x218] sm:$0xff] }
 0x14c   : > { %v1315_v14 = vld.sshfl [vmem:[#allocation1] sm:$0xff pattern:$0x75316420]  ;;  %v1316_v15 = vld.sshfl [vmem:[#allocation1 + $0x8] sm:$0xff pattern:$0x75316420] }
 0x14d   : > { %3779 = vmatpush.msk.msra.mxu0 %vm1212_vm0, %v1315_v14  ;;  %3781 = vmatpush.msk.msra.mxu1 %vm1212_vm0, %v1316_v15  ;;  %6388 = vst [vmem:[#allocation7_spill] sm:$0xff] %v4574_v21  ;;  %v840_v14 = vld [vmem:[#allocation2 + $0x6d8] sm:$0xff] }
 0x14e   : > { %3780 = vmatmul.msk.f32.vlgmr.msra.gmra.mxu0 %vm1317_vm5, %v1306_v0  ;;  %3782 = vmatmul.msk.f32.vlgmr.msra.gmra.mxu1 %vm1317_vm5, %v1306_v0  ;;  %v712_v0 = vld [vmem:[#allocation2 + $0x2d8] sm:$0xff]  ;;  %vm2209_vm5 = vcmask 785408  }
 0x14f   : > { %1492 = vmatpush.msrb.mxu0 %v742_v25  ;;  %1512 = vmatpush.msrb.mxu1 %v870_v26  ;;  %v704_v15 = vld [vmem:[#allocation2 + $0x298] sm:$0xff]  ;;  %v4393_v26 = vmov 2048.0  }
 0x150   : > { %1007 = vmatpush.msrb.mxu2 %v712_v0  ;;  %1027 = vmatpush.msrb.mxu3 %v840_v14  ;;  %v808_v25 = vld [vmem:[#allocation2 + $0x5d8] sm:$0xff]  ;;  %4207 = vrcp.f32 %v4393_v26  ;;  %v4660_v26 = vld [vmem:[#allocation2 + $0x168] sm:$0xff] }
 0x151   : > { %1493 = vmatpush.msrb.mxu0 %v734_v27  ;;  %1513 = vmatpush.msrb.mxu1 %v862_v28  ;;  %v672_v27 = vld [vmem:[#allocation2 + $0x198] sm:$0xff] }
 0x152   : > { %1008 = vmatpush.msrb.mxu2 %v704_v15  ;;  %1028 = vmatpush.msrb.mxu3 %v832_v16  ;;  %v800_v28 = vld [vmem:[#allocation2 + $0x598] sm:$0xff] }
 0x153   : > { %1494 = vmatpush.msrb.mxu0 %v726_v29  ;;  %1514 = vmatpush.msrb.mxu1 %v854_v30  ;;  %v664_v29 = vld [vmem:[#allocation2 + $0x158] sm:$0xff] }
 0x154   : > { %1009 = vmatpush.msrb.mxu2 %v696_v17  ;;  %1029 = vmatpush.msrb.mxu3 %v824_v19  ;;  %v792_v30 = vld [vmem:[#allocation2 + $0x558] sm:$0xff] }
 0x155   : > { %1495 = vmatpush.msrb.mxu0 %v718_v31  ;;  %1515 = vmatpush.msrb.mxu1 %v846_v32  ;;  %v1366_v31 = vld [vmem:[%s6294_s8] sm:$0xff] }
 0x156   : > { %1010 = vmatpush.msrb.mxu2 %v688_v20  ;;  %v656_v32 = vld [vmem:[#allocation2 + $0x118] sm:$0xff] }
 0x157   : > { %1496 = vmatpush.msrb.mxu0 %v710_v33  ;;  %1516 = vmatpush.msrb.mxu1 %v838_v34  ;;  %v784_v33 = vld [vmem:[#allocation2 + $0x518] sm:$0xff]  ;;  %v4593_v34 = vpop.eup %4207 }
 0x158   : > { %vm1394_vm6 = vweird.f32 %v4593_v34  ;;  %v4770_v21 = vld [vmem:[#allocation2 + $0xf8] sm:$0xff] }
 0x159   : > { %1497 = vmatpush.msrb.mxu0 %v702_v35  ;;  %1517 = vmatpush.msrb.mxu1 %v830_v36  ;;  %v648_v35 = vld [vmem:[#allocation2 + $0xd8] sm:$0xff]  ;;  %6402 = vst [vmem:[#allocation21_spill] sm:$0xff] %v4770_v21 }
 0x15a   : > { %v776_v36 = vld [vmem:[#allocation2 + $0x4d8] sm:$0xff] }
 0x15b   : > { %1498 = vmatpush.msrb.mxu0 %v694_v37  ;;  %1518 = vmatpush.msrb.mxu1 %v822_v38  ;;  %v640_v37 = vld [vmem:[#allocation2 + $0x98] sm:$0xff] }
 0x15c   : > { %v768_v38 = vld [vmem:[#allocation2 + $0x498] sm:$0xff] }
 0x15d   : > { %1499 = vmatpush.msrb.mxu0 %v686_v39  ;;  %1519 = vmatpush.msrb.mxu1 %v814_v40  ;;  %v1390_v39 = vmul.f32 2048.0, %v4593_v34  ;;  %v632_v40 = vld [vmem:[#allocation2 + $0x58] sm:$0xff] }
 0x15f   : > { %1500 = vmatpush.msrb.mxu0 %v678_v41  ;;  %1520 = vmatpush.msrb.mxu1 %v806_v42  ;;  %v760_v41 = vld [vmem:[#allocation2 + $0x458] sm:$0xff] }
 0x161   : > { %1501 = vmatpush.msrb.mxu0 %v670_v43  ;;  %1521 = vmatpush.msrb.mxu1 %v798_v44  ;;  %v624_v43 = vld [vmem:[#allocation2 + $0x18] sm:$0xff] }
 0x162   : > { %v752_v44 = vld [vmem:[#allocation2 + $0x418] sm:$0xff] }
 0x163   : > { %1502 = vmatpush.msrb.mxu0 %v662_v45  ;;  %1522 = vmatpush.msrb.mxu1 %v790_v46  ;;  %v1391_v46 = vsub.f32 1.0, %v1390_v39  ;;  %v4700_v39 = vld [vmem:[#allocation2 + $0x7f8] sm:$0xff] }
 0x165   : > { %1503 = vmatpush.msrb.mxu0 %v654_v47  ;;  %1523 = vmatpush.msrb.mxu1 %v782_v48  ;;  %v4596_v47 = vld [vmem:[#allocation2 + $0x3e8] sm:$0xff] }
 0x166   : > { %v4598_v48 = vld [vmem:[#allocation2 + $0x7e8] sm:$0xff] }
 0x167   : > { %1504 = vmatpush.msrb.mxu0 %v646_v49  ;;  %1524 = vmatpush.msrb.mxu1 %v774_v50 }
 0x169   : > { %v1140_v22 = vpop.f32.mrf.mxu0  ;;  %1505 = vmatpush.msrb.mxu0 %v638_v52  ;;  %1525 = vmatpush.msrb.mxu1 %v766_v53  ;;  %v4600_v52 = vld [vmem:[#allocation2 + $0x3a8] sm:$0xff] }
 0x16a   : > { %v4602_v53 = vld [vmem:[#allocation2 + $0x7a8] sm:$0xff] }
 0x16b   : > { %1506 = vmatpush.msrb.mxu0 %v630_v62  ;;  %1526 = vmatpush.msrb.mxu1 %v758_v63  ;;  %v4615_v63 = vld [vmem:[#allocation2 + $0x328] sm:$0xff] }
 0x16d   : > { %1507 = vmatpush.msrb.mxu0 %v622_v3  ;;  %1527 = vmatpush.msrb.mxu1 %v750_v4  ;;  %v4617_v3 = vld [vmem:[#allocation2 + $0x728] sm:$0xff] }
 0x16f   : > { %1572 = vmatpush.msra.mxu0 %v744_v5  ;;  %1592 = vmatpush.msra.mxu1 %v872_v6 }
 0x171   : > { %1573 = vmatpush.msra.mxu0 %v736_v7  ;;  %1593 = vmatpush.msra.mxu1 %v864_v8  ;;  %v4622_v7 = vld [vmem:[#allocation2 + $0x2e8] sm:$0xff] }
 0x172   : > { %v4624_v8 = vld [vmem:[#allocation2 + $0x6e8] sm:$0xff] }
 0x173   : > { %1574 = vmatpush.msra.mxu0 %v728_v9  ;;  %1594 = vmatpush.msra.mxu1 %v856_v10 }
 0x175   : > { %1575 = vmatpush.msra.mxu0 %v720_v11  ;;  %1595 = vmatpush.msra.mxu1 %v848_v12  ;;  %v4629_v11 = vld [vmem:[#allocation2 + $0x2a8] sm:$0xff] }
 0x176   : > { %v1160_v23 = vpop.f32.mrf.mxu1  ;;  %v4631_v12 = vld [vmem:[#allocation2 + $0x6a8] sm:$0xff] }
 0x177   : > { %v4576_v24 = vadd.f32 %v1160_v23, %v1140_v22  ;;  %v816_v22 = vld [vmem:[#allocation2 + $0x618] sm:$0xff]  ;;  %1576 = vmatpush.msra.mxu0 %v712_v0  ;;  %1596 = vmatpush.msra.mxu1 %v840_v14 }
 0x178   : > { %v680_v23 = vld [vmem:[#allocation2 + $0x1d8] sm:$0xff]  ;;  %1030 = vmatpush.msrb.mxu3 %v816_v22 }
 0x179   : > { %6389 = vst [vmem:[#allocation8_spill] sm:$0xff] %v4576_v24  ;;  %1577 = vmatpush.msra.mxu0 %v704_v15  ;;  %1597 = vmatpush.msra.mxu1 %v832_v16  ;;  %v4636_v15 = vld [vmem:[#allocation2 + $0x268] sm:$0xff]  ;;  %v4772_v24 = vld [vmem:[#allocation2 + $0x4f8] sm:$0xff] }
 0x17a   : > { %1011 = vmatpush.msrb.mxu2 %v680_v23  ;;  %1031 = vmatpush.msrb.mxu3 %v808_v25  ;;  %v4638_v16 = vld [vmem:[#allocation2 + $0x668] sm:$0xff]  ;;  %6403 = vst [vmem:[#allocation22_spill] sm:$0xff] %v4772_v24 }
 0x17b   : > { %1578 = vmatpush.msra.mxu0 %v696_v17  ;;  %1598 = vmatpush.msra.mxu1 %v824_v19  ;;  %v4642_v17 = vld [vmem:[#allocation2 + $0x228] sm:$0xff] }
 0x17c   : > { %1012 = vmatpush.msrb.mxu2 %v672_v27  ;;  %1032 = vmatpush.msrb.mxu3 %v800_v28  ;;  %v4644_v19 = vld [vmem:[#allocation2 + $0x628] sm:$0xff] }
 0x17d   : > { %1579 = vmatpush.msra.mxu0 %v688_v20  ;;  %1599 = vmatpush.msra.mxu1 %v816_v22  ;;  %v4648_v20 = vld [vmem:[#allocation2 + $0x1e8] sm:$0xff] }
 0x17e   : > { %1013 = vmatpush.msrb.mxu2 %v664_v29  ;;  %1033 = vmatpush.msrb.mxu3 %v792_v30  ;;  %v4650_v22 = vld [vmem:[#allocation2 + $0x5e8] sm:$0xff] }
 0x17f   : > { %1580 = vmatpush.msra.mxu0 %v680_v23  ;;  %1600 = vmatpush.msra.mxu1 %v808_v25  ;;  %v4654_v23 = vld [vmem:[#allocation2 + $0x1a8] sm:$0xff] }
 0x180   : > { %1014 = vmatpush.msrb.mxu2 %v656_v32  ;;  %1034 = vmatpush.msrb.mxu3 %v784_v33  ;;  %v4656_v25 = vld [vmem:[#allocation2 + $0x5a8] sm:$0xff] }
 0x181   : > { %1581 = vmatpush.msra.mxu0 %v672_v27  ;;  %1601 = vmatpush.msra.mxu1 %v800_v28  ;;  %v4662_v27 = vld [vmem:[#allocation2 + $0x568] sm:$0xff] }
 0x182   : > { %1015 = vmatpush.msrb.mxu2 %v648_v35  ;;  %1035 = vmatpush.msrb.mxu3 %v776_v36  ;;  %v4666_v28 = vld [vmem:[#allocation2 + $0x128] sm:$0xff] }
 0x183   : > { %1582 = vmatpush.msra.mxu0 %v664_v29  ;;  %1602 = vmatpush.msra.mxu1 %v792_v30  ;;  %v4668_v29 = vld [vmem:[#allocation2 + $0x528] sm:$0xff] }
 0x184   : > { %1016 = vmatpush.msrb.mxu2 %v640_v37  ;;  %1036 = vmatpush.msrb.mxu3 %v768_v38  ;;  %v4672_v30 = vld [vmem:[#allocation2 + $0xe8] sm:$0xff] }
 0x185   : > { %1583 = vmatpush.msra.mxu0 %v656_v32  ;;  %1603 = vmatpush.msra.mxu1 %v784_v33  ;;  %v4678_v32 = vld [vmem:[#allocation2 + $0xa8] sm:$0xff] }
 0x186   : > { %1017 = vmatpush.msrb.mxu2 %v632_v40  ;;  %1037 = vmatpush.msrb.mxu3 %v760_v41  ;;  %v4680_v33 = vld [vmem:[#allocation2 + $0x4a8] sm:$0xff] }
 0x187   : > { %1584 = vmatpush.msra.mxu0 %v648_v35  ;;  %1604 = vmatpush.msra.mxu1 %v776_v36  ;;  %v4688_v35 = vld [vmem:[#allocation2 + $0x468] sm:$0xff] }
 0x188   : > { %1018 = vmatpush.msrb.mxu2 %v624_v43  ;;  %1038 = vmatpush.msrb.mxu3 %v752_v44  ;;  %v4692_v36 = vld [vmem:[#allocation2 + $0x28] sm:$0xff] }
 0x189   : > { %1019 = vmatmul.f32.vlgmr.msrb.gmra.mxu2 %v4528_v1  ;;  %1039 = vmatmul.f32.vlgmr.msrb.gmra.mxu3 %v4530_v2 }
 0x18a   : > { %1083 = vmatpush.msra.mxu2 %v4596_v47  ;;  %1103 = vmatpush.msra.mxu3 %v4598_v48 }
 0x18b   : > { %1585 = vmatpush.msra.mxu0 %v640_v37  ;;  %1605 = vmatpush.msra.mxu1 %v768_v38  ;;  %v4694_v37 = vld [vmem:[#allocation2 + $0x428] sm:$0xff]  ;;  %v4698_v38 = vld [vmem:[#allocation2 + $0x3f8] sm:$0xff] }
 0x18c   : > { %1084 = vmatpush.msra.mxu2 %v4600_v52  ;;  %1104 = vmatpush.msra.mxu3 %v4602_v53 }
 0x18d   : > { %1586 = vmatpush.msra.mxu0 %v632_v40  ;;  %1606 = vmatpush.msra.mxu1 %v760_v41  ;;  %v4704_v40 = vld [vmem:[#allocation2 + $0x3b8] sm:$0xff] }
 0x18e   : > { %v4706_v41 = vld [vmem:[#allocation2 + $0x7b8] sm:$0xff] }
 0x18f   : > { %1587 = vmatpush.msra.mxu0 %v624_v43  ;;  %1607 = vmatpush.msra.mxu1 %v752_v44  ;;  %v4714_v43 = vld [vmem:[#allocation2 + $0x778] sm:$0xff] }
 0x190   : > { %v4718_v44 = vld [vmem:[#allocation2 + $0x338] sm:$0xff] }
 0x1cb   : > { %v1342_v54 = vpop.f32.mrf.mxu0  ;;  %v1362_v55 = vpop.f32.mrf.mxu1 }
 0x1cc   : > { %v4578_v56 = vadd.f32 %v1342_v54, %v1311_v51  ;;  %v4580_v57 = vadd.f32 %v1362_v55, %v1311_v51 }
 0x1ce   : > { %v1367_v58 = vadd.f32 %v4580_v57, %v4578_v56  ;;  %v1377_v59 = vmul.f32 %v4578_v56, %v4578_v56  ;;  %v1378_v60 = vmul.f32 %v4580_v57, %v4580_v57 }
 0x1d0   : > { %1368 = vadd.xlane.f32.xlu2 %v1367_v58  ;;  %v1379_v61 = vadd.f32 %v1378_v60, %v1377_v59  ;;  %v1392_v58 = vmul.f32 %v4593_v34, %v1391_v46  ;;  %v4607_v59 = vld [vmem:[#allocation2 + $0x368] sm:$0xff]  ;;  %v4724_v46 = vld [vmem:[#allocation2 + $0x2f8] sm:$0xff] }
 0x1d1   : > { %v4609_v60 = vld [vmem:[#allocation2 + $0x768] sm:$0xff]  ;;  %1085 = vmatpush.msra.mxu2 %v4607_v59 }
 0x1d2   : > { %1380 = vadd.xlane.f32.xlu0 %v1379_v61  ;;  %1105 = vmatpush.msra.mxu3 %v4609_v60  ;;  %v1393_v6 = vadd.f32 %v4593_v34, %v1392_v58  ;;  %v4742_v58 = vld [vmem:[#allocation2 + $0x238] sm:$0xff] }
 0x1d3   : > { %1086 = vmatpush.msra.mxu2 %v4615_v63  ;;  %6392 = vst [vmem:[#allocation11_spill] sm:$0xff] %v4742_v58 }
 0x1d4   : > { %1106 = vmatpush.msra.mxu3 %v4617_v3  ;;  %v1395_v14 = vsel %vm1394_vm6, %v4593_v34, %v1393_v6  ;;  %v4686_v34 = vld [vmem:[#allocation2 + $0x68] sm:$0xff]  ;;  %v4754_v6 = vld [vmem:[#allocation2 + $0x5b8] sm:$0xff]  ;;  %vm2165_vm6 = vcmask 1031168  }
 0x1d5   : > { %1087 = vmatpush.msra.mxu2 %v4622_v7  ;;  %6397 = vst [vmem:[#allocation16_spill] sm:$0xff] %v4754_v6 }
 0x1d6   : > { %1107 = vmatpush.msra.mxu3 %v4624_v8 }
 0x1d7   : > { %1088 = vmatpush.msra.mxu2 %v4629_v11 }
 0x1d8   : > { %1108 = vmatpush.msra.mxu3 %v4631_v12 }
 0x1d9   : > { %1089 = vmatpush.msra.mxu2 %v4636_v15 }
 0x1da   : > { %1109 = vmatpush.msra.mxu3 %v4638_v16 }
 0x1db   : > { %1090 = vmatpush.msra.mxu2 %v4642_v17 }
 0x1dc   : > { %1110 = vmatpush.msra.mxu3 %v4644_v19 }
 0x1dd   : > { %1091 = vmatpush.msra.mxu2 %v4648_v20 }
 0x1de   : > { %1111 = vmatpush.msra.mxu3 %v4650_v22 }
 0x1df   : > { %1092 = vmatpush.msra.mxu2 %v4654_v23 }
 0x1e0   : > { %1112 = vmatpush.msra.mxu3 %v4656_v25 }
 0x1e1   : > { %1093 = vmatpush.msra.mxu2 %v4660_v26 }
 0x1e2   : > { %1113 = vmatpush.msra.mxu3 %v4662_v27 }
 0x1e3   : > { %1094 = vmatpush.msra.mxu2 %v4666_v28 }
 0x1e4   : > { %1114 = vmatpush.msra.mxu3 %v4668_v29 }
 0x1e5   : > { %1095 = vmatpush.msra.mxu2 %v4672_v30 }
 0x1e6   : > { %1437 = vperm.xlu0 %3882, %v1366_v31   ;;  %v4674_v31 = vld [vmem:[#allocation2 + $0x4e8] sm:$0xff] }
 0x1e7   : > { %1115 = vmatpush.msra.mxu3 %v4674_v31  ;;  %1096 = vmatpush.msra.mxu2 %v4678_v32 }
 0x1e9   : > { %1116 = vmatpush.msra.mxu3 %v4680_v33  ;;  %1097 = vmatpush.msra.mxu2 %v4686_v34 }
 0x1eb   : > { %1117 = vmatpush.msra.mxu3 %v4688_v35  ;;  %1098 = vmatpush.msra.mxu2 %v4692_v36 }
 0x1ec   : > { %1099 = vmatmul.f32.vlgmr.msra.gmra.mxu2 %v4528_v1 }
 0x1ed   : > { %1118 = vmatpush.msra.mxu3 %v4694_v37  ;;  %1163 = vmatpush.msrb.mxu2 %v4698_v38 }
 0x1ee   : > { %1119 = vmatmul.f32.vlgmr.msra.gmra.mxu3 %v4530_v2 }
 0x1ef   : > { %1183 = vmatpush.msrb.mxu3 %v4700_v39  ;;  %1164 = vmatpush.msrb.mxu2 %v4704_v40 }
 0x1f1   : > { %1184 = vmatpush.msrb.mxu3 %v4706_v41 }
 0x1f3   : > { %1185 = vmatpush.msrb.mxu3 %v4714_v43 }
 0x243   : > { %v1369_v42 = vpop.xlane.xlu2 %1368 }
 0x244   : > { %v1370_v45 = vrot.slane %v1369_v42, 4 }
 0x245   : > { %v1381_v49 = vpop.xlane.xlu0 %1380 }
 0x246   : > { %v1371_v50 = vadd.f32 %v1370_v45, %v1369_v42  ;;  %v1382_v51 = vrot.slane %v1381_v49, 4  ;;  %v4712_v42 = vld [vmem:[#allocation2 + $0x378] sm:$0xff] }
 0x247   : > { %1165 = vmatpush.msrb.mxu2 %v4712_v42  ;;  %v4720_v45 = vld [vmem:[#allocation2 + $0x738] sm:$0xff] }
 0x248   : > { %v1383_v54 = vadd.f32 %v1382_v51, %v1381_v49  ;;  %v1372_v55 = vrot.slane %v1371_v50, 2  ;;  %1186 = vmatpush.msrb.mxu3 %v4720_v45  ;;  %v4726_v49 = vld [vmem:[#allocation2 + $0x6f8] sm:$0xff] }
 0x249   : > { %1166 = vmatpush.msrb.mxu2 %v4718_v44  ;;  %v4732_v51 = vld [vmem:[#allocation2 + $0x6b8] sm:$0xff] }
 0x24a   : > { %v1384_v61 = vrot.slane %v1383_v54, 2  ;;  %v1373_v62 = vadd.f32 %v1372_v55, %v1371_v50  ;;  %1187 = vmatpush.msrb.mxu3 %v4726_v49  ;;  %v4730_v50 = vld [vmem:[#allocation2 + $0x2b8] sm:$0xff] }
 0x24b   : > { %1167 = vmatpush.msrb.mxu2 %v4724_v46  ;;  %v4738_v55 = vld [vmem:[#allocation2 + $0x678] sm:$0xff] }
 0x24c   : > { %v1374_v4 = vrot.slane %v1373_v62, 1  ;;  %v1385_v5 = vadd.f32 %v1384_v61, %v1383_v54  ;;  %1188 = vmatpush.msrb.mxu3 %v4732_v51  ;;  %v4736_v54 = vld [vmem:[#allocation2 + $0x278] sm:$0xff]  ;;  %6391 = vst [vmem:[#allocation10_spill] sm:$0xff] %v4738_v55 }
 0x24d   : > { %1168 = vmatpush.msrb.mxu2 %v4730_v50  ;;  %6390 = vst [vmem:[#allocation9_spill] sm:$0xff] %v4736_v54  ;;  %v4744_v61 = vld [vmem:[#allocation2 + $0x638] sm:$0xff] }
 0x24e   : > { %v1375_v9 = vadd.f32 %v1374_v4, %v1373_v62  ;;  %v1386_v10 = vrot.slane %v1385_v5, 1  ;;  %1189 = vmatpush.msrb.mxu3 %v4738_v55  ;;  %6393 = vst [vmem:[#allocation12_spill] sm:$0xff] %v4744_v61  ;;  %v4748_v62 = vld [vmem:[#allocation2 + $0x1f8] sm:$0xff]  ;;  %v4240_v55 = vld [vmem:[#allocation2 + $0x500] sm:$0xff] }
 0x24f   : > { %1169 = vmatpush.msrb.mxu2 %v4736_v54  ;;  %6394 = vst [vmem:[#allocation13_spill] sm:$0xff] %v4748_v62  ;;  %v4750_v4 = vld [vmem:[#allocation2 + $0x5f8] sm:$0xff] }
 0x250   : > { %3819 = vpush %v1375_v9  ;;  %v1387_v0 = vadd.f32 %v1386_v10, %v1385_v5  ;;  %1190 = vmatpush.msrb.mxu3 %v4744_v61  ;;  %v4752_v5 = vld [vmem:[#allocation2 + $0x1b8] sm:$0xff] }
 0x251   : > { %1170 = vmatpush.msrb.mxu2 %v4742_v58  ;;  %6395 = vst [vmem:[#allocation14_spill] sm:$0xff] %v4750_v4  ;;  %v4758_v9 = vld [vmem:[#allocation2 + $0x178] sm:$0xff]  ;;  %v4239_v58 = vld [vmem:[#allocation2 + $0x100] sm:$0xff] }
 0x252   : > { %3821 = vpush %v1387_v0  ;;  %1191 = vmatpush.msrb.mxu3 %v4750_v4  ;;  %v4760_v10 = vld [vmem:[#allocation2 + $0x578] sm:$0xff]  ;;  %v4232_v4 = vld [vmem:[#allocation2 + $0x600] sm:$0xff] }
 0x253   : > { %3823 = vpush %v1395_v14  ;;  %1171 = vmatpush.msrb.mxu2 %v4748_v62  ;;  %v4764_v0 = vld [vmem:[#allocation2 + $0x138] sm:$0xff]  ;;  %v4238_v62 = vld [vmem:[#allocation2 + $0x540] sm:$0xff] }
 0x254   : > { %6396 = vst [vmem:[#allocation15_spill] sm:$0xff] %v4752_v5  ;;  %1192 = vmatpush.msrb.mxu3 %v4754_v6  ;;  %v4766_v14 = vld [vmem:[#allocation2 + $0x538] sm:$0xff] }
 0x255   : > { %6398 = vst [vmem:[#allocation17_spill] sm:$0xff] %v4758_v9  ;;  %1172 = vmatpush.msrb.mxu2 %v4752_v5  ;;  %v4782_v6 = vld [vmem:[#allocation2 + $0x78] sm:$0xff]  ;;  %v4231_v5 = vld [vmem:[#allocation2 + $0x200] sm:$0xff] }
 0x256   : > { %6399 = vst [vmem:[#allocation18_spill] sm:$0xff] %v4760_v10  ;;  %1193 = vmatpush.msrb.mxu3 %v4760_v10 }
 0x257   : > { %6400 = vst [vmem:[#allocation19_spill] sm:$0xff] %v4764_v0  ;;  %1173 = vmatpush.msrb.mxu2 %v4758_v9  ;;  %v4784_v9 = vld [vmem:[#allocation2 + $0x478] sm:$0xff] }
 0x258   : > { %6401 = vst [vmem:[#allocation20_spill] sm:$0xff] %v4766_v14  ;;  %1194 = vmatpush.msrb.mxu3 %v4766_v14  ;;  %v4790_v14 = vld [vmem:[#allocation2 + $0x438] sm:$0xff] }
 0x259   : > { %1174 = vmatpush.msrb.mxu2 %v4764_v0  ;;  %6406 = vst [vmem:[#allocation25_spill] sm:$0xff] %v4782_v6  ;;  %v4788_v0 = vld [vmem:[#allocation2 + $0x38] sm:$0xff] }
 0x25a   : > { %1195 = vmatpush.msrb.mxu3 %v4772_v24  ;;  %6407 = vst [vmem:[#allocation26_spill] sm:$0xff] %v4784_v9  ;;  %v4221_v24 = vld [vmem:[#allocation2 + $0x340] sm:$0xff] }
 0x25b   : > { %1175 = vmatpush.msrb.mxu2 %v4770_v21  ;;  %6408 = vst [vmem:[#allocation27_spill] sm:$0xff] %v4788_v0  ;;  %v4225_v21 = vld [vmem:[#allocation2 + $0x2c0] sm:$0xff] }
 0x25c   : > { %1196 = vmatpush.msrb.mxu3 %v4778_v18  ;;  %6409 = vst [vmem:[#allocation28_spill] sm:$0xff] %v4790_v14  ;;  %v4217_v18 = vld [vmem:[#allocation2 + $0x3c0] sm:$0xff] }
 0x25d   : > { %1176 = vmatpush.msrb.mxu2 %v4776_v13  ;;  %v4218_v13 = vld [vmem:[#allocation2 + $0x7c0] sm:$0xff] }
 0x25e   : > { %1197 = vmatpush.msrb.mxu3 %v4784_v9  ;;  %v4219_v9 = vld [vmem:[#allocation2 + $0x380] sm:$0xff] }
 0x25f   : > { %1177 = vmatpush.msrb.mxu2 %v4782_v6  ;;  %v4220_v6 = vld [vmem:[#allocation2 + $0x780] sm:$0xff] }
 0x260   : > { %1198 = vmatpush.msrb.mxu3 %v4790_v14  ;;  %v4223_v14 = vld [vmem:[#allocation2 + $0x300] sm:$0xff] }
 0x261   : > { %1178 = vmatpush.msrb.mxu2 %v4788_v0  ;;  %1199 = vmatmul.f32.vlgmr.msrb.gmra.mxu3 %v4530_v2  ;;  %v4222_v0 = vld [vmem:[#allocation2 + $0x740] sm:$0xff]  ;;  %v4805_v2 = vld [vmem:[%s6410_s24] sm:$0xff] }
 0x262   : > { %1472 = vmatpush.msra.mxu3 %v4218_v13  ;;  %1179 = vmatmul.f32.vlgmr.msrb.gmra.mxu2 %v4528_v1  ;;  %v4226_v1 = vld [vmem:[#allocation2 + $0x6c0] sm:$0xff] }
 0x263   : > { %1452 = vmatpush.msra.mxu2 %v4217_v18  ;;  %v4224_v18 = vld [vmem:[#allocation2 + $0x700] sm:$0xff] }
 0x264   : > { %1473 = vmatpush.msra.mxu3 %v4220_v6  ;;  %v4227_v6 = vld [vmem:[#allocation2 + $0x280] sm:$0xff] }
 0x265   : > { %1453 = vmatpush.msra.mxu2 %v4219_v9  ;;  %v1851_v9 = vperm.slane %v4805_v2, 1 }
 0x266   : > { %1474 = vmatpush.msra.mxu3 %v4222_v0  ;;  %v1819_v0 = vperm.slane %v4805_v2, 0 }
 0x267   : > { %1454 = vmatpush.msra.mxu2 %v4221_v24  ;;  %v4228_v24 = vld [vmem:[#allocation2 + $0x680] sm:$0xff] }
 0x268   : > { %1475 = vmatpush.msra.mxu3 %v4224_v18  ;;  %v4230_v18 = vld [vmem:[#allocation2 + $0x640] sm:$0xff] }
 0x269   : > { %1455 = vmatpush.msra.mxu2 %v4223_v14  ;;  %v4229_v14 = vld [vmem:[#allocation2 + $0x240] sm:$0xff] }
 0x26a   : > { %1476 = vmatpush.msra.mxu3 %v4226_v1  ;;  %v4811_v1 = vperm.slane %v1819_v0, 0 }
 0x26b   : > { %1456 = vmatpush.msra.mxu2 %v4225_v21  ;;  %v4809_v21 = vperm.slane %v1851_v9, 1  ;;  %v4234_v9 = vld [vmem:[#allocation2 + $0x5c0] sm:$0xff] }
 0x26c   : > { %1477 = vmatpush.msra.mxu3 %v4228_v24  ;;  %6412 = vst [vmem:[#allocation30_spill] sm:$0xff] %v4811_v1  ;;  %2017 = vrot.lane.b32.xlu0 %v4811_v1, %s6373_s3  ;;  %v4233_v24 = vld [vmem:[#allocation2 + $0x1c0] sm:$0xff] }
 0x26d   : > { %1457 = vmatpush.msra.mxu2 %v4227_v6  ;;  %6411 = vst [vmem:[#allocation29_spill] sm:$0xff] %v4809_v21  ;;  %2059 = vrot.lane.b32.xlu1 %v4809_v21, %s4394_s25 }
 0x26e   : > { %1478 = vmatpush.msra.mxu3 %v4230_v18  ;;  %v4236_v18 = vld [vmem:[#allocation2 + $0x580] sm:$0xff] }
 0x26f   : > { %1458 = vmatpush.msra.mxu2 %v4229_v14  ;;  %v4235_v14 = vld [vmem:[#allocation2 + $0x180] sm:$0xff] }
 0x270   : > { %1479 = vmatpush.msra.mxu3 %v4232_v4  ;;  %v4237_v4 = vld [vmem:[#allocation2 + $0x140] sm:$0xff] }
 0x271   : > { %1459 = vmatpush.msra.mxu2 %v4231_v5 }
 0x272   : > { %1480 = vmatpush.msra.mxu3 %v4234_v9 }
 0x273   : > { %1460 = vmatpush.msra.mxu2 %v4233_v24  ;;  %v4242_v24 = vld [vmem:[#allocation2 + $0x4c0] sm:$0xff] }
 0x274   : > { %1481 = vmatpush.msra.mxu3 %v4236_v18  ;;  %v4250_v18 = vld [vmem:[#allocation2 + $0x7d0] sm:$0xff] }
 0x275   : > { %1461 = vmatpush.msra.mxu2 %v4235_v14  ;;  %v4249_v14 = vld [vmem:[#allocation2 + $0x3d0] sm:$0xff] }
 0x276   : > { %1482 = vmatpush.msra.mxu3 %v4238_v62  ;;  %v4243_v62 = vld [vmem:[#allocation2 + $0x80] sm:$0xff] }
 0x277   : > { %1462 = vmatpush.msra.mxu2 %v4237_v4  ;;  %v4254_v4 = vld [vmem:[#allocation2 + $0x750] sm:$0xff] }
 0x278   : > { %1483 = vmatpush.msra.mxu3 %v4240_v55  ;;  %v4246_v55 = vld [vmem:[#allocation2 + $0x440] sm:$0xff] }
 0x279   : > { %1463 = vmatpush.msra.mxu2 %v4239_v58  ;;  %v4245_v58 = vld [vmem:[#allocation2 + $0x40] sm:$0xff] }
 0x27a   : > { %1484 = vmatpush.msra.mxu3 %v4242_v24  ;;  %v4256_v24 = vld [vmem:[#allocation2 + $0x710] sm:$0xff] }
 0x281   : > { %s3820_s26 = spop %3819 }
 0x283   : > { %s3822_s27 = spop %3821 }
 0x284   : > { %s3824_s28 = spop %3823 }
 0x285   : > { %s4794_s29 = smul.f32 %s3824_s28, %s3820_s26  ;;  %s4396_s26 = smov 34  }
 0x286   : > { %s1406_s30 = smul.f32 %s3824_s28, %s3822_s27  ;;  %1975 = vrot.lane.b32.xlu0 %v4809_v21, %s4396_s26  ;;  %s6371_s27 = smov 126  }
 0x287   : > { %s1407_s20 = smul.f32 %s4794_s29, %s4794_s29  ;;  %s6377_s28 = smov 96  }
 0x289   : > { %s1408_s21 = ssub.f32 %s1406_s30, %s1407_s20  ;;  %s4397_s20 = smov 32  }
 0x28b   : > { %s1412_s1 = sadd.f32 1e-05, %s1408_s21  ;;  %s4399_s21 = smov 33  }
 0x28d   : > { %v1413_v13 = vstv %s1412_s1  ;;  %s4400_s1 = smov 127  }
 0x28e   : > { %4209 = vrsqrt.f32 %v1413_v13  ;;  %vm1420_vm8 = vweird.f32 %v1413_v13 }
 0x294   : > { %v4210_v10 = vpop.eup %4209 }
 0x295   : > { %v1415_v6 = vmul.f32 %v4210_v10, %v1413_v13  ;;  %vm1421_vm7 = vweird.f32 %v4210_v10  ;;  %v4248_v13 = vld [vmem:[#allocation2 + $0x400] sm:$0xff] }
 0x296   : > { %vm1422_vm9 = vmor %vm1420_vm8, %vm1421_vm7  ;;  %vm2121_vm7 = vcmask 1039360   ;;  %vm2432_vm8 = vcmask 588800  }
 0x297   : > { %v1416_v0 = vmul.f32 %v4210_v10, %v1415_v6  ;;  %v4241_v6 = vld [vmem:[#allocation2 + $0xc0] sm:$0xff] }
 0x298   : > { %1464 = vmatpush.msra.mxu2 %v4241_v6  ;;  %v4255_v6 = vld [vmem:[#allocation2 + $0x310] sm:$0xff] }
 0x299   : > { %v1417_v5 = vmul.f32 0.5, %v1416_v0  ;;  %v4244_v0 = vld [vmem:[#allocation2 + $0x480] sm:$0xff] }
 0x29a   : > { %1465 = vmatpush.msra.mxu2 %v4243_v62  ;;  %1485 = vmatpush.msra.mxu3 %v4244_v0  ;;  %v4258_v62 = vld [vmem:[#allocation2 + $0x6d0] sm:$0xff] }
 0x29b   : > { %v1418_v61 = vsub.f32 1.5, %v1417_v5  ;;  %v4251_v5 = vld [vmem:[#allocation2 + $0x390] sm:$0xff] }
 0x29c   : > { %1466 = vmatpush.msra.mxu2 %v4245_v58  ;;  %1486 = vmatpush.msra.mxu3 %v4246_v55  ;;  %v4259_v0 = vld [vmem:[#allocation2 + $0x290] sm:$0xff] }
 0x29d   : > { %v1419_v1 = vmul.f32 %v4210_v10, %v1418_v61  ;;  %v4247_v61 = vld [vmem:[#allocation2] sm:$0xff]  ;;  %v4260_v58 = vld [vmem:[#allocation2 + $0x690] sm:$0xff] }
 0x29e   : > { %1467 = vmatpush.msra.mxu2 %v4247_v61  ;;  %1487 = vmatpush.msra.mxu3 %v4248_v13  ;;  %v4261_v55 = vld [vmem:[#allocation2 + $0x250] sm:$0xff] }
 0x29f   : > { %v1423_v9 = vsel %vm1422_vm9, %v4210_v10, %v1419_v1  ;;  %v4252_v10 = vld [vmem:[#allocation2 + $0x790] sm:$0xff] }
 0x2a0   : > { %3825 = vpush %v1423_v9  ;;  %1532 = vmatpush.msrb.mxu2 %v4249_v14  ;;  %1552 = vmatpush.msrb.mxu3 %v4250_v18  ;;  %v4253_v1 = vld [vmem:[#allocation2 + $0x350] sm:$0xff] }
 0x2a1   : > { %v4257_v9 = vld [vmem:[#allocation2 + $0x2d0] sm:$0xff] }
 0x2a2   : > { %1533 = vmatpush.msrb.mxu2 %v4251_v5  ;;  %1553 = vmatpush.msrb.mxu3 %v4252_v10  ;;  %v4262_v61 = vld [vmem:[#allocation2 + $0x650] sm:$0xff]  ;;  %v1852_v10 = vperm.slane %v4805_v2, 3 }
 0x2a3   : > { %v4263_v13 = vld [vmem:[#allocation2 + $0x210] sm:$0xff] }
 0x2a4   : > { %1534 = vmatpush.msrb.mxu2 %v4253_v1  ;;  %1554 = vmatpush.msrb.mxu3 %v4254_v4  ;;  %v4264_v14 = vld [vmem:[#allocation2 + $0x610] sm:$0xff] }
 0x2a5   : > { %v4265_v18 = vld [vmem:[#allocation2 + $0x1d0] sm:$0xff] }
 0x2a6   : > { %1535 = vmatpush.msrb.mxu2 %v4255_v6  ;;  %1555 = vmatpush.msrb.mxu3 %v4256_v24  ;;  %v4266_v5 = vld [vmem:[#allocation2 + $0x5d0] sm:$0xff]  ;;  %v1868_v6 = vperm.slane %v1852_v10, 1 }
 0x2a7   : > { %v4267_v1 = vld [vmem:[#allocation2 + $0x190] sm:$0xff] }
 0x2a8   : > { %1536 = vmatpush.msrb.mxu2 %v4257_v9  ;;  %1556 = vmatpush.msrb.mxu3 %v4258_v62  ;;  %v4268_v4 = vld [vmem:[#allocation2 + $0x590] sm:$0xff] }
 0x2a9   : > { %2061 = vrot.lane.b32.xlu1 %v1868_v6, %s4394_s25  ;;  %v4269_v24 = vld [vmem:[#allocation2 + $0x150] sm:$0xff] }
 0x2aa   : > { %1537 = vmatpush.msrb.mxu2 %v4259_v0  ;;  %1557 = vmatpush.msrb.mxu3 %v4260_v58  ;;  %v4270_v9 = vld [vmem:[#allocation2 + $0x550] sm:$0xff] }
 0x2ab   : > { %v4271_v62 = vld [vmem:[#allocation2 + $0x110] sm:$0xff] }
 0x2ac   : > { %1538 = vmatpush.msrb.mxu2 %v4261_v55  ;;  %1558 = vmatpush.msrb.mxu3 %v4262_v61  ;;  %v4272_v0 = vld [vmem:[#allocation2 + $0x510] sm:$0xff]  ;;  %v1853_v55 = vperm.slane %v4805_v2, 5 }
 0x2ad   : > { %v4273_v58 = vld [vmem:[#allocation2 + $0xd0] sm:$0xff] }
 0x2ae   : > { %1539 = vmatpush.msrb.mxu2 %v4263_v13  ;;  %1559 = vmatpush.msrb.mxu3 %v4264_v14  ;;  %v4274_v61 = vld [vmem:[#allocation2 + $0x4d0] sm:$0xff]  ;;  %v4822_v14 = vperm.slane %v1853_v55, 1  ;;  %v940_v55 = vpop.f32.mrf.mxu2 }
 0x2af   : > { %v4275_v13 = vld [vmem:[#allocation2 + $0x90] sm:$0xff] }
 0x2b0   : > { %1540 = vmatpush.msrb.mxu2 %v4265_v18  ;;  %1560 = vmatpush.msrb.mxu3 %v4266_v5  ;;  %6413 = vst [vmem:[#allocation31_spill] sm:$0xff] %v4822_v14  ;;  %v4276_v18 = vld [vmem:[#allocation2 + $0x490] sm:$0xff] }
 0x2b1   : > { %2063 = vrot.lane.b32.xlu1 %v4822_v14, %s4394_s25  ;;  %v4277_v5 = vld [vmem:[#allocation2 + $0x50] sm:$0xff]  ;;  %1979 = vrot.lane.b32.xlu0 %v4822_v14, %s4396_s26  ;;  %v1438_v14 = vpop.permute.xlu0 %1437 }
 0x2b2   : > { %1541 = vmatpush.msrb.mxu2 %v4267_v1  ;;  %1561 = vmatpush.msrb.mxu3 %v4268_v4  ;;  %v4278_v10 = vld [vmem:[#allocation2 + $0x450] sm:$0xff] }
 0x2b3   : > { %v4279_v1 = vld [vmem:[#allocation2 + $0x10] sm:$0xff] }
 0x2b4   : > { %1542 = vmatpush.msrb.mxu2 %v4269_v24  ;;  %1562 = vmatpush.msrb.mxu3 %v4270_v9  ;;  %v4280_v4 = vld [vmem:[#allocation2 + $0x410] sm:$0xff]  ;;  %v4831_v24 = vld [vmem:[%s6410_s24 + $0x8] sm:$0xff]  ;;  %v1820_v9 = vperm.slane %v4805_v2, 2 }
 0x2b6   : > { %1543 = vmatpush.msrb.mxu2 %v4271_v62  ;;  %1563 = vmatpush.msrb.mxu3 %v4272_v0  ;;  %v1856_v62 = vperm.slane %v4831_v24, 3  ;;  %v4835_v0 = vperm.slane %v1820_v9, 0 }
 0x2b8   : > { %1544 = vmatpush.msrb.mxu2 %v4273_v58  ;;  %1564 = vmatpush.msrb.mxu3 %v4274_v61  ;;  %v4837_v58 = vperm.slane %v1856_v62, 1  ;;  %v960_v61 = vpop.f32.mrf.mxu3  ;;  %v1431_v62 = vpop.permute.xlu1 %1430 }
 0x2b9   : > { %2019 = vrot.lane.b32.xlu1 %v4835_v0, %s6373_s3 }
 0x2ba   : > { %1545 = vmatpush.msrb.mxu2 %v4275_v13  ;;  %1565 = vmatpush.msrb.mxu3 %v4276_v18  ;;  %6414 = vst [vmem:[#allocation32_spill] sm:$0xff] %v4837_v58  ;;  %v4843_v13 = vadd.f32 %v960_v61, %v940_v55  ;;  %v1409_v18 = vstv %s4794_s29  ;;  %s4398_s29 = smov 2  }
 0x2bb   : > { %2069 = vrot.lane.b32.xlu0 %v4837_v58, %s4394_s25 }
 0x2bc   : > { %1546 = vmatpush.msrb.mxu2 %v4277_v5  ;;  %1566 = vmatpush.msrb.mxu3 %v4278_v10  ;;  %6415 = vst [vmem:[#allocation33_spill] sm:$0xff] %v4843_v13  ;;  %v1410_v5 = vsub.f32 %v4578_v56, %v1409_v18  ;;  %v1411_v10 = vsub.f32 %v4580_v57, %v1409_v18  ;;  %v1854_v57 = vperm.slane %v4805_v2, 7 }
 0x2be   : > { %1547 = vmatpush.msrb.mxu2 %v4279_v1  ;;  %1567 = vmatpush.msrb.mxu3 %v4280_v4 }
 0x2c1   : > { %1977 = vrot.lane.b32.xlu1 %v1868_v6, %s4396_s26 }
 0x2c3   : > { %1935 = vrot.lane.b32.xlu0 %v4835_v0, %s4397_s20 }
 0x2cb   : > { %1885 = vrot.lane.b32.xlu0 %v1868_v6, %s4398_s29  ;;  %v4281_v6 = vld [vmem:[#allocation2 + $0x3e0] sm:$0xff] }
 0x2d1   : > { %s3826_s30 = spop %3825 }
 0x2d2   : > { %v1425_v1 = vstv %s3826_s30 }
 0x2d3   : > { %v1426_v4 = vmul.f32 %v1425_v1, %v1410_v5  ;;  %v1427_v9 = vmul.f32 %v1425_v1, %v1411_v10  ;;  %v4852_v5 = vperm.slane %v1854_v57, 1 }
 0x2d5   : > { %v1433_v21 = vmul.f32 %v1431_v62, %v1426_v4  ;;  %v1434_v55 = vmul.f32 %v1431_v62, %v1427_v9  ;;  %2065 = vrot.lane.b32.xlu1 %v4852_v5, %s4394_s25  ;;  %v4285_v62 = vld [vmem:[#allocation2 + $0x360] sm:$0xff] }
 0x2d7   : > { %v1440_v61 = vadd.f32 %v1438_v14, %v1433_v21  ;;  %v1441_v13 = vadd.f32 %v1438_v14, %v1434_v55  ;;  %v4286_v55 = vld [vmem:[#allocation2 + $0x760] sm:$0xff] }
 0x2d9   : > { %v1442_v58 = vadd.f32 3.0, %v1440_v61  ;;  %v1443_v56 = vadd.f32 3.0, %v1441_v13 }
 0x2db   : > { %v1444_v18 = vmax.f32 %v1442_v58, 0.0  ;;  %v1445_v54 = vmax.f32 %v1443_v56, 0.0  ;;  %v4283_v58 = vld [vmem:[#allocation2 + $0x3a0] sm:$0xff] }
 0x2dc   : > { %v4294_v56 = vld [vmem:[#allocation2 + $0x660] sm:$0xff] }
 0x2dd   : > { %v1446_v10 = vmin.f32 %v1444_v18, 6.0  ;;  %v1447_v1 = vmin.f32 %v1445_v54, 6.0  ;;  %v4282_v54 = vld [vmem:[#allocation2 + $0x7e0] sm:$0xff] }
 0x2de   : > { %v4299_v18 = vld [vmem:[#allocation2 + $0x1a0] sm:$0xff] }
 0x2df   : > { %v1448_v4 = vmul.f32 %v1446_v10, %v1440_v61  ;;  %v1449_v9 = vmul.f32 %v1447_v1, %v1441_v13  ;;  %v4284_v13 = vld [vmem:[#allocation2 + $0x7a0] sm:$0xff]  ;;  %v1823_v10 = vperm.slane %v4831_v24, 0 }
 0x2e0   : > { %v4287_v61 = vld [vmem:[#allocation2 + $0x320] sm:$0xff] }
 0x2e1   : > { %v4857_v21 = vmul.f32 0.16666667, %v1448_v4  ;;  %v4859_v14 = vmul.f32 0.16666667, %v1449_v9  ;;  %v4901_v4 = vperm.slane %v1823_v10, 0  ;;  %v4317_v9 = vld [vmem:[#allocation2 + $0x370] sm:$0xff] }
 0x2e2   : > { %v6428_v10 = vld [vmem:[#allocation19_spill] sm:$0xff] }
 0x2e3   : > { %1468 = vmatmul.f32.vlgmr.msra.gmra.mxu2 %v4857_v21  ;;  %1488 = vmatmul.f32.vlgmr.msra.gmra.mxu3 %v4859_v14 }
 0x2e4   : > { %1508 = vmatmul.f32.vlgmr.msrb.gmra.mxu0 %v4857_v21  ;;  %1528 = vmatmul.f32.vlgmr.msrb.gmra.mxu1 %v4859_v14 }
 0x2e5   : > { %1612 = vmatpush.msra.mxu2 %v4281_v6  ;;  %1632 = vmatpush.msra.mxu3 %v4282_v54  ;;  %v4318_v6 = vld [vmem:[#allocation2 + $0x770] sm:$0xff] }
 0x2e6   : > { %1652 = vmatpush.msrb.mxu0 %v4596_v47  ;;  %1672 = vmatpush.msrb.mxu1 %v4598_v48  ;;  %v4288_v47 = vld [vmem:[#allocation2 + $0x720] sm:$0xff] }
 0x2e7   : > { %1613 = vmatpush.msra.mxu2 %v4283_v58  ;;  %1633 = vmatpush.msra.mxu3 %v4284_v13  ;;  %v4289_v48 = vld [vmem:[#allocation2 + $0x2e0] sm:$0xff] }
 0x2e8   : > { %1653 = vmatpush.msrb.mxu0 %v4600_v52  ;;  %1673 = vmatpush.msrb.mxu1 %v4602_v53  ;;  %v4290_v52 = vld [vmem:[#allocation2 + $0x6e0] sm:$0xff] }
 0x2e9   : > { %1614 = vmatpush.msra.mxu2 %v4285_v62  ;;  %1634 = vmatpush.msra.mxu3 %v4286_v55  ;;  %v4291_v53 = vld [vmem:[#allocation2 + $0x2a0] sm:$0xff]  ;;  %v4323_v62 = vld [vmem:[#allocation2 + $0x2b0] sm:$0xff] }
 0x2ea   : > { %1654 = vmatpush.msrb.mxu0 %v4607_v59  ;;  %1674 = vmatpush.msrb.mxu1 %v4609_v60  ;;  %v4292_v59 = vld [vmem:[#allocation2 + $0x6a0] sm:$0xff]  ;;  %v1020_v60 = vpop.f32.mrf.mxu2  ;;  %v4324_v55 = vld [vmem:[#allocation2 + $0x6b0] sm:$0xff] }
 0x2eb   : > { %1615 = vmatpush.msra.mxu2 %v4287_v61  ;;  %1635 = vmatpush.msra.mxu3 %v4288_v47  ;;  %v4326_v47 = vld [vmem:[#allocation2 + $0x670] sm:$0xff] }
 0x2ec   : > { %1655 = vmatpush.msrb.mxu0 %v4615_v63  ;;  %1675 = vmatpush.msrb.mxu1 %v4617_v3  ;;  %v1040_v63 = vpop.f32.mrf.mxu3  ;;  %v4293_v3 = vld [vmem:[#allocation2 + $0x260] sm:$0xff] }
 0x2ed   : > { %1548 = vmatmul.f32.vlgmr.msrb.gmra.mxu2 %v4857_v21  ;;  %1568 = vmatmul.f32.vlgmr.msrb.gmra.mxu3 %v4859_v14  ;;  %v4881_v57 = vadd.f32 %v1040_v63, %v1020_v60  ;;  %v4329_v60 = vld [vmem:[#allocation2 + $0x1f0] sm:$0xff] }
 0x2ee   : > { %1588 = vmatmul.f32.vlgmr.msra.gmra.mxu0 %v4857_v21  ;;  %1608 = vmatmul.f32.vlgmr.msra.gmra.mxu1 %v4859_v14  ;;  %v4330_v63 = vld [vmem:[#allocation2 + $0x5f0] sm:$0xff] }
 0x2ef   : > { %1616 = vmatpush.msra.mxu2 %v4289_v48  ;;  %1636 = vmatpush.msra.mxu3 %v4290_v52  ;;  %6416 = vst [vmem:[#allocation34_spill] sm:$0xff] %v4881_v57  ;;  %v4327_v48 = vld [vmem:[#allocation2 + $0x230] sm:$0xff] }
 0x2f0   : > { %1656 = vmatpush.msrb.mxu0 %v4622_v7  ;;  %1676 = vmatpush.msrb.mxu1 %v4624_v8  ;;  %v4295_v7 = vld [vmem:[#allocation2 + $0x220] sm:$0xff]  ;;  %v4328_v52 = vld [vmem:[#allocation2 + $0x630] sm:$0xff] }
 0x2f1   : > { %1617 = vmatpush.msra.mxu2 %v4291_v53  ;;  %1637 = vmatpush.msra.mxu3 %v4292_v59  ;;  %v4296_v8 = vld [vmem:[#allocation2 + $0x620] sm:$0xff]  ;;  %v6420_v53 = vld [vmem:[#allocation11_spill] sm:$0xff]  ;;  %v6421_v59 = vld [vmem:[#allocation12_spill] sm:$0xff] }
 0x2f2   : > { %1657 = vmatpush.msrb.mxu0 %v4629_v11  ;;  %1677 = vmatpush.msrb.mxu1 %v4631_v12  ;;  %v4297_v11 = vld [vmem:[#allocation2 + $0x1e0] sm:$0xff]  ;;  %v1100_v54 = vpop.f32.mrf.mxu2 }
 0x2f3   : > { %1618 = vmatpush.msra.mxu2 %v4293_v3  ;;  %1638 = vmatpush.msra.mxu3 %v4294_v56  ;;  %v4298_v12 = vld [vmem:[#allocation2 + $0x5e0] sm:$0xff]  ;;  %v6423_v56 = vld [vmem:[#allocation14_spill] sm:$0xff] }
 0x2f4   : > { %1658 = vmatpush.msrb.mxu0 %v4636_v15  ;;  %1678 = vmatpush.msrb.mxu1 %v4638_v16  ;;  %v4300_v15 = vld [vmem:[#allocation2 + $0x5a0] sm:$0xff]  ;;  %v1120_v58 = vpop.f32.mrf.mxu3 }
 0x2f5   : > { %1619 = vmatpush.msra.mxu2 %v4295_v7  ;;  %1639 = vmatpush.msra.mxu3 %v4296_v8  ;;  %v4301_v16 = vld [vmem:[#allocation2 + $0x160] sm:$0xff]  ;;  %v4936_v13 = vadd.f32 %v1120_v58, %v1100_v54  ;;  %v4331_v7 = vld [vmem:[#allocation2 + $0x1b0] sm:$0xff] }
 0x2f6   : > { %1659 = vmatpush.msrb.mxu0 %v4642_v17  ;;  %1679 = vmatpush.msrb.mxu1 %v4644_v19  ;;  %v4302_v17 = vld [vmem:[#allocation2 + $0x560] sm:$0xff]  ;;  %v4332_v8 = vld [vmem:[#allocation2 + $0x5b0] sm:$0xff] }
 0x2f7   : > { %1620 = vmatpush.msra.mxu2 %v4297_v11  ;;  %1640 = vmatpush.msra.mxu3 %v4298_v12  ;;  %v4303_v19 = vld [vmem:[#allocation2 + $0x120] sm:$0xff]  ;;  %6417 = vst [vmem:[#allocation35_spill] sm:$0xff] %v4936_v13 }
 0x2f8   : > { %1660 = vmatpush.msrb.mxu0 %v4648_v20  ;;  %1680 = vmatpush.msrb.mxu1 %v4650_v22  ;;  %v4304_v20 = vld [vmem:[#allocation2 + $0x520] sm:$0xff]  ;;  %v1857_v22 = vperm.slane %v4831_v24, 5 }
 0x2f9   : > { %1621 = vmatpush.msra.mxu2 %v4299_v18  ;;  %1641 = vmatpush.msra.mxu3 %v4300_v15  ;;  %v6422_v3 = vld [vmem:[#allocation13_spill] sm:$0xff]  ;;  %v6425_v18 = vld [vmem:[#allocation16_spill] sm:$0xff]  ;;  %v4333_v15 = vld [vmem:[#allocation2 + $0x170] sm:$0xff] }
 0x2fa   : > { %1661 = vmatpush.msrb.mxu0 %v4654_v23  ;;  %1681 = vmatpush.msrb.mxu1 %v4656_v25  ;;  %v4305_v23 = vld [vmem:[#allocation2 + $0xe0] sm:$0xff]  ;;  %v4899_v1 = vperm.slane %v1857_v22, 1  ;;  %v4336_v22 = vld [vmem:[#allocation2 + $0x530] sm:$0xff] }
 0x2fb   : > { %1622 = vmatpush.msra.mxu2 %v4301_v16  ;;  %1642 = vmatpush.msra.mxu3 %v4302_v17  ;;  %v4306_v25 = vld [vmem:[#allocation2 + $0x4e0] sm:$0xff]  ;;  %v4334_v16 = vld [vmem:[#allocation2 + $0x570] sm:$0xff] }
 0x2fc   : > { %1662 = vmatpush.msrb.mxu0 %v4660_v26  ;;  %1682 = vmatpush.msrb.mxu1 %v4662_v27  ;;  %v4307_v26 = vld [vmem:[#allocation2 + $0xa0] sm:$0xff]  ;;  %v1200_v54 = vpop.f32.mrf.mxu3 }
 0x2fd   : > { %1623 = vmatpush.msra.mxu2 %v4303_v19  ;;  %1643 = vmatpush.msra.mxu3 %v4304_v20  ;;  %v4308_v27 = vld [vmem:[#allocation2 + $0x4a0] sm:$0xff]  ;;  %v6427_v19 = vld [vmem:[#allocation18_spill] sm:$0xff]  ;;  %v4335_v20 = vld [vmem:[#allocation2 + $0x130] sm:$0xff] }
 0x2fe   : > { %1663 = vmatpush.msrb.mxu0 %v4666_v28  ;;  %1683 = vmatpush.msrb.mxu1 %v4668_v29  ;;  %v4309_v28 = vld [vmem:[#allocation2 + $0x60] sm:$0xff] }
 0x2ff   : > { %1624 = vmatpush.msra.mxu2 %v4305_v23  ;;  %1644 = vmatpush.msra.mxu3 %v4306_v25  ;;  %v4310_v29 = vld [vmem:[#allocation2 + $0x460] sm:$0xff]  ;;  %v6429_v23 = vld [vmem:[#allocation20_spill] sm:$0xff]  ;;  %v1858_v25 = vperm.slane %v4831_v24, 7 }
 0x300   : > { %1664 = vmatpush.msrb.mxu0 %v4672_v30  ;;  %1684 = vmatpush.msrb.mxu1 %v4674_v31  ;;  %v4311_v30 = vld [vmem:[#allocation2 + $0x20] sm:$0xff] }
 0x301   : > { %1625 = vmatpush.msra.mxu2 %v4307_v26  ;;  %1645 = vmatpush.msra.mxu3 %v4308_v27  ;;  %v4312_v31 = vld [vmem:[#allocation2 + $0x420] sm:$0xff]  ;;  %v4337_v26 = vld [vmem:[#allocation2 + $0xf0] sm:$0xff] }
 0x302   : > { %1665 = vmatpush.msrb.mxu0 %v4678_v32  ;;  %1685 = vmatpush.msrb.mxu1 %v4680_v33  ;;  %v1821_v32 = vperm.slane %v4805_v2, 4  ;;  %v4313_v33 = vld [vmem:[#allocation2 + $0x3f0] sm:$0xff]  ;;  %v6426_v17 = vld [vmem:[#allocation17_spill] sm:$0xff] }
 0x303   : > { %1626 = vmatpush.msra.mxu2 %v4309_v28  ;;  %1646 = vmatpush.msra.mxu3 %v4310_v29  ;;  %v4338_v27 = vld [vmem:[#allocation2 + $0x4f0] sm:$0xff]  ;;  %v6430_v28 = vld [vmem:[#allocation21_spill] sm:$0xff]  ;;  %v6431_v29 = vld [vmem:[#allocation22_spill] sm:$0xff] }
 0x304   : > { %1666 = vmatpush.msrb.mxu0 %v4686_v34  ;;  %1686 = vmatpush.msrb.mxu1 %v4688_v35  ;;  %v4314_v34 = vld [vmem:[#allocation2 + $0x7f0] sm:$0xff] }
 0x305   : > { %2071 = vrot.lane.b32.xlu1 %v4899_v1, %s4394_s25  ;;  %2025 = vrot.lane.b32.xlu0 %v4901_v4, %s6373_s3  ;;  %v4315_v35 = vld [vmem:[#allocation2 + $0x3b0] sm:$0xff] }
 0x306   : > { %1627 = vmatpush.msra.mxu2 %v4311_v30  ;;  %1647 = vmatpush.msra.mxu3 %v4312_v31  ;;  %v4339_v30 = vld [vmem:[#allocation2 + $0xb0] sm:$0xff] }
 0x307   : > { %1667 = vmatpush.msrb.mxu0 %v4692_v36  ;;  %1687 = vmatpush.msrb.mxu1 %v4694_v37  ;;  %v4316_v36 = vld [vmem:[#allocation2 + $0x7b0] sm:$0xff]  ;;  %v4920_v37 = vperm.slane %v1821_v32, 0 }
 0x308   : > { %1628 = vmatmul.f32.vlgmr.msra.gmra.mxu2 %v4857_v21  ;;  %1648 = vmatmul.f32.vlgmr.msra.gmra.mxu3 %v4859_v14  ;;  %v4340_v31 = vld [vmem:[#allocation2 + $0x4b0] sm:$0xff] }
 0x309   : > { %1668 = vmatmul.f32.vlgmr.msrb.gmra.mxu0 %v4857_v21  ;;  %1688 = vmatmul.f32.vlgmr.msrb.gmra.mxu1 %v4859_v14  ;;  %v6432_v32 = vld [vmem:[#allocation23_spill] sm:$0xff] }
 0x30a   : > { %1692 = vmatpush.msrb.mxu2 %v4313_v33  ;;  %1712 = vmatpush.msrb.mxu3 %v4314_v34  ;;  %v1874_v33 = vperm.slane %v1858_v25, 1  ;;  %v6433_v34 = vld [vmem:[#allocation24_spill] sm:$0xff] }
 0x30b   : > { %1732 = vmatpush.msra.mxu0 %v4698_v38  ;;  %1752 = vmatpush.msra.mxu1 %v4700_v39  ;;  %v4319_v38 = vld [vmem:[#allocation2 + $0x330] sm:$0xff] }
 0x30c   : > { %1693 = vmatpush.msrb.mxu2 %v4315_v35  ;;  %1713 = vmatpush.msrb.mxu3 %v4316_v36  ;;  %v4320_v39 = vld [vmem:[#allocation2 + $0x730] sm:$0xff] }
 0x30d   : > { %1733 = vmatpush.msra.mxu0 %v4704_v40  ;;  %1753 = vmatpush.msra.mxu1 %v4706_v41  ;;  %v1824_v40 = vperm.slane %v4831_v24, 2  ;;  %v1825_v41 = vperm.slane %v4831_v24, 4  ;;  %v4341_v35 = vld [vmem:[#allocation2 + $0x70] sm:$0xff] }
 0x30e   : > { %1694 = vmatpush.msrb.mxu2 %v4317_v9  ;;  %1714 = vmatpush.msrb.mxu3 %v4318_v6  ;;  %v4342_v36 = vld [vmem:[#allocation2 + $0x470] sm:$0xff]  ;;  %v6434_v9 = vld [vmem:[#allocation25_spill] sm:$0xff]  ;;  %v6435_v6 = vld [vmem:[#allocation26_spill] sm:$0xff] }
 0x30f   : > { %1734 = vmatpush.msra.mxu0 %v4712_v42  ;;  %1754 = vmatpush.msra.mxu1 %v4714_v43  ;;  %v4321_v42 = vld [vmem:[#allocation2 + $0x2f0] sm:$0xff]  ;;  %v4938_v61 = vperm.slane %v1824_v40, 0 }
 0x310   : > { %1937 = vrot.lane.b32.xlu1 %v4920_v37, %s4397_s20  ;;  %1981 = vrot.lane.b32.xlu0 %v4852_v5, %s4396_s26  ;;  %v4322_v43 = vld [vmem:[#allocation2 + $0x6f0] sm:$0xff] }
 0x311   : > { %1695 = vmatpush.msrb.mxu2 %v4319_v38  ;;  %1715 = vmatpush.msrb.mxu3 %v4320_v39  ;;  %v4343_v38 = vld [vmem:[#allocation2 + $0x30] sm:$0xff] }
 0x312   : > { %1735 = vmatpush.msra.mxu0 %v4718_v44  ;;  %1755 = vmatpush.msra.mxu1 %v4720_v45  ;;  %v4940_v44 = vperm.slane %v1825_v41, 0  ;;  %v4325_v45 = vld [vmem:[#allocation2 + $0x270] sm:$0xff]  ;;  %v6437_v41 = vld [vmem:[#allocation28_spill] sm:$0xff] }
 0x313   : > { %1696 = vmatpush.msrb.mxu2 %v4321_v42  ;;  %1716 = vmatpush.msrb.mxu3 %v4322_v43  ;;  %v4344_v39 = vld [vmem:[#allocation2 + $0x430] sm:$0xff]  ;;  %v4986_v42 = vpop.permute.xlu1 %2059  ;;  %v1180_v43 = vpop.f32.mrf.mxu2 }
 0x314   : > { %1736 = vmatpush.msra.mxu0 %v4724_v46  ;;  %1756 = vmatpush.msra.mxu1 %v4726_v49  ;;  %v6418_v46 = vld [vmem:[#allocation9_spill] sm:$0xff]  ;;  %v6419_v49 = vld [vmem:[#allocation10_spill] sm:$0xff]  ;;  %v6436_v40 = vld [vmem:[#allocation27_spill] sm:$0xff]  ;;  %v4992_v58 = vadd.f32 %v1200_v54, %v1180_v43 }
 0x315   : > { %1697 = vmatpush.msrb.mxu2 %v4323_v62  ;;  %1717 = vmatpush.msrb.mxu3 %v4324_v55  ;;  %6438 = vst [vmem:[#allocation9_spill] sm:$0xff] %v4986_v42  ;;  %v6440_v62 = vld [vmem:[#allocation32_spill] sm:$0xff]  ;;  %v6441_v55 = vld [vmem:[#allocation30_spill] sm:$0xff] }
 0x316   : > { %1737 = vmatpush.msra.mxu0 %v4730_v50  ;;  %1757 = vmatpush.msra.mxu1 %v4732_v51  ;;  %v1855_v50 = vperm.slane %v4831_v24, 1  ;;  %v1822_v51 = vperm.slane %v4805_v2, 6  ;;  %v6424_v2 = vld [vmem:[#allocation15_spill] sm:$0xff]  ;;  %6439 = vst [vmem:[#allocation10_spill] sm:$0xff] %v4992_v58 }
 0x317   : > { %1698 = vmatpush.msrb.mxu2 %v4325_v45  ;;  %1718 = vmatpush.msrb.mxu3 %v4326_v47  ;;  %v5002_v47 = vpop.permute.xlu0 %2017 }
 0x318   : > { %1738 = vmatpush.msra.mxu0 %v6418_v46  ;;  %1758 = vmatpush.msra.mxu1 %v6419_v49  ;;  %v4956_v11 = vperm.slane %v1855_v50, 1  ;;  %v4958_v12 = vperm.slane %v1822_v51, 0  ;;  %6442 = vst [vmem:[#allocation11_spill] sm:$0xff] %v5002_v47  ;;  %v1826_v46 = vperm.slane %v4831_v24, 6  ;;  %v6444_v24 = vld [vmem:[#allocation31_spill] sm:$0xff] }
 0x319   : > { %2027 = vrot.lane.b32.xlu1 %v4938_v61, %s6373_s3  ;;  %2029 = vrot.lane.b32.xlu0 %v4940_v44, %s6373_s3 }
 0x31a   : > { %1699 = vmatpush.msrb.mxu2 %v4327_v48  ;;  %1719 = vmatpush.msrb.mxu3 %v4328_v52  ;;  %v5013_v48 = vperm.slane %v1826_v46, 0 }
 0x31b   : > { %1739 = vmatpush.msra.mxu0 %v6420_v53  ;;  %1759 = vmatpush.msra.mxu1 %v6421_v59  ;;  %v5000_v45 = vpop.permute.xlu1 %2061 }
 0x31c   : > { %1700 = vmatpush.msrb.mxu2 %v4329_v60  ;;  %1720 = vmatpush.msrb.mxu3 %v4330_v63 }
 0x31d   : > { %1740 = vmatpush.msra.mxu0 %v6422_v3  ;;  %1760 = vmatpush.msra.mxu1 %v6423_v56 }
 0x31e   : > { %1701 = vmatpush.msrb.mxu2 %v4331_v7  ;;  %1721 = vmatpush.msrb.mxu3 %v4332_v8 }
 0x31f   : > { %1741 = vmatpush.msra.mxu0 %v6424_v2  ;;  %1761 = vmatpush.msra.mxu1 %v6425_v18 }
 0x320   : > { %1702 = vmatpush.msrb.mxu2 %v4333_v15  ;;  %1722 = vmatpush.msrb.mxu3 %v4334_v16 }
 0x321   : > { %1742 = vmatpush.msra.mxu0 %v6426_v17  ;;  %1762 = vmatpush.msra.mxu1 %v6427_v19 }
 0x322   : > { %1983 = vrot.lane.b32.xlu1 %v4956_v11, %s4396_s26  ;;  %1939 = vrot.lane.b32.xlu0 %v4958_v12, %s4397_s20 }
 0x323   : > { %1703 = vmatpush.msrb.mxu2 %v4335_v20  ;;  %1723 = vmatpush.msrb.mxu3 %v4336_v22 }
 0x324   : > { %1743 = vmatpush.msra.mxu0 %v6428_v10  ;;  %1763 = vmatpush.msra.mxu1 %v6429_v23 }
 0x325   : > { %2021 = vrot.lane.b32.xlu2 %v4920_v37, %s6373_s3  ;;  %1704 = vmatpush.msrb.mxu2 %v4337_v26 }
 0x326   : > { %1724 = vmatpush.msrb.mxu3 %v4338_v27  ;;  %1744 = vmatpush.msra.mxu0 %v6430_v28 }
 0x327   : > { %1764 = vmatpush.msra.mxu1 %v6431_v29  ;;  %1705 = vmatpush.msrb.mxu2 %v4339_v30 }
 0x328   : > { %1725 = vmatpush.msrb.mxu3 %v4340_v31  ;;  %1745 = vmatpush.msra.mxu0 %v6432_v32 }
 0x329   : > { %1765 = vmatpush.msra.mxu1 %v6433_v34  ;;  %1706 = vmatpush.msrb.mxu2 %v4341_v35 }
 0x32a   : > { %1726 = vmatpush.msrb.mxu3 %v4342_v36  ;;  %1746 = vmatpush.msra.mxu0 %v6434_v9 }
 0x32b   : > { %1766 = vmatpush.msra.mxu1 %v6435_v6  ;;  %1987 = vrot.lane.b32.xlu1 %v4899_v1, %s4396_s26 }
 0x32c   : > { %2073 = vrot.lane.b32.xlu0 %v1874_v33, %s4394_s25  ;;  %1707 = vmatpush.msrb.mxu2 %v4343_v38 }
 0x32d   : > { %1727 = vmatpush.msrb.mxu3 %v4344_v39  ;;  %1747 = vmatpush.msra.mxu0 %v6436_v40 }
 0x32e   : > { %1767 = vmatpush.msra.mxu1 %v6437_v41  ;;  %2067 = vrot.lane.b32.xlu2 %v4956_v11, %s4394_s25  ;;  %s4403_s25 = smov 95  }
 0x32f   : > { %1708 = vmatmul.f32.vlgmr.msrb.gmra.mxu2 %v4857_v21  ;;  %1728 = vmatmul.f32.vlgmr.msrb.gmra.mxu3 %v4859_v14 }
 0x330   : > { %1748 = vmatmul.f32.vlgmr.msra.gmra.mxu0 %v4857_v21  ;;  %1768 = vmatmul.f32.vlgmr.msra.gmra.mxu1 %v4859_v14  ;;  %v6443_v21 = vld [vmem:[#allocation29_spill] sm:$0xff]  ;;  %v2064_v14 = vpop.permute.xlu1 %2063 }
 0x331   : > { %v5011_v49 = vsel %vm2075_vm10, %v5000_v45, %v2064_v14 }
 0x333   : > { %1941 = vrot.lane.b32.xlu1 %v4901_v4, %s4397_s20 }
 0x334   : > { %1893 = vrot.lane.b32.xlu0 %v6440_v62, %s4398_s29 }
 0x336   : > { %1933 = vrot.lane.b32.xlu2 %v6441_v55, %s4397_s20 }
 0x338   : > { %v5023_v52 = vpop.permute.xlu1 %2019 }
 0x33b   : > { %1889 = vrot.lane.b32.xlu1 %v4852_v5, %s4398_s29  ;;  %v5019_v5 = vpop.permute.xlu0 %1975 }
 0x33c   : > { %2031 = vrot.lane.b32.xlu0 %v5013_v48, %s6373_s3 }
 0x33e   : > { %1883 = vrot.lane.b32.xlu2 %v6443_v21, %s4398_s29 }
 0x340   : > { %v5029_v51 = vpop.permute.xlu1 %1977 }
 0x343   : > { %1945 = vrot.lane.b32.xlu1 %v4940_v44, %s4397_s20  ;;  %v1980_v50 = vpop.permute.xlu0 %1979 }
 0x344   : > { %1897 = vrot.lane.b32.xlu0 %v1874_v33, %s4398_s29  ;;  %v5033_v53 = vsel %vm1991_vm11, %v5029_v51, %v1980_v50 }
 0x345   : > { %6445 = vst [vmem:[#allocation12_spill] sm:$0xff] %v5033_v53 }
 0x346   : > { %2023 = vrot.lane.b32.xlu2 %v4958_v12, %s6373_s3 }
 0x348   : > { %v5037_v59 = vpop.permute.xlu1 %2065 }
 0x349   : > { %v5041_v60 = vsel %vm2075_vm10, %v2064_v14, %v5037_v59 }
 0x34a   : > { %6446 = vst [vmem:[#allocation13_spill] sm:$0xff] %v5041_v60 }
 0x34b   : > { %1989 = vrot.lane.b32.xlu1 %v1874_v33, %s4396_s26  ;;  %v5043_v63 = vpop.permute.xlu0 %2069 }
 0x34e   : > { %1887 = vrot.lane.b32.xlu2 %v6444_v24, %s4398_s29 }
 0x353   : > { %v5047_v8 = vpop.permute.xlu0 %1935 }
 0x356   : > { %1985 = vrot.lane.b32.xlu2 %v6440_v62, %s4396_s26  ;;  %s6375_s26 = smov 62  }
 0x35b   : > { %v5055_v20 = vpop.permute.xlu0 %1885 }
 0x35e   : > { %1943 = vrot.lane.b32.xlu2 %v4938_v61, %s4397_s20 }
 0x361   : > { %v1509_v3 = vpop.f32.mrf.mxu0  ;;  %v1529_v56 = vpop.f32.mrf.mxu1 }
 0x362   : > { %v1530_v7 = vadd.f32 %v1529_v56, %v1509_v3 }
 0x364   : > { %1784 = vrot.lane.b32.xlu1 %v1530_v7, %s4399_s21 }
 0x366   : > { %1891 = vrot.lane.b32.xlu2 %v4956_v11, %s4398_s29  ;;  %v1469_v2 = vpop.f32.mrf.mxu2  ;;  %v1489_v18 = vpop.f32.mrf.mxu3 }
 0x367   : > { %v1490_v15 = vadd.f32 %v1489_v18, %v1469_v2 }
 0x36b   : > { %v1589_v16 = vpop.f32.mrf.mxu0  ;;  %v1609_v17 = vpop.f32.mrf.mxu1 }
 0x36c   : > { %v1610_v19 = vadd.f32 %v1609_v17, %v1589_v16  ;;  %1782 = vrot.lane.b32.xlu1 %v1490_v15, %s4399_s21 }
 0x36e   : > { %1895 = vrot.lane.b32.xlu2 %v4899_v1, %s4398_s29  ;;  %1788 = vrot.lane.b32.xlu0 %v1610_v19, %s4399_s21 }
 0x370   : > { %v1549_v22 = vpop.f32.mrf.mxu2  ;;  %v1569_v11 = vpop.f32.mrf.mxu3 }
 0x371   : > { %v1570_v26 = vadd.f32 %v1569_v11, %v1549_v22 }
 0x376   : > { %1947 = vrot.lane.b32.xlu2 %v5013_v48, %s4397_s20 }
 0x377   : > { %v5060_v10 = vpop.permute.xlu1 %2071  ;;  %v2026_v25 = vpop.permute.xlu0 %2025 }
 0x378   : > { %v5065_v23 = vsel %vm2075_vm10, %v5043_v63, %v5060_v10 }
 0x37e   : > { %1786 = vrot.lane.b32.xlu2 %v1570_v26, %s4399_s21 }
 0x37f   : > { %v5068_v1 = vpop.permute.xlu2 %2021 }
 0x382   : > { %v1938_v27 = vpop.permute.xlu1 %1937  ;;  %v1982_v28 = vpop.permute.xlu0 %1981 }
 0x383   : > { %v5072_v29 = vsel %vm1949_vm12, %v5047_v8, %v1938_v27  ;;  %v5075_v30 = vsel %vm1991_vm11, %v1980_v50, %v1982_v28 }
 0x384   : > { %6447 = vst [vmem:[#allocation14_spill] sm:$0xff] %v5072_v29 }
 0x386   : > { %v1669_v31 = vpop.f32.mrf.mxu0  ;;  %v1689_v32 = vpop.f32.mrf.mxu1 }
 0x387   : > { %v1690_v33 = vadd.f32 %v1689_v32, %v1669_v31 }
 0x388   : > { %v5077_v34 = vpop.permute.xlu2 %2067 }
 0x389   : > { %1792 = vrot.lane.b32.xlu2 %v1690_v33, %s4399_s21 }
 0x38b   : > { %v2028_v35 = vpop.permute.xlu1 %2027  ;;  %v5080_v36 = vpop.permute.xlu0 %2029 }
 0x38c   : > { %v5083_v9 = vsel %vm2033_vm13, %v2026_v25, %v2028_v35  ;;  %v5087_v6 = vsel %vm2033_vm13, %v2028_v35, %v5080_v36  ;;  %v1629_v38 = vpop.f32.mrf.mxu2  ;;  %v1649_v39 = vpop.f32.mrf.mxu3 }
 0x38d   : > { %6448 = vst [vmem:[#allocation15_spill] sm:$0xff] %v5087_v6  ;;  %v1650_v40 = vadd.f32 %v1649_v39, %v1629_v38 }
 0x38f   : > { %1790 = vrot.lane.b32.xlu1 %v1650_v40, %s4399_s21 }
 0x390   : > { %v5090_v41 = vpop.permute.xlu2 %1933 }
 0x391   : > { %6449 = vst [vmem:[#allocation16_spill] sm:$0xff] %v5090_v41 }
 0x394   : > { %v1984_v43 = vpop.permute.xlu1 %1983  ;;  %v1940_v54 = vpop.permute.xlu0 %1939 }
 0x395   : > { %v5093_v62 = vsel %vm1991_vm11, %v1982_v28, %v1984_v43  ;;  %v5096_v21 = vsel %vm1949_vm12, %v1938_v27, %v1940_v54 }
 0x396   : > { %6450 = vst [vmem:[#allocation17_spill] sm:$0xff] %v5093_v62 }
 0x397   : > { %6451 = vst [vmem:[#allocation18_spill] sm:$0xff] %v5096_v21 }
 0x398   : > { %v5098_v14 = vpop.permute.xlu2 %1883 }
 0x39d   : > { %v5100_v46 = vpop.permute.xlu1 %1987 }
 0x39e   : > { %v5115_v16 = vpop.permute.xlu0 %2073 }
 0x39f   : > { %6453 = vst [vmem:[#allocation20_spill] sm:$0xff] %v5115_v16 }
 0x3a0   : > { %v5102_v24 = vpop.permute.xlu2 %2023 }
 0x3a1   : > { %v5106_v50 = vsel %vm2033_vm13, %v5102_v24, %v2026_v25 }
 0x3a5   : > { %v1942_v3 = vpop.permute.xlu1 %1941 }
 0x3a6   : > { %v5109_v56 = vsel %vm1949_vm12, %v1940_v54, %v1942_v3  ;;  %v1894_v32 = vpop.permute.xlu0 %1893 }
 0x3a7   : > { %6452 = vst [vmem:[#allocation19_spill] sm:$0xff] %v5109_v56 }
 0x3a8   : > { %v1888_v7 = vpop.permute.xlu2 %1887 }
 0x3a9   : > { %v5113_v2 = vsel %vm1899_vm14, %v5055_v20, %v1888_v7 }
 0x3ad   : > { %v1749_v18 = vpop.f32.mrf.mxu0  ;;  %v1769_v15 = vpop.f32.mrf.mxu1 }
 0x3ae   : > { %v1770_v17 = vadd.f32 %v1769_v15, %v1749_v18  ;;  %v5117_v19 = vpop.permute.xlu1 %1889 }
 0x3af   : > { %v5121_v22 = vsel %vm1899_vm14, %v1888_v7, %v5117_v19 }
 0x3b0   : > { %1796 = vrot.lane.b32.xlu2 %v1770_v17, %s4399_s21  ;;  %v1986_v11 = vpop.permute.xlu2 %1985 }
 0x3b1   : > { %v5125_v25 = vsel %vm1991_vm11, %v1984_v43, %v1986_v11  ;;  %v5129_v26 = vsel %vm1991_vm11, %v1986_v11, %v5100_v46  ;;  %v5143_v43 = vpop.permute.xlu0 %2031 }
 0x3b2   : > { %6454 = vst [vmem:[#allocation21_spill] sm:$0xff] %v5129_v26  ;;  %v1709_v27 = vpop.f32.mrf.mxu2  ;;  %v1729_v28 = vpop.f32.mrf.mxu3 }
 0x3b3   : > { %v1730_v31 = vadd.f32 %v1729_v28, %v1709_v27  ;;  %6457 = vst [vmem:[#allocation24_spill] sm:$0xff] %v5143_v43  ;;  %v5163_v28 = vsel %vm1991_vm11, %v5019_v5, %v5029_v51 }
 0x3b4   : > { %6462 = vst [vmem:[#allocation32_spill] sm:$0xff] %v5163_v28 }
 0x3b5   : > { %1794 = vrot.lane.b32.xlu1 %v1730_v31, %s4399_s21 }
 0x3b6   : > { %v5132_v33 = vpop.permute.xlu1 %1945 }
 0x3b8   : > { %v1944_v35 = vpop.permute.xlu2 %1943 }
 0x3b9   : > { %v5135_v38 = vsel %vm1949_vm12, %v1942_v3, %v1944_v35  ;;  %v5139_v39 = vsel %vm1949_vm12, %v1944_v35, %v5132_v33  ;;  %v5149_v18 = vpop.permute.xlu0 %1897 }
 0x3ba   : > { %6455 = vst [vmem:[#allocation22_spill] sm:$0xff] %v5135_v38 }
 0x3bb   : > { %6456 = vst [vmem:[#allocation23_spill] sm:$0xff] %v5139_v39 }
 0x3bc   : > { %6458 = vst [vmem:[#allocation25_spill] sm:$0xff] %v5149_v18 }
 0x3be   : > { %v5158_v17 = vpop.permute.xlu1 %1989 }
 0x3bf   : > { %6461 = vst [vmem:[#allocation28_spill] sm:$0xff] %v5158_v17 }
 0x3c0   : > { %v5141_v40 = vpop.permute.xlu2 %1891 }
 0x3c1   : > { %v5147_v54 = vsel %vm1899_vm14, %v5141_v40, %v1894_v32 }
 0x3c8   : > { %v1896_v7 = vpop.permute.xlu2 %1895 }
 0x3c9   : > { %v5152_v15 = vsel %vm1899_vm14, %v1894_v32, %v1896_v7  ;;  %v5156_v3 = vsel %vm1899_vm14, %v1896_v7, %v5149_v18 }
 0x3ca   : > { %6459 = vst [vmem:[#allocation26_spill] sm:$0xff] %v5152_v15 }
 0x3cb   : > { %6460 = vst [vmem:[#allocation27_spill] sm:$0xff] %v5156_v3 }
 0x3d6   : > { %v1785_v11 = vpop.permute.xlu1 %1784 }
 0x3de   : > { %v1783_v27 = vpop.permute.xlu1 %1782 }
 0x3df   : > { %v5166_v31 = vsel %vm1798_vm15, %v1783_v27, %v1785_v11  ;;  %v5169_v32 = vsel %vm1798_vm15, 0.0, %v1783_v27  ;;  %v5182_v27 = vsel %vm2075_vm10, %v4986_v42, %v5000_v45 }
 0x3e0   : > { %v3893_v35 = vpack.i.bf16 %v5166_v31, %v5169_v32  ;;  %v2008_v7 = vmul.f32 %v5019_v5, %v5169_v32  ;;  %v2009_v13 = vmul.f32 %v5163_v28, %v5166_v31  ;;  %6463 = vst [vmem:[#allocation29_spill] sm:$0xff] %v5182_v27  ;;  %v2092_v58 = vmul.f32 %v4986_v42, %v5169_v32 }
 0x3e1   : > { %v2093_v57 = vmul.f32 %v5182_v27, %v5166_v31  ;;  %v5192_v28 = vsel %vm1899_vm14, %v5098_v14, %v5055_v20  ;;  %v5203_v42 = vsel %vm2033_vm13, %v5002_v47, %v5023_v52  ;;  %v5208_v20 = vsel %vm1949_vm12, %v5090_v41, %v5047_v8 }
 0x3e2   : > { %3894 = vrot.lane.b32.xlu1 %v3893_v35, %s4400_s1  ;;  %3884 = vrot.lane.b32.xlu2 %v3893_v35, %s4401_s2  ;;  %v3908_v51 = vpack.i.bf16 %v2009_v13, %v2008_v7  ;;  %6464 = vst [vmem:[#allocation31_spill] sm:$0xff] %v5192_v28  ;;  %v1916_v13 = vmul.f32 %v5098_v14, %v5169_v32 }
 0x3e3   : > { %v1917_v45 = vmul.f32 %v5192_v28, %v5166_v31  ;;  %v3898_v7 = vpack.i.bf16 %v2093_v57, %v2092_v58  ;;  %6465 = vst [vmem:[#allocation36_spill] sm:$0xff] %v5203_v42  ;;  %v2050_v57 = vmul.f32 %v5002_v47, %v5169_v32  ;;  %v2051_v58 = vmul.f32 %v5203_v42, %v5166_v31  ;;  %v1789_v47 = vpop.permute.xlu0 %1788 }
 0x3e4   : > { %3909 = vrot.lane.b32.xlu0 %v3908_v51, %s6343_s23  ;;  %6466 = vst [vmem:[#allocation37_spill] sm:$0xff] %v5208_v20 }
 0x3e5   : > { %v3918_v51 = vpack.i.bf16 %v1917_v45, %v1916_v13  ;;  %v1967_v13 = vmul.f32 %v5208_v20, %v5166_v31  ;;  %v5219_v45 = vpop.permute.xlu2 %1947 }
 0x3e6   : > { %6467 = vst [vmem:[#allocation38_spill] sm:$0xff] %v5219_v45 }
 0x3ea   : > { %3889 = vrot.lane.b32.xlu2 %v3893_v35, %s4403_s25  ;;  %3899 = vrot.lane.b32.xlu1 %v3898_v7, %s6375_s26  ;;  %v1966_v35 = vmul.f32 %v5090_v41, %v5169_v32  ;;  %v3903_v7 = vpack.i.bf16 %v2051_v58, %v2050_v57 }
 0x3ec   : > { %3919 = vrot.lane.b32.xlu0 %v3918_v51, %s6371_s27  ;;  %v3913_v8 = vpack.i.bf16 %v1967_v13, %v1966_v35  ;;  %v5257_v13 = vsel %vm2033_vm13, %v5068_v1, %v5102_v24 }
 0x3ed   : > { %v1787_v51 = vpop.permute.xlu2 %1786 }
 0x3ee   : > { %v5224_v42 = vsel %vm1798_vm15, %v1785_v11, %v1787_v51  ;;  %v5227_v41 = vsel %vm1798_vm15, %v1787_v51, %v1789_v47 }
 0x3ef   : > { %v2053_v51 = vmul.f32 %v5257_v13, %v5227_v41 }
 0x3f2   : > { %3904 = vrot.lane.b32.xlu1 %v3903_v7, %s6373_s3  ;;  %3914 = vrot.lane.b32.xlu2 %v3913_v8, %s6377_s28  ;;  %v2094_v8 = vmul.f32 %v5011_v49, %v5224_v42 }
 0x3f5   : > { %v1793_v27 = vpop.permute.xlu2 %1792 }
 0x401   : > { %v1791_v28 = vpop.permute.xlu1 %1790 }
 0x402   : > { %v5230_v20 = vsel %vm1798_vm15, %v1789_v47, %v1791_v28  ;;  %v5233_v57 = vsel %vm1798_vm15, %v1791_v28, %v1793_v27  ;;  %v5247_v47 = vsel %vm2075_vm10, %v5037_v59, %v5077_v34  ;;  %v5264_v59 = vsel %vm2033_vm13, %v5023_v52, %v5068_v1 }
 0x403   : > { %v3928_v58 = vpack.i.bf16 %v5230_v20, %v5224_v42  ;;  %v3933_v35 = vpack.i.bf16 %v5227_v41, %v5233_v57  ;;  %6468 = vst [vmem:[#allocation39_spill] sm:$0xff] %v5247_v47  ;;  %v2096_v11 = vmul.f32 %v5247_v47, %v5230_v20  ;;  %v2055_v28 = vmul.f32 %v5083_v9, %v5233_v57 }
 0x404   : > { %v2054_v7 = vmul.f32 %v5106_v50, %v5230_v20  ;;  %6469 = vst [vmem:[#allocation40_spill] sm:$0xff] %v5264_v59  ;;  %v5277_v52 = vsel %vm1899_vm14, %v5117_v19, %v5141_v40  ;;  %v5283_v1 = vsel %vm2075_vm10, %v5077_v34, %v5043_v63  ;;  %v2010_v19 = vmul.f32 %v5033_v53, %v5224_v42 }
 0x405   : > { %3929 = vrot.lane.b32.xlu0 %v3928_v58, %s4403_s25  ;;  %3924 = vrot.lane.b32.xlu2 %v3928_v58, %s4401_s2  ;;  %v3978_v24 = vpack.i.bf16 %v2053_v51, %v2055_v28  ;;  %6470 = vst [vmem:[#allocation41_spill] sm:$0xff] %v5283_v1  ;;  %v1920_v28 = vmul.f32 %v5277_v52, %v5230_v20 }
 0x406   : > { %3934 = vrot.lane.b32.xlu1 %v3933_v35, %s4401_s2  ;;  %v1918_v40 = vmul.f32 %v5113_v2, %v5224_v42  ;;  %v2013_v51 = vmul.f32 %v5125_v25, %v5233_v57  ;;  %v1919_v53 = vmul.f32 %v5121_v22, %v5227_v41 }
 0x408   : > { %v3983_v34 = vpack.i.bf16 %v1920_v28, %v1918_v40  ;;  %v1968_v28 = vmul.f32 %v5072_v29, %v5224_v42 }
 0x40d   : > { %3939 = vrot.lane.b32.xlu2 %v3928_v58, %s4400_s1  ;;  %3944 = vrot.lane.b32.xlu0 %v3933_v35, %s4403_s25  ;;  %v2052_v58 = vmul.f32 %v5264_v59, %v5224_v42 }
 0x40e   : > { %3949 = vrot.lane.b32.xlu1 %v3933_v35, %s4400_s1  ;;  %v3953_v35 = vpack.i.bf16 %v2096_v11, %v2094_v8  ;;  %v2012_v11 = vmul.f32 %v5093_v62, %v5230_v20 }
 0x40f   : > { %v3958_v47 = vpack.i.bf16 %v2054_v7, %v2052_v58  ;;  %v2097_v7 = vmul.f32 %v5283_v1, %v5233_v57  ;;  %v1971_v58 = vmul.f32 %v5135_v38, %v5233_v57 }
 0x410   : > { %v3963_v63 = vpack.i.bf16 %v2012_v11, %v2010_v19  ;;  %v1969_v11 = vmul.f32 %v5096_v21, %v5227_v41 }
 0x412   : > { %v3993_v19 = vpack.i.bf16 %v1969_v11, %v1971_v58  ;;  %v5332_v11 = vsel %vm2075_vm10, %v5060_v10, %v5115_v16  ;;  %v5345_v10 = vsel %vm1949_vm12, %v5132_v33, %v5219_v45 }
 0x413   : > { %6471 = vst [vmem:[#allocation42_spill] sm:$0xff] %v5345_v10 }
 0x415   : > { %3954 = vrot.lane.b32.xlu0 %v3953_v35, %s6375_s26  ;;  %3979 = vrot.lane.b32.xlu2 %v3978_v24, %s6373_s3  ;;  %v1970_v35 = vmul.f32 %v5109_v56, %v5230_v20  ;;  %v2011_v24 = vmul.f32 %v5075_v30, %v5227_v41 }
 0x416   : > { %3959 = vrot.lane.b32.xlu1 %v3958_v47, %s6373_s3  ;;  %v2095_v47 = vmul.f32 %v5041_v60, %v5227_v41 }
 0x417   : > { %v3973_v40 = vpack.i.bf16 %v1970_v35, %v1968_v28 }
 0x418   : > { %v3968_v8 = vpack.i.bf16 %v2095_v47, %v2097_v7  ;;  %v3988_v7 = vpack.i.bf16 %v2011_v24, %v2013_v51  ;;  %v1797_v47 = vpop.permute.xlu2 %1796 }
 0x41d   : > { %3964 = vrot.lane.b32.xlu0 %v3963_v63, %s6343_s23  ;;  %3984 = vrot.lane.b32.xlu2 %v3983_v34, %s6371_s27  ;;  %v1816_v63 = vsel %vm1798_vm15, %v1797_v47, 0.0  ;;  %v1921_v34 = vmul.f32 %v5147_v54, %v5233_v57 }
 0x41e   : > { %3969 = vrot.lane.b32.xlu1 %v3968_v8, %s6375_s26  ;;  %v2058_v51 = vmul.f32 %v5143_v43, %v1816_v63 }
 0x41f   : > { %v3998_v24 = vpack.i.bf16 %v1919_v53, %v1921_v34 }
 0x425   : > { %3989 = vrot.lane.b32.xlu0 %v3988_v7, %s6343_s23  ;;  %3994 = vrot.lane.b32.xlu2 %v3993_v19, %s6377_s28  ;;  %v2100_v7 = vmul.f32 %v5115_v16, %v1816_v63  ;;  %v5352_v19 = vsel %vm2033_vm13, %v5080_v36, %v5143_v43  ;;  %v5370_v36 = vsel %vm1991_vm11, %v5100_v46, %v5158_v17 }
 0x426   : > { %3974 = vrot.lane.b32.xlu1 %v3973_v40, %s6377_s28  ;;  %6472 = vst [vmem:[#allocation43_spill] sm:$0xff] %v5352_v19  ;;  %v2016_v46 = vmul.f32 %v5158_v17, %v1816_v63 }
 0x427   : > { %v1795_v8 = vpop.permute.xlu1 %1794  ;;  %6473 = vst [vmem:[#allocation44_spill] sm:$0xff] %v5370_v36 }
 0x428   : > { %v5322_v58 = vsel %vm1798_vm15, %v1793_v27, %v1795_v8  ;;  %v5325_v35 = vsel %vm1798_vm15, %v1795_v8, %v1797_v47 }
 0x429   : > { %v2098_v28 = vmul.f32 %v5065_v23, %v5322_v58  ;;  %v2099_v27 = vmul.f32 %v5332_v11, %v5325_v35  ;;  %v1972_v40 = vmul.f32 %v5139_v39, %v5322_v58  ;;  %v1973_v47 = vmul.f32 %v5345_v10, %v5325_v35 }
 0x42a   : > { %v2056_v34 = vmul.f32 %v5087_v6, %v5322_v58  ;;  %v2057_v33 = vmul.f32 %v5352_v19, %v5325_v35  ;;  %v4003_v8 = vpack.i.bf16 %v5325_v35, %v5322_v58 }
 0x42b   : > { %v4013_v53 = vpack.i.bf16 %v2099_v27, %v2098_v28  ;;  %v1922_v28 = vmul.f32 %v5152_v15, %v5322_v58  ;;  %v1923_v27 = vmul.f32 %v5156_v3, %v5325_v35 }
 0x42d   : > { %2364 = vrot.lane.b32.xlu0 %v1816_v63, %s4401_s2  ;;  %2330 = vrot.lane.b32.xlu2 %v2058_v51, %s6373_s3  ;;  %v4028_v51 = vpack.i.bf16 %v1973_v47, %v1972_v40  ;;  %v4033_v40 = vpack.i.bf16 %v1923_v27, %v1922_v28  ;;  %v1924_v28 = vmul.f32 %v5149_v18, %v1816_v63 }
 0x42e   : > { %3999 = vrot.lane.b32.xlu1 %v3998_v24, %s6371_s27  ;;  %v4018_v24 = vpack.i.bf16 %v2057_v33, %v2056_v34  ;;  %v1974_v33 = vmul.f32 %v5219_v45, %v1816_v63 }
 0x435   : > { %2408 = vrot.lane.b32.xlu0 %v2100_v7, %s6375_s26  ;;  %4014 = vrot.lane.b32.xlu2 %v4013_v53, %s6375_s26  ;;  %v2014_v7 = vmul.f32 %v5129_v26, %v5322_v58  ;;  %v2015_v53 = vmul.f32 %v5370_v36, %v5325_v35 }
 0x436   : > { %2115 = vrot.lane.b32.xlu1 %v5322_v58, %s4400_s1 }
 0x437   : > { %v4023_v34 = vpack.i.bf16 %v2015_v53, %v2014_v7  ;;  %v2596_v53 = vld [vmem:[%s6297_s11] sm:$0xff] }
 0x43c   : > { %v5380_v47 = vpop.permute.xlu2 %3884 }
 0x43d   : > { %4004 = vrot.lane.b32.xlu0 %v4003_v8, %s4401_s2  ;;  %4029 = vrot.lane.b32.xlu2 %v4028_v51, %s6377_s28  ;;  %v6477_v19 = vunpack.i.h.bf16 %v5380_v47 }
 0x43e   : > { %4019 = vrot.lane.b32.xlu1 %v4018_v24, %s6373_s3  ;;  %v4038_v24 = vpack.i.bf16 %v1816_v63, %v5325_v35 }
 0x444   : > { %v5389_v51 = vpop.permute.xlu2 %3889 }
 0x445   : > { %4009 = vrot.lane.b32.xlu0 %v4003_v8, %s4403_s25  ;;  %4034 = vrot.lane.b32.xlu2 %v4033_v40, %s6371_s27  ;;  %v1773_v8 = vld [vmem:[%s6296_s10] sm:$0xff]  ;;  %v3891_v43 = vunpack.i.l.bf16 %v5389_v51  ;;  %v6475_v36 = vunpack.i.h.bf16 %v5389_v51 }
 0x446   : > { %4024 = vrot.lane.b32.xlu1 %v4023_v34, %s6343_s23  ;;  %v6350_v34 = vunpack.i.h.bf16 %v5380_v47 }
 0x44c   : > { %v5401_v7 = vpop.permute.xlu2 %3914 }
 0x44d   : > { %2286 = vrot.lane.b32.xlu0 %v2016_v46, %s6343_s23  ;;  %2207 = vrot.lane.b32.xlu2 %v1974_v33, %s6377_s28 }
 0x44e   : > { %2242 = vrot.lane.b32.xlu1 %v1816_v63, %s4403_s25  ;;  %v3886_v63 = vunpack.i.l.bf16 %v5380_v47 }
 0x450   : > { %v2367_v18 = vsel %vm2366_vm2, %v3886_v63, %v6350_v34 }
 0x454   : > { %v5397_v27 = vpop.permute.xlu1 %3894 }
 0x455   : > { %4039 = vrot.lane.b32.xlu0 %v4038_v24, %s4400_s1  ;;  %2429 = vperm.xlu2 %3881, %v1773_v8   ;;  %v3896_v6 = vunpack.i.l.bf16 %v5397_v27 }
 0x456   : > { %2163 = vrot.lane.b32.xlu1 %v1924_v28, %s6371_s27  ;;  %v5412_v8 = vpop.permute.xlu0 %3909 }
 0x457   : > { %v3911_v45 = vunpack.i.l.bf16 %v5412_v8  ;;  %v6474_v26 = vunpack.i.h.bf16 %v5412_v8 }
 0x45c   : > { %v5406_v40 = vpop.permute.xlu1 %3899 }
 0x45d   : > { %2691 = vperm.xlu2 %3881, %v2596_v53   ;;  %v3902_v46 = vunpack.i.h.bf16 %v5406_v40  ;;  %v3901_v33 = vunpack.i.l.bf16 %v5406_v40  ;;  %v2597_v53 = vld [vmem:[%s6298_s12] sm:$0xff]  ;;  %v3916_v40 = vunpack.i.l.bf16 %v5401_v7 }
 0x45e   : > { %v5428_v34 = vpop.permute.xlu0 %3919 }
 0x45f   : > { %v2411_v24 = vsel %vm2410_vm1, %v3901_v33, %v3902_v46  ;;  %v5415_v28 = vpop.permute.xlu2 %3924 }
 0x460   : > { %2443 = vmatpush.msra.mxu2 %v2411_v24  ;;  %v6355_v24 = vunpack.i.h.bf16 %v5428_v34  ;;  %v3927_v47 = vunpack.i.h.bf16 %v5415_v28 }
 0x462   : > { %2444 = vmatpush.msra.mxu2 %v2367_v18  ;;  %v6354_v18 = vunpack.i.h.bf16 %v5397_v27 }
 0x464   : > { %v3905_v17 = vpop.permute.xlu1 %3904 }
 0x465   : > { %2704 = vperm.xlu2 %3881, %v2597_v53   ;;  %v3907_v16 = vunpack.i.h.bf16 %v3905_v17  ;;  %v3906_v33 = vunpack.i.l.bf16 %v3905_v17  ;;  %v2289_v53 = vsel %vm2288_vm3, %v3911_v45, %v6474_v26  ;;  %v6476_v26 = vunpack.i.h.bf16 %v5401_v7 }
 0x467   : > { %v2332_v63 = vsel %vm2033_vm13, %v3906_v33, %v3907_v16  ;;  %v5435_v17 = vpop.permute.xlu2 %3939  ;;  %v3921_v33 = vunpack.i.l.bf16 %v5428_v34  ;;  %v2210_v45 = vsel %vm2209_vm5, %v3916_v40, %v6476_v26 }
 0x468   : > { %2445 = vmatpush.msra.mxu2 %v2332_v63  ;;  %v2245_v63 = vsel %vm2244_vm4, %v3891_v43, %v6475_v36  ;;  %v2122_v43 = vsel %vm2121_vm7, %v3896_v6, %v6354_v18  ;;  %v1843_v36 = vmul.f32 %v6441_v55, %v5169_v32 }
 0x46a   : > { %2446 = vmatpush.msra.mxu2 %v2289_v53  ;;  %v2166_v53 = vsel %vm2165_vm6, %v3921_v33, %v6355_v24 }
 0x46c   : > { %2447 = vmatpush.msra.mxu2 %v2245_v63  ;;  %v5458_v63 = vld [vmem:[%s6295_s9] sm:$0xff] }
 0x46e   : > { %2448 = vmatpush.msra.mxu2 %v2210_v45 }
 0x46f   : > { %v5460_v40 = vpop.permute.xlu2 %3979 }
 0x470   : > { %2449 = vmatpush.msra.mxu2 %v2166_v53 }
 0x472   : > { %2450 = vmatpush.msra.mxu2 %v2122_v43  ;;  %v3926_v43 = vunpack.i.l.bf16 %v5415_v28  ;;  %v6479_v28 = vunpack.i.h.bf16 %v5389_v51 }
 0x474   : > { %2451 = vmatpush.msra.mxu2 %v1843_v36  ;;  %v2368_v3 = vsel %vm2366_vm2, %v6477_v19, %v3926_v43 }
 0x475   : > { %3783 = vmatmul.msk.f32.vlgmr.msra.gmra.mxu2 %vm2432_vm8, %v5458_v63 }
 0x477   : > { %v5464_v33 = vpop.permute.xlu0 %3929  ;;  %v5468_v6 = vpop.permute.xlu2 %3984 }
 0x478   : > { %v5466_v26 = vpop.permute.xlu1 %3934  ;;  %v3931_v56 = vunpack.i.l.bf16 %v5464_v33 }
 0x479   : > { %v3937_v1 = vunpack.i.h.bf16 %v5466_v26 }
 0x47f   : > { %v5470_v45 = vpop.permute.xlu0 %3944  ;;  %v5475_v18 = vpop.permute.xlu2 %3994 }
 0x480   : > { %v5472_v32 = vpop.permute.xlu1 %3949  ;;  %v3947_v51 = vunpack.i.h.bf16 %v5470_v45 }
 0x487   : > { %v3955_v53 = vpop.permute.xlu0 %3954  ;;  %v5490_v19 = vpop.permute.xlu2 %2330 }
 0x488   : > { %v3956_v24 = vunpack.i.l.bf16 %v3955_v53  ;;  %v3960_v36 = vpop.permute.xlu1 %3959  ;;  %v3957_v60 = vunpack.i.h.bf16 %v3955_v53 }
 0x489   : > { %v3961_v55 = vunpack.i.l.bf16 %v3960_v36  ;;  %v3962_v38 = vunpack.i.h.bf16 %v3960_v36  ;;  %v2369_v36 = vsel %vm2366_vm2, %v3926_v43, %v3937_v1 }
 0x48a   : > { %v2412_v15 = vsel %vm2410_vm1, %v3902_v46, %v3956_v24 }
 0x48b   : > { %2463 = vmatpush.msra.mxu3 %v2412_v15  ;;  %v2333_v29 = vsel %vm2033_vm13, %v3907_v16, %v3961_v55 }
 0x48d   : > { %2464 = vmatpush.msra.mxu3 %v2368_v3  ;;  %v2246_v3 = vsel %vm2244_vm4, %v6479_v28, %v3931_v56  ;;  %v3932_v28 = vunpack.i.h.bf16 %v5464_v33 }
 0x48f   : > { %v3965_v39 = vpop.permute.xlu0 %3964  ;;  %2465 = vmatpush.msra.mxu3 %v2333_v29  ;;  %v6478_v29 = vunpack.i.h.bf16 %v5412_v8  ;;  %v3982_v8 = vunpack.i.h.bf16 %v5460_v40 }
 0x490   : > { %v3966_v10 = vunpack.i.l.bf16 %v3965_v39  ;;  %v5483_v62 = vpop.permute.xlu1 %3969  ;;  %v3967_v43 = vunpack.i.h.bf16 %v3965_v39 }
 0x491   : > { %v3972_v46 = vunpack.i.h.bf16 %v5483_v62  ;;  %v3971_v15 = vunpack.i.l.bf16 %v5483_v62 }
 0x492   : > { %v2290_v16 = vsel %vm2288_vm3, %v6478_v29, %v3966_v10 }
 0x493   : > { %2466 = vmatpush.msra.mxu3 %v2290_v16  ;;  %v2413_v21 = vsel %vm2410_vm1, %v3956_v24, %v3972_v46  ;;  %v2414_v53 = vsel %vm2410_vm1, %v3972_v46, %v3957_v60  ;;  %v2415_v59 = vsel %vm2410_vm1, %v3957_v60, %v3971_v15  ;;  %v2370_v24 = vsel %vm2366_vm2, %v3937_v1, %v3927_v47 }
 0x494   : > { %2483 = vmatpush.msrb.mxu0 %v2413_v21  ;;  %2503 = vmatpush.msrb.mxu1 %v2414_v53  ;;  %v3981_v46 = vunpack.i.l.bf16 %v5460_v40  ;;  %v6480_v60 = vunpack.i.l.bf16 %v5466_v26 }
 0x495   : > { %2523 = vmatpush.msrb.mxu2 %v2415_v59  ;;  %2467 = vmatpush.msra.mxu3 %v2246_v3  ;;  %v2334_v59 = vsel %vm2033_vm13, %v3961_v55, %v3982_v8  ;;  %v2335_v3 = vsel %vm2033_vm13, %v3982_v8, %v3962_v38  ;;  %v3946_v55 = vunpack.i.l.bf16 %v5470_v45 }
 0x496   : > { %2484 = vmatpush.msrb.mxu0 %v2369_v36  ;;  %2504 = vmatpush.msrb.mxu1 %v2370_v24  ;;  %v2371_v21 = vsel %vm2366_vm2, %v3927_v47, %v6480_v60  ;;  %v2336_v47 = vsel %vm2033_vm13, %v3962_v38, %v3981_v46  ;;  %v3986_v36 = vunpack.i.l.bf16 %v5468_v6  ;;  %v6481_v38 = vunpack.i.h.bf16 %v5401_v7 }
 0x497   : > { %2524 = vmatpush.msrb.mxu2 %v2371_v21  ;;  %v5511_v29 = vpop.permute.xlu0 %3989  ;;  %v2249_v7 = vsel %vm2244_vm4, %v3932_v28, %v3946_v55 }
 0x498   : > { %v3975_v16 = vpop.permute.xlu1 %3974  ;;  %v3992_v1 = vunpack.i.h.bf16 %v5511_v29  ;;  %v6370_v53 = vunpack.i.l.bf16 %v5511_v29  ;;  %2485 = vmatpush.msrb.mxu0 %v2334_v59  ;;  %2505 = vmatpush.msrb.mxu1 %v2335_v3  ;;  %v3941_v59 = vunpack.i.l.bf16 %v5435_v17  ;;  %v3997_v3 = vunpack.i.h.bf16 %v5475_v18 }
 0x499   : > { %v3976_v24 = vunpack.i.l.bf16 %v3975_v16  ;;  %2525 = vmatpush.msrb.mxu2 %v2336_v47  ;;  %v3977_v39 = vunpack.i.h.bf16 %v3975_v16  ;;  %v4015_v47 = vpop.permute.xlu2 %4014  ;;  %v2248_v16 = vsel %vm2244_vm4, %v3947_v51, %v3932_v28  ;;  %v3987_v28 = vunpack.i.h.bf16 %v5468_v6 }
 0x49a   : > { %v2291_v8 = vsel %vm2288_vm3, %v3966_v10, %v3992_v1  ;;  %v2292_v60 = vsel %vm2288_vm3, %v3992_v1, %v3967_v43  ;;  %v2293_v21 = vsel %vm2288_vm3, %v3967_v43, %v6370_v53  ;;  %v2247_v10 = vsel %vm2244_vm4, %v3931_v56, %v3947_v51 }
 0x49b   : > { %v2211_v33 = vsel %vm2209_vm5, %v6481_v38, %v3976_v24  ;;  %2486 = vmatpush.msrb.mxu0 %v2291_v8  ;;  %2506 = vmatpush.msrb.mxu1 %v2292_v60  ;;  %v3996_v1 = vunpack.i.l.bf16 %v5475_v18  ;;  %v6482_v43 = vunpack.i.h.bf16 %v5428_v34  ;;  %v2212_v8 = vsel %vm2209_vm5, %v3976_v24, %v3997_v3 }
 0x49c   : > { %2468 = vmatpush.msra.mxu3 %v2211_v33  ;;  %2526 = vmatpush.msrb.mxu2 %v2293_v21  ;;  %v2213_v56 = vsel %vm2209_vm5, %v3997_v3, %v3977_v39  ;;  %v4016_v60 = vunpack.i.l.bf16 %v4015_v47  ;;  %v6483_v21 = vunpack.i.h.bf16 %v5397_v27  ;;  %v3952_v24 = vunpack.i.h.bf16 %v5472_v32 }
 0x49d   : > { %v2167_v53 = vsel %vm2165_vm6, %v6482_v43, %v3986_v36  ;;  %2487 = vmatpush.msrb.mxu0 %v2247_v10  ;;  %2507 = vmatpush.msrb.mxu1 %v2248_v16  ;;  %v2214_v38 = vsel %vm2209_vm5, %v3977_v39, %v3996_v1  ;;  %v3951_v10 = vunpack.i.l.bf16 %v5472_v32  ;;  %v3942_v43 = vunpack.i.h.bf16 %v5435_v17 }
 0x49e   : > { %2469 = vmatpush.msra.mxu3 %v2167_v53  ;;  %2527 = vmatpush.msrb.mxu2 %v2249_v7  ;;  %v2123_v34 = vsel %vm2121_vm7, %v6483_v21, %v3941_v59  ;;  %v1844_v53 = vmul.f32 %v4835_v0, %v5166_v31  ;;  %v2416_v39 = vsel %vm2410_vm1, %v3971_v15, %v4016_v60  ;;  %v6485_v40 = vunpack.i.l.bf16 %v5511_v29 }
 0x49f   : > { %v2365_v51 = vpop.permute.xlu0 %2364  ;;  %2488 = vmatpush.msrb.mxu0 %v2212_v8  ;;  %2508 = vmatpush.msrb.mxu1 %v2213_v56  ;;  %v2124_v7 = vsel %vm2121_vm7, %v3941_v59, %v3952_v24  ;;  %v4017_v8 = vunpack.i.h.bf16 %v4015_v47  ;;  %v2125_v62 = vsel %vm2121_vm7, %v3952_v24, %v3942_v43  ;;  %v2126_v15 = vsel %vm2121_vm7, %v3942_v43, %v3951_v10 }
 0x4a0   : > { %v5550_v33 = vpop.permute.xlu1 %3999  ;;  %2470 = vmatpush.msra.mxu3 %v2123_v34  ;;  %2528 = vmatpush.msrb.mxu2 %v2214_v38  ;;  %v1846_v56 = vmul.f32 %v4958_v12, %v5227_v41  ;;  %v1847_v59 = vmul.f32 %v4901_v4, %v5230_v20 }
 0x4a1   : > { %v4002_v27 = vunpack.i.h.bf16 %v5550_v33  ;;  %v4001_v3 = vunpack.i.l.bf16 %v5550_v33  ;;  %v4030_v41 = vpop.permute.xlu2 %4029 }
 0x4a2   : > { %2471 = vmatpush.msra.mxu3 %v1844_v53 }
 0x4a3   : > { %3784 = vmatmul.msk.f32.vlgmr.msra.gmra.mxu3 %vm2432_vm8, %v5458_v63  ;;  %v2168_v31 = vsel %vm2165_vm6, %v3986_v36, %v4002_v27  ;;  %v2169_v6 = vsel %vm2165_vm6, %v4002_v27, %v3987_v28  ;;  %v2170_v16 = vsel %vm2165_vm6, %v3987_v28, %v4001_v3  ;;  %v1845_v36 = vmul.f32 %v4920_v37, %v5224_v42 }
 0x4a4   : > { %2543 = vmatpush.msrb.mxu3 %v2416_v39  ;;  %2489 = vmatpush.msrb.mxu0 %v2168_v31  ;;  %v2417_v42 = vsel %vm2410_vm1, %v4016_v60, %v4017_v8  ;;  %v6484_v27 = vunpack.i.l.bf16 %v5466_v26 }
 0x4a5   : > { %2509 = vmatpush.msrb.mxu1 %v2169_v6  ;;  %2529 = vmatpush.msrb.mxu2 %v2170_v16 }
 0x4a6   : > { %2490 = vmatpush.msrb.mxu0 %v2124_v7 }
 0x4a7   : > { %2510 = vmatpush.msrb.mxu1 %v2125_v62  ;;  %2530 = vmatpush.msrb.mxu2 %v2126_v15  ;;  %v2409_v17 = vpop.permute.xlu0 %2408 }
 0x4a8   : > { %v5581_v47 = vpop.permute.xlu1 %2115  ;;  %2491 = vmatpush.msrb.mxu0 %v1845_v36  ;;  %v2418_v21 = vsel %vm2410_vm1, %v4017_v8, %v2409_v17  ;;  %v4032_v17 = vunpack.i.h.bf16 %v4030_v41 }
 0x4a9   : > { %2511 = vmatpush.msrb.mxu1 %v1846_v56  ;;  %2531 = vmatpush.msrb.mxu2 %v1847_v59  ;;  %v4035_v43 = vpop.permute.xlu2 %4034  ;;  %v4031_v56 = vunpack.i.l.bf16 %v4030_v41 }
 0x4aa   : > { %3785 = vmatmul.msk.f32.vlgmr.msrb.gmra.mxu0 %vm2432_vm8, %v5458_v63  ;;  %3786 = vmatmul.msk.f32.vlgmr.msrb.gmra.mxu1 %vm2432_vm8, %v5458_v63 }
 0x4ab   : > { %3787 = vmatmul.msk.f32.vlgmr.msrb.gmra.mxu2 %vm2432_vm8, %v5458_v63  ;;  %2563 = vmatpush.msra.mxu0 %v2417_v42  ;;  %v2215_v29 = vsel %vm2209_vm5, %v3996_v1, %v4031_v56  ;;  %v2216_v41 = vsel %vm2209_vm5, %v4031_v56, %v4032_v17  ;;  %v2127_v1 = vsel %vm2121_vm7, %v3951_v10, %v5581_v47 }
 0x4ac   : > { %2583 = vmatpush.msra.mxu1 %v2418_v21  ;;  %v4037_v21 = vunpack.i.h.bf16 %v4035_v43 }
 0x4af   : > { %v4005_v20 = vpop.permute.xlu0 %4004 }
 0x4b0   : > { %v4007_v34 = vunpack.i.h.bf16 %v4005_v20  ;;  %v4006_v38 = vunpack.i.l.bf16 %v4005_v20  ;;  %v4020_v53 = vpop.permute.xlu1 %4019 }
 0x4b1   : > { %v4022_v28 = vunpack.i.h.bf16 %v4020_v53  ;;  %v4021_v24 = vunpack.i.l.bf16 %v4020_v53 }
 0x4b2   : > { %v2372_v39 = vsel %vm2366_vm2, %v6484_v27, %v4006_v38  ;;  %v2373_v31 = vsel %vm2366_vm2, %v4006_v38, %v4007_v34  ;;  %v2374_v60 = vsel %vm2366_vm2, %v4007_v34, %v2365_v51 }
 0x4b3   : > { %2544 = vmatpush.msrb.mxu3 %v2372_v39  ;;  %2564 = vmatpush.msra.mxu0 %v2373_v31  ;;  %v2337_v6 = vsel %vm2033_vm13, %v3981_v46, %v4021_v24  ;;  %v2338_v16 = vsel %vm2033_vm13, %v4021_v24, %v4022_v28  ;;  %v2339_v26 = vsel %vm2033_vm13, %v4022_v28, %v5490_v19  ;;  %v4036_v19 = vunpack.i.l.bf16 %v4035_v43  ;;  %v2208_v28 = vpop.permute.xlu2 %2207 }
 0x4b4   : > { %2584 = vmatpush.msra.mxu1 %v2374_v60  ;;  %v1848_v24 = vmul.f32 %v4938_v61, %v5233_v57  ;;  %v2217_v33 = vsel %vm2209_vm5, %v4032_v17, %v2208_v28  ;;  %v1849_v57 = vmul.f32 %v4940_v44, %v5322_v58 }
 0x4b5   : > { %2545 = vmatpush.msrb.mxu3 %v2337_v6  ;;  %2565 = vmatpush.msra.mxu0 %v2338_v16  ;;  %v2171_v45 = vsel %vm2165_vm6, %v4001_v3, %v4036_v19  ;;  %v1850_v6 = vmul.f32 %v5013_v48, %v5325_v35 }
 0x4b6   : > { %2585 = vmatpush.msra.mxu1 %v2339_v26 }
 0x4b7   : > { %v4010_v7 = vpop.permute.xlu0 %4009 }
 0x4b8   : > { %v4025_v8 = vpop.permute.xlu1 %4024  ;;  %v4012_v62 = vunpack.i.h.bf16 %v4010_v7  ;;  %v4011_v51 = vunpack.i.l.bf16 %v4010_v7 }
 0x4b9   : > { %v4027_v15 = vunpack.i.h.bf16 %v4025_v8  ;;  %v4026_v36 = vunpack.i.l.bf16 %v4025_v8 }
 0x4ba   : > { %v2250_v42 = vsel %vm2244_vm4, %v3946_v55, %v4011_v51  ;;  %v2251_v20 = vsel %vm2244_vm4, %v4011_v51, %v4012_v62  ;;  %v2172_v55 = vsel %vm2165_vm6, %v4036_v19, %v4037_v21 }
 0x4bb   : > { %v2294_v46 = vsel %vm2288_vm3, %v6485_v40, %v4026_v36  ;;  %v2295_v59 = vsel %vm2288_vm3, %v4026_v36, %v4027_v15 }
 0x4bc   : > { %2546 = vmatpush.msrb.mxu3 %v2294_v46  ;;  %2566 = vmatpush.msra.mxu0 %v2295_v59 }
 0x4be   : > { %2547 = vmatpush.msrb.mxu3 %v2250_v42  ;;  %2567 = vmatpush.msra.mxu0 %v2251_v20 }
 0x4bf   : > { %v2287_v34 = vpop.permute.xlu0 %2286 }
 0x4c0   : > { %v2243_v38 = vpop.permute.xlu1 %2242  ;;  %2548 = vmatpush.msrb.mxu3 %v2215_v29  ;;  %2568 = vmatpush.msra.mxu0 %v2216_v41  ;;  %v2296_v53 = vsel %vm2288_vm3, %v4027_v15, %v2287_v34 }
 0x4c1   : > { %2586 = vmatpush.msra.mxu1 %v2296_v53  ;;  %v2252_v18 = vsel %vm2244_vm4, %v4012_v62, %v2243_v38 }
 0x4c2   : > { %2549 = vmatpush.msrb.mxu3 %v2171_v45  ;;  %2569 = vmatpush.msra.mxu0 %v2172_v55 }
 0x4c3   : > { %2587 = vmatpush.msra.mxu1 %v2252_v18 }
 0x4c4   : > { %2550 = vmatpush.msrb.mxu3 %v2127_v1 }
 0x4c5   : > { %2588 = vmatpush.msra.mxu1 %v2217_v33 }
 0x4c6   : > { %2551 = vmatpush.msrb.mxu3 %v1848_v24 }
 0x4c7   : > { %3788 = vmatmul.msk.f32.vlgmr.msrb.gmra.mxu3 %vm2432_vm8, %v5458_v63  ;;  %v4040_v3 = vpop.permute.xlu0 %4039 }
 0x4c8   : > { %v4042_v27 = vunpack.i.h.bf16 %v4040_v3  ;;  %v4041_v39 = vunpack.i.l.bf16 %v4040_v3  ;;  %v2164_v31 = vpop.permute.xlu1 %2163 }
 0x4c9   : > { %v2173_v32 = vsel %vm2165_vm6, %v4037_v21, %v2164_v31 }
 0x4ca   : > { %2589 = vmatpush.msra.mxu1 %v2173_v32  ;;  %v2128_v10 = vsel %vm2121_vm7, %v5581_v47, %v4041_v39  ;;  %v2129_v60 = vsel %vm2121_vm7, %v4041_v39, %v4042_v27  ;;  %v2430_v47 = vpop.permute.xlu2 %2429 }
 0x4cb   : > { %2570 = vmatpush.msra.mxu0 %v2128_v10  ;;  %v4407_v10 = vmov 8192.0  }
 0x4cc   : > { %2590 = vmatpush.msra.mxu1 %v2129_v60  ;;  %4211 = vrcp.f32 %v4407_v10 }
 0x4cd   : > { %2571 = vmatpush.msra.mxu0 %v1849_v57 }
 0x4ce   : > { %2591 = vmatpush.msra.mxu1 %v1850_v6  ;;  %3789 = vmatmul.msk.f32.vlgmr.msra.gmra.mxu0 %vm2432_vm8, %v5458_v63 }
 0x4cf   : > { %3790 = vmatmul.msk.f32.vlgmr.msra.gmra.mxu1 %vm2432_vm8, %v5458_v63 }
 0x4d2   : > { %v4212_v60 = vpop.eup %4211 }
 0x4d3   : > { %v2639_v57 = vmul.f32 8192.0, %v4212_v60  ;;  %vm2643_vm9 = vweird.f32 %v4212_v60 }
 0x4f8   : > { %v2453_v26 = vpop.f32.mrf.mxu2 }
 0x4f9   : > { %v5643_v7 = vadd.f32 %v2453_v26, %v2430_v47 }
 0x4fb   : > { %v2614_v35 = vmul.f32 %v5643_v7, %v5643_v7 }
 0x526   : > { %v2473_v16 = vpop.f32.mrf.mxu3 }
 0x527   : > { %v5641_v43 = vadd.f32 %v2473_v16, %v2430_v47  ;;  %v2493_v58 = vpop.f32.mrf.mxu0  ;;  %v2513_v63 = vpop.f32.mrf.mxu1 }
 0x528   : > { %v5651_v51 = vadd.f32 %v2493_v58, %v2430_v47  ;;  %v5656_v40 = vadd.f32 %v2513_v63, %v2430_v47 }
 0x529   : > { %v2615_v8 = vmul.f32 %v5641_v43, %v5641_v43  ;;  %v2598_v62 = vadd.f32 %v5641_v43, %v5643_v7 }
 0x52a   : > { %v2616_v56 = vmul.f32 %v5651_v51, %v5651_v51  ;;  %v2617_v19 = vmul.f32 %v5656_v40, %v5656_v40 }
 0x52b   : > { %v2622_v15 = vadd.f32 %v2615_v8, %v2614_v35  ;;  %v2599_v17 = vadd.f32 %v2598_v62, %v5651_v51 }
 0x52d   : > { %v2623_v46 = vadd.f32 %v2622_v15, %v2616_v56  ;;  %v2600_v21 = vadd.f32 %v2599_v17, %v5656_v40 }
 0x52e   : > { %v2533_v36 = vpop.f32.mrf.mxu2 }
 0x52f   : > { %v5658_v59 = vadd.f32 %v2533_v36, %v2430_v47  ;;  %v2624_v42 = vadd.f32 %v2623_v46, %v2617_v19 }
 0x531   : > { %v2618_v20 = vmul.f32 %v5658_v59, %v5658_v59  ;;  %v2601_v29 = vadd.f32 %v2600_v21, %v5658_v59 }
 0x533   : > { %v2625_v45 = vadd.f32 %v2624_v42, %v2618_v20 }
 0x54a   : > { %v2553_v34 = vpop.f32.mrf.mxu3 }
 0x54b   : > { %v5666_v41 = vadd.f32 %v2553_v34, %v2430_v47  ;;  %v2573_v38 = vpop.f32.mrf.mxu0 }
 0x54c   : > { %v5668_v53 = vadd.f32 %v2573_v38, %v2430_v47  ;;  %v2593_v28 = vpop.f32.mrf.mxu1 }
 0x54d   : > { %v2602_v55 = vadd.f32 %v2601_v29, %v5666_v41  ;;  %v2619_v18 = vmul.f32 %v5666_v41, %v5666_v41  ;;  %v5673_v1 = vadd.f32 %v2593_v28, %v2430_v47  ;;  %v2640_v47 = vsub.f32 1.0, %v2639_v57 }
 0x54e   : > { %v2620_v24 = vmul.f32 %v5668_v53, %v5668_v53 }
 0x54f   : > { %v2603_v33 = vadd.f32 %v2602_v55, %v5668_v53  ;;  %v2626_v3 = vadd.f32 %v2625_v45, %v2619_v18  ;;  %v2621_v39 = vmul.f32 %v5673_v1, %v5673_v1  ;;  %v2641_v63 = vmul.f32 %v4212_v60, %v2640_v47 }
 0x551   : > { %v2604_v27 = vadd.f32 %v2603_v33, %v5673_v1  ;;  %v2627_v31 = vadd.f32 %v2626_v3, %v2620_v24  ;;  %v2642_v46 = vadd.f32 %v4212_v60, %v2641_v63  ;;  %v5685_v33 = vpop.permute.xlu2 %2691 }
 0x553   : > { %2605 = vadd.xlane.f32.xlu0 %v2604_v27  ;;  %v2628_v32 = vadd.f32 %v2627_v31, %v2621_v39  ;;  %v2644_v20 = vsel %vm2643_vm9, %v4212_v60, %v2642_v46 }
 0x555   : > { %2629 = vadd.xlane.f32.xlu1 %v2628_v32 }
 0x5c6   : > { %v2606_v6 = vpop.xlane.xlu0 %2605 }
 0x5c7   : > { %v2607_v16 = vrot.slane %v2606_v6, 4 }
 0x5c8   : > { %v2630_v26 = vpop.xlane.xlu1 %2629 }
 0x5c9   : > { %v2608_v58 = vadd.f32 %v2607_v16, %v2606_v6  ;;  %v2631_v8 = vrot.slane %v2630_v26, 4 }
 0x5cb   : > { %v2609_v35 = vrot.slane %v2608_v58, 2  ;;  %v2632_v62 = vadd.f32 %v2631_v8, %v2630_v26 }
 0x5cd   : > { %v2633_v15 = vrot.slane %v2632_v62, 2  ;;  %v2610_v36 = vadd.f32 %v2609_v35, %v2608_v58 }
 0x5cf   : > { %v2611_v17 = vrot.slane %v2610_v36, 1  ;;  %v2634_v56 = vadd.f32 %v2633_v15, %v2632_v62 }
 0x5d1   : > { %v2612_v21 = vadd.f32 %v2611_v17, %v2610_v36  ;;  %v2635_v19 = vrot.slane %v2634_v56, 1 }
 0x5d3   : > { %3827 = vpush %v2612_v21  ;;  %v2636_v42 = vadd.f32 %v2635_v19, %v2634_v56 }
 0x5d5   : > { %3829 = vpush %v2636_v42 }
 0x5d6   : > { %3831 = vpush %v2644_v20 }
 0x604   : > { %s3828_s23 = spop %3827 }
 0x606   : > { %s3830_s30 = spop %3829 }
 0x607   : > { %s5681_s20 = spop %3831 }
 0x608   : > { %s2646_s29 = smul.f32 %s5681_s20, %s3828_s23 }
 0x609   : > { %s2655_s27 = smul.f32 %s5681_s20, %s3830_s30 }
 0x60a   : > { %s2656_s3 = smul.f32 %s2646_s29, %s2646_s29  ;;  %v5687_v3 = vstv %s2646_s29 }
 0x60b   : > { %v2664_v27 = vsub.f32 %v5666_v41, %v5687_v3  ;;  %v2663_v39 = vsub.f32 %v5658_v59, %v5687_v3  ;;  %v2659_v31 = vsub.f32 %v5643_v7, %v5687_v3  ;;  %v2660_v32 = vsub.f32 %v5641_v43, %v5687_v3  ;;  %v2705_v7 = vpop.permute.xlu2 %2704 }
 0x60c   : > { %s2657_s26 = ssub.f32 %s2655_s27, %s2656_s3  ;;  %v2661_v47 = vsub.f32 %v5651_v51, %v5687_v3  ;;  %v2662_v42 = vsub.f32 %v5656_v40, %v5687_v3  ;;  %v2665_v40 = vsub.f32 %v5668_v53, %v5687_v3  ;;  %s6490_s3 = smov 96  }
 0x60d   : > { %s6504_s27 = smov 94  }
 0x60e   : > { %s2667_s28 = sadd.f32 1e-05, %s2657_s26  ;;  %s6496_s26 = smov 64  }
 0x610   : > { %v2668_v34 = vstv %s2667_s28 }
 0x611   : > { %4213 = vrsqrt.f32 %v2668_v34  ;;  %vm2675_vm11 = vweird.f32 %v2668_v34 }
 0x617   : > { %v4214_v29 = vpop.eup %4213 }
 0x618   : > { %v2670_v38 = vmul.f32 %v4214_v29, %v2668_v34  ;;  %vm2676_vm10 = vweird.f32 %v4214_v29 }
 0x619   : > { %vm2677_vm12 = vmor %vm2675_vm11, %vm2676_vm10 }
 0x61a   : > { %v2671_v28 = vmul.f32 %v4214_v29, %v2670_v38 }
 0x61c   : > { %v2672_v45 = vmul.f32 0.5, %v2671_v28 }
 0x61e   : > { %v2673_v55 = vsub.f32 1.5, %v2672_v45 }
 0x620   : > { %v2674_v18 = vmul.f32 %v4214_v29, %v2673_v55 }
 0x622   : > { %v2678_v24 = vsel %vm2677_vm12, %v4214_v29, %v2674_v18 }
 0x623   : > { %3833 = vpush %v2678_v24 }
 0x654   : > { %s3834_s23 = spop %3833 }
 0x655   : > { %v2680_v10 = vstv %s3834_s23 }
 0x656   : > { %v2686_v60 = vmul.f32 %v2680_v10, %v2664_v27  ;;  %v2685_v57 = vmul.f32 %v2680_v10, %v2663_v39  ;;  %v2681_v6 = vmul.f32 %v2680_v10, %v2659_v31  ;;  %v2682_v16 = vmul.f32 %v2680_v10, %v2660_v32 }
 0x657   : > { %v2683_v8 = vmul.f32 %v2680_v10, %v2661_v47  ;;  %v2684_v45 = vmul.f32 %v2680_v10, %v2662_v42 }
 0x658   : > { %v2699_v26 = vmul.f32 %v5685_v33, %v2686_v60  ;;  %v2698_v41 = vmul.f32 %v5685_v33, %v2685_v57  ;;  %v2694_v59 = vmul.f32 %v5685_v33, %v2681_v6  ;;  %v2695_v58 = vmul.f32 %v5685_v33, %v2682_v16 }
 0x659   : > { %v2696_v51 = vmul.f32 %v5685_v33, %v2683_v8  ;;  %v2697_v57 = vmul.f32 %v5685_v33, %v2684_v45 }
 0x65a   : > { %v2712_v35 = vadd.f32 %v2705_v7, %v2699_v26  ;;  %v2711_v43 = vadd.f32 %v2705_v7, %v2698_v41  ;;  %v2707_v62 = vadd.f32 %v2705_v7, %v2694_v59  ;;  %v2708_v63 = vadd.f32 %v2705_v7, %v2695_v58 }
 0x65b   : > { %v2709_v28 = vadd.f32 %v2705_v7, %v2696_v51  ;;  %v2710_v47 = vadd.f32 %v2705_v7, %v2697_v57  ;;  %v2687_v26 = vmul.f32 %v2680_v10, %v2665_v40 }
 0x65c   : > { %v2720_v15 = vadd.f32 3.0, %v2712_v35  ;;  %v2719_v36 = vadd.f32 3.0, %v2711_v43  ;;  %v2715_v17 = vadd.f32 3.0, %v2707_v62  ;;  %v2716_v56 = vadd.f32 3.0, %v2708_v63 }
 0x65d   : > { %v2717_v60 = vadd.f32 3.0, %v2709_v28  ;;  %v2718_v58 = vadd.f32 3.0, %v2710_v47  ;;  %v2700_v8 = vmul.f32 %v5685_v33, %v2687_v26 }
 0x65e   : > { %v2728_v46 = vmax.f32 %v2720_v15, 0.0  ;;  %v2727_v21 = vmax.f32 %v2719_v36, 0.0  ;;  %v2723_v19 = vmax.f32 %v2715_v17, 0.0  ;;  %v2724_v38 = vmax.f32 %v2716_v56, 0.0 }
 0x65f   : > { %v2725_v16 = vmax.f32 %v2717_v60, 0.0  ;;  %v2713_v15 = vadd.f32 %v2705_v7, %v2700_v8 }
 0x660   : > { %v2736_v20 = vmin.f32 %v2728_v46, 6.0  ;;  %v2735_v34 = vmin.f32 %v2727_v21, 6.0  ;;  %v2731_v29 = vmin.f32 %v2723_v19, 6.0  ;;  %v2732_v32 = vmin.f32 %v2724_v38, 6.0 }
 0x661   : > { %v2733_v59 = vmin.f32 %v2725_v16, 6.0 }
 0x662   : > { %v2744_v55 = vmul.f32 %v2736_v20, %v2712_v35  ;;  %v2743_v18 = vmul.f32 %v2735_v34, %v2711_v43  ;;  %v2739_v24 = vmul.f32 %v2731_v29, %v2707_v62  ;;  %v2740_v6 = vmul.f32 %v2732_v32, %v2708_v63 }
 0x663   : > { %v2666_v35 = vsub.f32 %v5673_v1, %v5687_v3  ;;  %v2741_v43 = vmul.f32 %v2733_v59, %v2709_v28  ;;  %v2726_v62 = vmax.f32 %v2718_v58, 0.0  ;;  %v2721_v63 = vadd.f32 3.0, %v2713_v15 }
 0x664   : > { %v2752_v27 = vmul.f32 0.16666667, %v2744_v55  ;;  %v2751_v39 = vmul.f32 0.16666667, %v2743_v18  ;;  %v2747_v31 = vmul.f32 0.16666667, %v2739_v24 }
 0x665   : > { %v2748_v41 = vmul.f32 0.16666667, %v2740_v6  ;;  %v2688_v36 = vmul.f32 %v2680_v10, %v2666_v35  ;;  %v2749_v17 = vmul.f32 0.16666667, %v2741_v43  ;;  %v2734_v53 = vmin.f32 %v2726_v62, 6.0  ;;  %v6486_v24 = vld [vmem:[#allocation32_spill] sm:$0xff] }
 0x666   : > { %2775 = vrot.lane.b32.xlu1 %v2752_v27, %s4399_s21  ;;  %2773 = vrot.lane.b32.xlu0 %v2751_v39, %s4399_s21  ;;  %v2729_v46 = vmax.f32 %v2721_v63, 0.0 }
 0x667   : > { %2765 = vrot.lane.b32.xlu2 %v2747_v31, %s4399_s21  ;;  %v2701_v56 = vmul.f32 %v5685_v33, %v2688_v36  ;;  %v2742_v51 = vmul.f32 %v2734_v53, %v2710_v47  ;;  %v6487_v31 = vld [vmem:[#allocation31_spill] sm:$0xff]  ;;  %v6488_v53 = vld [vmem:[#allocation37_spill] sm:$0xff] }
 0x668   : > { %v2737_v42 = vmin.f32 %v2729_v46, 6.0 }
 0x669   : > { %v2714_v21 = vadd.f32 %v2705_v7, %v2701_v56  ;;  %v2750_v19 = vmul.f32 0.16666667, %v2742_v51  ;;  %v6489_v56 = vld [vmem:[#allocation16_spill] sm:$0xff] }
 0x66a   : > { %v2745_v1 = vmul.f32 %v2737_v42, %v2713_v15 }
 0x66b   : > { %v2722_v20 = vadd.f32 3.0, %v2714_v21 }
 0x66c   : > { %v2753_v34 = vmul.f32 0.16666667, %v2745_v1  ;;  %v6492_v1 = vld [vmem:[#allocation9_spill] sm:$0xff] }
 0x66d   : > { %v2730_v3 = vmax.f32 %v2722_v20, 0.0 }
 0x66f   : > { %2767 = vrot.lane.b32.xlu2 %v2748_v41, %s4399_s21  ;;  %v2738_v29 = vmin.f32 %v2730_v3, 6.0 }
 0x671   : > { %v2746_v10 = vmul.f32 %v2738_v29, %v2714_v21 }
 0x673   : > { %v2754_v38 = vmul.f32 0.16666667, %v2746_v10 }
 0x677   : > { %2769 = vrot.lane.b32.xlu2 %v2749_v17, %s4399_s21 }
 0x67f   : > { %2771 = vrot.lane.b32.xlu2 %v2750_v19, %s4399_s21  ;;  %v6491_v19 = vld [vmem:[#allocation29_spill] sm:$0xff] }
 0x687   : > { %2777 = vrot.lane.b32.xlu2 %v2753_v34, %s4399_s21 }
 0x68f   : > { %2779 = vrot.lane.b32.xlu2 %v2754_v38, %s4399_s21  ;;  %s6493_s21 = smov 62   ;;  %v6494_v38 = vld [vmem:[#allocation36_spill] sm:$0xff] }
 0x6c1   : > { %v2766_v33 = vpop.permute.xlu2 %2765 }
 0x6c2   : > { %v5722_v28 = vsel %vm1798_vm15, 0.0, %v2766_v33 }
 0x6c3   : > { %v5731_v18 = vmul.f32 %v5722_v28, %v5019_v5  ;;  %v5739_v39 = vmul.f32 %v5722_v28, %v5098_v14  ;;  %v2816_v51 = vmul.f32 %v5722_v28, %v6489_v56  ;;  %v2843_v3 = vmul.f32 %v5722_v28, %v6492_v1  ;;  %v6503_v56 = vld [vmem:[#allocation41_spill] sm:$0xff] }
 0x6c9   : > { %v2768_v7 = vpop.permute.xlu2 %2767 }
 0x6ca   : > { %v5725_v45 = vsel %vm1798_vm15, %v2766_v33, %v2768_v7  ;;  %v6495_v33 = vld [vmem:[#allocation11_spill] sm:$0xff] }
 0x6cb   : > { %v4043_v55 = vpack.i.bf16 %v5725_v45, %v5722_v28  ;;  %v5735_v27 = vmul.f32 %v5725_v45, %v6486_v24  ;;  %v5743_v32 = vmul.f32 %v5725_v45, %v6487_v31  ;;  %v2817_v63 = vmul.f32 %v5725_v45, %v6488_v53  ;;  %v6501_v53 = vld [vmem:[#allocation22_spill] sm:$0xff] }
 0x6cc   : > { %v2844_v42 = vmul.f32 %v5725_v45, %v6491_v19  ;;  %v6505_v19 = vld [vmem:[#allocation17_spill] sm:$0xff] }
 0x6cd   : > { %4044 = vrot.lane.b32.xlu2 %v4043_v55, %s4401_s2  ;;  %v4113_v60 = vpack.i.bf16 %v5735_v27, %v5731_v18  ;;  %v4143_v5 = vpack.i.bf16 %v5743_v32, %v5739_v39  ;;  %v4133_v46 = vpack.i.bf16 %v2817_v63, %v2816_v51  ;;  %v6502_v63 = vld [vmem:[#allocation13_spill] sm:$0xff]  ;;  %v6510_v27 = vld [vmem:[#allocation14_spill] sm:$0xff]  ;;  %v6518_v39 = vld [vmem:[#allocation20_spill] sm:$0xff] }
 0x6ce   : > { %v4098_v29 = vpack.i.bf16 %v2844_v42, %v2843_v3  ;;  %v6507_v3 = vld [vmem:[#allocation19_spill] sm:$0xff] }
 0x6d1   : > { %v2770_v57 = vpop.permute.xlu2 %2769 }
 0x6d2   : > { %v5754_v47 = vsel %vm1798_vm15, %v2768_v7, %v2770_v57  ;;  %v2834_v7 = vmul.f32 %v5722_v28, %v6495_v33 }
 0x6d8   : > { %v2776_v40 = vpop.permute.xlu1 %2775  ;;  %v2774_v6 = vpop.permute.xlu0 %2773 }
 0x6d9   : > { %v5751_v16 = vsel %vm1798_vm15, %v2774_v6, %v2776_v40  ;;  %v2772_v14 = vpop.permute.xlu2 %2771 }
 0x6da   : > { %v5757_v26 = vsel %vm1798_vm15, %v2770_v57, %v2772_v14  ;;  %v5760_v41 = vsel %vm1798_vm15, %v2772_v14, %v2774_v6  ;;  %v5775_v35 = vmul.f32 %v5751_v16, %v5125_v25  ;;  %v5783_v15 = vmul.f32 %v5751_v16, %v5147_v54 }
 0x6db   : > { %v4058_v59 = vpack.i.bf16 %v5760_v41, %v5754_v47  ;;  %v4063_v58 = vpack.i.bf16 %v5757_v26, %v5751_v16  ;;  %v5771_v8 = vmul.f32 %v5757_v26, %v5075_v30  ;;  %v5779_v62 = vmul.f32 %v5757_v26, %v5121_v22 }
 0x6dc   : > { %v2839_v10 = vmul.f32 %v5751_v16, %v5083_v9  ;;  %v2811_v57 = vmul.f32 %v5760_v41, %v5277_v52  ;;  %v2845_v6 = vmul.f32 %v5754_v47, %v5011_v49  ;;  %v2809_v14 = vmul.f32 %v5754_v47, %v5113_v2  ;;  %v6500_v52 = vld [vmem:[#allocation18_spill] sm:$0xff] }
 0x6dd   : > { %4059 = vrot.lane.b32.xlu1 %v4058_v59, %s4403_s25  ;;  %4049 = vrot.lane.b32.xlu2 %v4058_v59, %s4401_s2  ;;  %v4163_v36 = vpack.i.bf16 %v5771_v8, %v5775_v35  ;;  %v4183_v30 = vpack.i.bf16 %v5779_v62, %v5783_v15  ;;  %v2821_v49 = vmul.f32 %v5751_v16, %v6501_v53  ;;  %v2756_v8 = vld [vmem:[%s6300_s14] sm:$0xff]  ;;  %v6521_v15 = vld [vmem:[#allocation25_spill] sm:$0xff] }
 0x6de   : > { %4064 = vrot.lane.b32.xlu0 %v4063_v58, %s4401_s2  ;;  %v2846_v2 = vmul.f32 %v5757_v26, %v6502_v63  ;;  %v2848_v51 = vmul.f32 %v5751_v16, %v6503_v56  ;;  %v2829_v42 = vmul.f32 %v5760_v41, %v6505_v19  ;;  %v6520_v35 = vld [vmem:[#allocation28_spill] sm:$0xff] }
 0x6df   : > { %v3339_v63 = vld [vmem:[%s6301_s15] sm:$0xff] }
 0x6e0   : > { %v3340_v56 = vld [vmem:[%s6302_s16] sm:$0xff] }
 0x6e1   : > { %v2778_v43 = vpop.permute.xlu2 %2777 }
 0x6e2   : > { %v5792_v17 = vsel %vm1798_vm15, %v2776_v40, %v2778_v43  ;;  %v2838_v40 = vmul.f32 %v5760_v41, %v5106_v50  ;;  %v2819_v50 = vmul.f32 %v5757_v26, %v6500_v52  ;;  %v6517_v52 = vld [vmem:[#allocation24_spill] sm:$0xff] }
 0x6e3   : > { %v2849_v20 = vmul.f32 %v5792_v17, %v5065_v23  ;;  %v2835_v23 = vmul.f32 %v5725_v45, %v6494_v38 }
 0x6e5   : > { %4054 = vrot.lane.b32.xlu2 %v4043_v55, %s4403_s25  ;;  %v4108_v31 = vpack.i.bf16 %v2835_v23, %v2834_v7  ;;  %v6511_v7 = vld [vmem:[#allocation27_spill] sm:$0xff] }
 0x6e6   : > { %4074 = vrot.lane.b32.xlu0 %v4043_v55, %s4400_s1 }
 0x6e9   : > { %v2780_v25 = vpop.permute.xlu2 %2779 }
 0x6ea   : > { %v5795_v22 = vsel %vm1798_vm15, %v2778_v43, %v2780_v25  ;;  %v5830_v24 = vsel %vm1798_vm15, %v2780_v25, 0.0  ;;  %v4158_v25 = vpack.i.bf16 %v2811_v57, %v2809_v14 }
 0x6eb   : > { %v4068_v54 = vpack.i.bf16 %v5795_v22, %v5792_v17  ;;  %v2850_v21 = vmul.f32 %v5795_v22, %v5332_v11  ;;  %v2837_v11 = vmul.f32 %v5757_v26, %v5257_v13  ;;  %v6497_v13 = vld [vmem:[#allocation39_spill] sm:$0xff]  ;;  %v2851_v32 = vmul.f32 %v5830_v24, %v6518_v39 }
 0x6ec   : > { %v2847_v9 = vmul.f32 %v5760_v41, %v6497_v13  ;;  %v4198_v62 = vpack.i.bf16 %v5830_v24, %v5795_v22 }
 0x6ed   : > { %4079 = vrot.lane.b32.xlu2 %v4058_v59, %s4400_s1  ;;  %4069 = vrot.lane.b32.xlu1 %v4068_v54, %s4401_s2  ;;  %v4138_v34 = vpack.i.bf16 %v2850_v21, %v2849_v20  ;;  %v4153_v55 = vpack.i.bf16 %v2837_v11, %v2839_v10  ;;  %v6498_v59 = vld [vmem:[#allocation40_spill] sm:$0xff]  ;;  %v4128_v21 = vpack.i.bf16 %v2846_v2, %v2848_v51  ;;  %v6506_v20 = vld [vmem:[#allocation42_spill] sm:$0xff]  ;;  %v6509_v10 = vld [vmem:[#allocation23_spill] sm:$0xff] }
 0x6ee   : > { %4094 = vrot.lane.b32.xlu0 %v4063_v58, %s4400_s1  ;;  %v4103_v43 = vpack.i.bf16 %v2847_v9, %v2845_v6  ;;  %v2823_v1 = vmul.f32 %v5795_v22, %v6506_v20  ;;  %v2822_v18 = vmul.f32 %v5792_v17, %v6509_v10  ;;  %v6513_v9 = vld [vmem:[#allocation26_spill] sm:$0xff] }
 0x6ef   : > { %v2813_v57 = vmul.f32 %v5792_v17, %v6513_v9 }
 0x6f0   : > { %v4188_v23 = vpack.i.bf16 %v2823_v1, %v2822_v18 }
 0x6f5   : > { %4134 = vrot.lane.b32.xlu2 %v4133_v46, %s6490_s3  ;;  %4084 = vrot.lane.b32.xlu1 %v4063_v58, %s4403_s25  ;;  %v2836_v58 = vmul.f32 %v5754_v47, %v6498_v59  ;;  %v4178_v46 = vpack.i.bf16 %v2819_v50, %v2821_v49  ;;  %v2842_v50 = vmul.f32 %v5830_v24, %v6517_v52 }
 0x6f6   : > { %2866 = vrot.lane.b32.xlu0 %v5792_v17, %s4400_s1 }
 0x6fd   : > { %4089 = vrot.lane.b32.xlu1 %v4068_v54, %s4403_s25  ;;  %4139 = vrot.lane.b32.xlu2 %v4138_v34, %s6493_s21  ;;  %v4118_v54 = vpack.i.bf16 %v2838_v40, %v2836_v58  ;;  %v2820_v34 = vmul.f32 %v5760_v41, %v6507_v3  ;;  %v6514_v40 = vld [vmem:[#allocation15_spill] sm:$0xff]  ;;  %v6515_v58 = vld [vmem:[#allocation44_spill] sm:$0xff] }
 0x6fe   : > { %4099 = vrot.lane.b32.xlu0 %v4098_v29, %s6493_s21  ;;  %v6508_v29 = vld [vmem:[#allocation12_spill] sm:$0xff]  ;;  %v2840_v6 = vmul.f32 %v5792_v17, %v6514_v40 }
 0x6ff   : > { %v2827_v11 = vmul.f32 %v5754_v47, %v6508_v29 }
 0x701   : > { %v4123_v38 = vpack.i.bf16 %v2829_v42, %v2827_v11 }
 0x705   : > { %3110 = vrot.lane.b32.xlu1 %v5830_v24, %s4401_s2  ;;  %4154 = vrot.lane.b32.xlu2 %v4153_v55, %s6496_s26  ;;  %s6499_s2 = smov 126   ;;  %v2814_v55 = vmul.f32 %v5795_v22, %v6511_v7 }
 0x706   : > { %4109 = vrot.lane.b32.xlu0 %v4108_v31, %s6496_s26  ;;  %v6512_v31 = vld [vmem:[#allocation43_spill] sm:$0xff] }
 0x707   : > { %v2841_v13 = vmul.f32 %v5795_v22, %v6512_v31  ;;  %v4193_v14 = vpack.i.bf16 %v2814_v55, %v2813_v57 }
 0x709   : > { %v4168_v59 = vpack.i.bf16 %v2841_v13, %v2840_v6 }
 0x70d   : > { %4104 = vrot.lane.b32.xlu1 %v4103_v43, %s6493_s21  ;;  %4159 = vrot.lane.b32.xlu2 %v4158_v25, %s6499_s2  ;;  %v2832_v43 = vmul.f32 %v5795_v22, %v6515_v58  ;;  %v6516_v25 = vld [vmem:[#allocation21_spill] sm:$0xff] }
 0x70e   : > { %4119 = vrot.lane.b32.xlu0 %v4118_v54, %s6496_s26  ;;  %v2831_v54 = vmul.f32 %v5792_v17, %v6516_v25 }
 0x710   : > { %v4173_v53 = vpack.i.bf16 %v2832_v43, %v2831_v54 }
 0x715   : > { %4114 = vrot.lane.b32.xlu1 %v4113_v60, %s6504_s27  ;;  %4179 = vrot.lane.b32.xlu2 %v4178_v46, %s6490_s3  ;;  %v2818_v60 = vmul.f32 %v5754_v47, %v6510_v27 }
 0x716   : > { %4129 = vrot.lane.b32.xlu0 %v4128_v21, %s6493_s21  ;;  %v3499_v21 = vld [vmem:[%s6304_s18] sm:$0xf] }
 0x717   : > { %v4148_v33 = vpack.i.bf16 %v2820_v34, %v2818_v60 }
 0x71d   : > { %4124 = vrot.lane.b32.xlu1 %v4123_v38, %s6504_s27  ;;  %4189 = vrot.lane.b32.xlu2 %v4188_v23, %s6490_s3 }
 0x71e   : > { %4149 = vrot.lane.b32.xlu0 %v4148_v33, %s6490_s3 }
 0x725   : > { %4144 = vrot.lane.b32.xlu1 %v4143_v5, %s6499_s2  ;;  %4194 = vrot.lane.b32.xlu2 %v4193_v14, %s6499_s2  ;;  %v6519_v5 = vld [vmem:[#allocation38_spill] sm:$0xff] }
 0x726   : > { %4169 = vrot.lane.b32.xlu0 %v4168_v59, %s6496_s26  ;;  %v2824_v49 = vmul.f32 %v5830_v24, %v6519_v5 }
 0x727   : > { %v4045_v2 = vpop.permute.xlu2 %4044 }
 0x728   : > { %v4047_v23 = vunpack.i.h.bf16 %v4045_v2  ;;  %v4046_v33 = vunpack.i.l.bf16 %v4045_v2 }
 0x72a   : > { %v3112_v9 = vsel %vm2366_vm2, %v4046_v33, %v4047_v23 }
 0x72d   : > { %4164 = vrot.lane.b32.xlu1 %v4163_v36, %s6504_s27  ;;  %3076 = vrot.lane.b32.xlu2 %v2842_v50, %s6496_s26  ;;  %v2833_v36 = vmul.f32 %v5830_v24, %v6520_v35 }
 0x72e   : > { %4174 = vrot.lane.b32.xlu0 %v4173_v53, %s6504_s27 }
 0x735   : > { %3153 = vrot.lane.b32.xlu1 %v2851_v32, %s6493_s21  ;;  %2956 = vrot.lane.b32.xlu2 %v2824_v49, %s6490_s3 }
 0x736   : > { %4184 = vrot.lane.b32.xlu0 %v4183_v30, %s6499_s2  ;;  %v2815_v30 = vmul.f32 %v5830_v24, %v6521_v15 }
 0x737   : > { %v5936_v51 = vpop.permute.xlu2 %4049 }
 0x738   : > { %v4051_v25 = vunpack.i.l.bf16 %v5936_v51 }
 0x73a   : > { %v3113_v39 = vsel %vm2366_vm2, %v4047_v23, %v4051_v25  ;;  %v4052_v23 = vunpack.i.h.bf16 %v5936_v51 }
 0x73d   : > { %3033 = vrot.lane.b32.xlu1 %v2833_v36, %s6504_s27  ;;  %3173 = vperm.xlu2 %3881, %v2756_v8  }
 0x73e   : > { %2990 = vrot.lane.b32.xlu0 %v5830_v24, %s4403_s25 }
 0x73f   : > { %v5943_v19 = vpop.permute.xlu2 %4054 }
 0x740   : > { %v4057_v8 = vunpack.i.h.bf16 %v5943_v19  ;;  %v4056_v35 = vunpack.i.l.bf16 %v5943_v19 }
 0x745   : > { %4199 = vrot.lane.b32.xlu1 %v4198_v62, %s4400_s1  ;;  %3434 = vperm.xlu2 %3881, %v3339_v63   ;;  %s3810_s1 = sshll.u32 %s6532_s22, 5 }
 0x746   : > { %2913 = vrot.lane.b32.xlu0 %v2815_v30, %s6499_s2 }
 0x747   : > { %v5949_v20 = vpop.permute.xlu2 %4079 }
 0x74d   : > { %3447 = vperm.xlu2 %3881, %v3340_v56  }
 0x74f   : > { %v5945_v24 = vpop.permute.xlu1 %4059  ;;  %v5968_v27 = vpop.permute.xlu2 %4134 }
 0x750   : > { %v5938_v46 = vpop.permute.xlu0 %4064  ;;  %v4137_v56 = vunpack.i.h.bf16 %v5968_v27 }
 0x751   : > { %v4066_v3 = vunpack.i.l.bf16 %v5938_v46  ;;  %v4067_v62 = vunpack.i.h.bf16 %v5938_v46 }
 0x755   : > { %3502 = vperm.xlu2 %3881, %v3499_v21   ;;  %v4136_v21 = vunpack.i.l.bf16 %v5968_v27  ;;  %v3114_v27 = vsel %vm2366_vm2, %v4051_v25, %v4067_v62 }
 0x757   : > { %v5972_v31 = vpop.permute.xlu2 %4139 }
 0x758   : > { %v5947_v42 = vpop.permute.xlu0 %4074 }
 0x75f   : > { %v5951_v1 = vpop.permute.xlu1 %4069  ;;  %v5979_v58 = vpop.permute.xlu2 %4154 }
 0x760   : > { %v5954_v34 = vpop.permute.xlu0 %4094  ;;  %v4071_v29 = vunpack.i.l.bf16 %v5951_v1 }
 0x762   : > { %v5962_v11 = vsel %vm2366_vm2, %v4066_v3, %v4071_v29 }
 0x767   : > { %v5964_v10 = vpop.permute.xlu1 %4084  ;;  %v5991_v5 = vpop.permute.xlu2 %4159 }
 0x768   : > { %v5966_v18 = vpop.permute.xlu0 %2866  ;;  %v4086_v46 = vunpack.i.l.bf16 %v5964_v10 }
 0x76f   : > { %v5970_v60 = vpop.permute.xlu1 %4089 }
 0x770   : > { %v4100_v38 = vpop.permute.xlu0 %4099  ;;  %v4091_v51 = vunpack.i.l.bf16 %v5970_v60 }
 0x771   : > { %v4102_v7 = vunpack.i.h.bf16 %v4100_v38  ;;  %v4101_v55 = vunpack.i.l.bf16 %v4100_v38 }
 0x773   : > { %v3155_v13 = vsel %vm2410_vm1, %v4101_v55, %v4102_v7  ;;  %v2992_v55 = vsel %vm2244_vm4, %v4056_v35, %v4057_v8 }
 0x774   : > { %3186 = vmatpush.msra.mxu2 %v3155_v13  ;;  %v4157_v13 = vunpack.i.h.bf16 %v5979_v58 }
 0x776   : > { %3187 = vmatpush.msra.mxu2 %v3112_v9  ;;  %v3115_v9 = vsel %vm2366_vm2, %v4067_v62, %v4052_v23 }
 0x777   : > { %v5976_v57 = vpop.permute.xlu1 %3110 }
 0x778   : > { %v4110_v40 = vpop.permute.xlu0 %4109 }
 0x779   : > { %v4112_v6 = vunpack.i.h.bf16 %v4110_v40  ;;  %v4111_v14 = vunpack.i.l.bf16 %v4110_v40  ;;  %v2958_v40 = vsel %vm2209_vm5, %v4136_v21, %v4137_v56  ;;  %v4161_v21 = vunpack.i.l.bf16 %v5991_v5 }
 0x77b   : > { %v3078_v59 = vsel %vm2033_vm13, %v4111_v14, %v4112_v6 }
 0x77c   : > { %3188 = vmatpush.msra.mxu2 %v3078_v59 }
 0x77f   : > { %v5981_v43 = vpop.permute.xlu1 %4104 }
 0x780   : > { %v5984_v54 = vpop.permute.xlu0 %4119  ;;  %v4106_v52 = vunpack.i.l.bf16 %v5981_v43  ;;  %v4107_v15 = vunpack.i.h.bf16 %v5981_v43  ;;  %v4156_v43 = vunpack.i.l.bf16 %v5979_v58 }
 0x781   : > { %v4121_v50 = vunpack.i.l.bf16 %v5984_v54  ;;  %v4122_v19 = vunpack.i.h.bf16 %v5984_v54 }
 0x782   : > { %v3156_v53 = vsel %vm2410_vm1, %v4102_v7, %v4106_v52 }
 0x783   : > { %3206 = vmatpush.msra.mxu3 %v3156_v53  ;;  %v3079_v32 = vsel %vm2033_vm13, %v4112_v6, %v4121_v50  ;;  %v3080_v14 = vsel %vm2033_vm13, %v4121_v50, %v4157_v13  ;;  %v3081_v59 = vsel %vm2033_vm13, %v4157_v13, %v4122_v19 }
 0x785   : > { %3207 = vmatpush.msra.mxu3 %v3113_v39  ;;  %v6026_v39 = vpop.permute.xlu2 %4179 }
 0x787   : > { %v4115_v49 = vpop.permute.xlu1 %4114  ;;  %3208 = vmatpush.msra.mxu3 %v3079_v32 }
 0x788   : > { %v5995_v36 = vpop.permute.xlu0 %4129  ;;  %v4117_v63 = vunpack.i.h.bf16 %v4115_v49  ;;  %v4116_v2 = vunpack.i.l.bf16 %v4115_v49 }
 0x789   : > { %v4132_v30 = vunpack.i.h.bf16 %v5995_v36  ;;  %v4131_v13 = vunpack.i.l.bf16 %v5995_v36  ;;  %v6060_v36 = vld [vmem:[%s6299_s13] sm:$0xff] }
 0x78a   : > { %v3035_v38 = vsel %vm2288_vm3, %v4116_v2, %v4117_v63  ;;  %v4077_v2 = vunpack.i.h.bf16 %v5947_v42 }
 0x78b   : > { %3189 = vmatpush.msra.mxu2 %v3035_v38  ;;  %v3157_v33 = vsel %vm2410_vm1, %v4106_v52, %v4132_v30  ;;  %v3158_v7 = vsel %vm2410_vm1, %v4132_v30, %v4107_v15  ;;  %v4061_v52 = vunpack.i.l.bf16 %v5945_v24  ;;  %v4076_v30 = vunpack.i.l.bf16 %v5947_v42 }
 0x78c   : > { %3226 = vmatpush.msrb.mxu0 %v3157_v33  ;;  %3246 = vmatpush.msrb.mxu1 %v3158_v7  ;;  %v4081_v7 = vunpack.i.l.bf16 %v5949_v20 }
 0x78d   : > { %3190 = vmatpush.msra.mxu2 %v2992_v55  ;;  %v2993_v50 = vsel %vm2244_vm4, %v4057_v8, %v4061_v52  ;;  %v6046_v55 = vpop.permute.xlu2 %4189  ;;  %v2872_v42 = vsel %vm2121_vm7, %v4076_v30, %v4077_v2 }
 0x78e   : > { %3227 = vmatpush.msrb.mxu0 %v3114_v27  ;;  %3247 = vmatpush.msrb.mxu1 %v3115_v9  ;;  %v2873_v27 = vsel %vm2121_vm7, %v4077_v2, %v4081_v7  ;;  %v6522_v9 = vld [vmem:[#allocation30_spill] sm:$0xff]  ;;  %v4191_v54 = vunpack.i.l.bf16 %v6046_v55 }
 0x78f   : > { %v6016_v6 = vpop.permute.xlu1 %4124  ;;  %3191 = vmatpush.msra.mxu2 %v2958_v40  ;;  %v2799_v40 = vmul.f32 %v5722_v28, %v6522_v9 }
 0x790   : > { %v6023_v25 = vpop.permute.xlu0 %4149  ;;  %v4126_v53 = vunpack.i.l.bf16 %v6016_v6  ;;  %3228 = vmatpush.msrb.mxu0 %v3080_v14  ;;  %3248 = vmatpush.msrb.mxu1 %v3081_v59  ;;  %v2800_v14 = vmul.f32 %v5725_v45, %v4835_v0  ;;  %v4141_v59 = vunpack.i.l.bf16 %v5972_v31 }
 0x791   : > { %v4151_v32 = vunpack.i.l.bf16 %v6023_v25  ;;  %v4152_v58 = vunpack.i.h.bf16 %v6023_v25 }
 0x792   : > { %v3036_v49 = vsel %vm2288_vm3, %v4117_v63, %v4126_v53  ;;  %v3160_v45 = vsel %vm2410_vm1, %v4131_v13, %v4141_v59 }
 0x793   : > { %3209 = vmatpush.msra.mxu3 %v3036_v49  ;;  %v2959_v35 = vsel %vm2209_vm5, %v4137_v56, %v4151_v32 }
 0x795   : > { %3210 = vmatpush.msra.mxu3 %v2993_v50  ;;  %v3159_v50 = vsel %vm2410_vm1, %v4107_v15, %v4131_v13  ;;  %v4087_v15 = vunpack.i.h.bf16 %v5964_v10 }
 0x797   : > { %v4145_v62 = vpop.permute.xlu1 %4144  ;;  %3211 = vmatpush.msra.mxu3 %v2959_v35  ;;  %v4127_v35 = vunpack.i.h.bf16 %v6016_v6  ;;  %v3116_v6 = vsel %vm2366_vm2, %v4052_v23, %v4066_v3  ;;  %v3082_v3 = vsel %vm2033_vm13, %v4122_v19, %v4156_v43 }
 0x798   : > { %v4147_v38 = vunpack.i.h.bf16 %v4145_v62  ;;  %v4146_v63 = vunpack.i.l.bf16 %v4145_v62  ;;  %v6039_v33 = vpop.permute.xlu0 %4169 }
 0x799   : > { %v4171_v28 = vunpack.i.l.bf16 %v6039_v33 }
 0x79a   : > { %v2915_v8 = vsel %vm2165_vm6, %v4146_v63, %v4147_v38  ;;  %v2916_v56 = vsel %vm2165_vm6, %v4147_v38, %v4161_v21 }
 0x79b   : > { %3192 = vmatpush.msra.mxu2 %v2915_v8  ;;  %3212 = vmatpush.msra.mxu3 %v2916_v56  ;;  %v4062_v8 = vunpack.i.h.bf16 %v5945_v24  ;;  %v3083_v23 = vsel %vm2033_vm13, %v4156_v43, %v4171_v28  ;;  %v6099_v56 = vpop.permute.xlu2 %4194  ;;  %v4082_v43 = vunpack.i.h.bf16 %v5949_v20 }
 0x79d   : > { %3193 = vmatpush.msra.mxu2 %v2872_v42  ;;  %3213 = vmatpush.msra.mxu3 %v2873_v27  ;;  %v2995_v10 = vsel %vm2244_vm4, %v4087_v15, %v4062_v8  ;;  %v4181_v27 = vunpack.i.l.bf16 %v6026_v39 }
 0x79f   : > { %v4165_v49 = vpop.permute.xlu1 %4164  ;;  %3194 = vmatpush.msra.mxu2 %v2799_v40  ;;  %3214 = vmatpush.msra.mxu3 %v2800_v14  ;;  %v2996_v40 = vsel %vm2244_vm4, %v4062_v8, %v4086_v46  ;;  %v2997_v14 = vsel %vm2244_vm4, %v4086_v46, %v4091_v51  ;;  %v2802_v46 = vmul.f32 %v5757_v26, %v4958_v12  ;;  %v4172_v12 = vunpack.i.h.bf16 %v6039_v33 }
 0x7a0   : > { %v4167_v2 = vunpack.i.h.bf16 %v4165_v49  ;;  %v6068_v0 = vpop.permute.xlu0 %4174  ;;  %3791 = vmatmul.msk.f32.vlgmr.msra.gmra.mxu2 %vm2432_vm8, %v6060_v36  ;;  %3792 = vmatmul.msk.f32.vlgmr.msra.gmra.mxu3 %vm2432_vm8, %v6060_v36  ;;  %v4166_v62 = vunpack.i.l.bf16 %v4165_v49  ;;  %v4097_v49 = vunpack.i.h.bf16 %v5954_v34  ;;  %v4197_v33 = vunpack.i.h.bf16 %v6099_v56 }
 0x7a1   : > { %3266 = vmatpush.msrb.mxu2 %v3159_v50  ;;  %3286 = vmatpush.msrb.mxu3 %v3160_v45  ;;  %v4176_v30 = vunpack.i.l.bf16 %v6068_v0  ;;  %v4162_v50 = vunpack.i.h.bf16 %v5991_v5  ;;  %v2963_v45 = vsel %vm2209_vm5, %v4181_v27, %v4191_v54 }
 0x7a2   : > { %v3037_v38 = vsel %vm2288_vm3, %v4126_v53, %v4167_v2  ;;  %v3038_v63 = vsel %vm2288_vm3, %v4167_v2, %v4127_v35  ;;  %v4182_v53 = vunpack.i.h.bf16 %v6026_v39  ;;  %v3039_v19 = vsel %vm2288_vm3, %v4127_v35, %v4166_v62 }
 0x7a3   : > { %3267 = vmatpush.msrb.mxu2 %v3116_v6  ;;  %3287 = vmatpush.msrb.mxu3 %v5962_v11  ;;  %v2994_v11 = vsel %vm2244_vm4, %v4061_v52, %v4087_v15  ;;  %v3040_v13 = vsel %vm2288_vm3, %v4166_v62, %v4176_v30  ;;  %v4196_v39 = vunpack.i.l.bf16 %v6099_v56  ;;  %v2962_v2 = vsel %vm2209_vm5, %v4152_v58, %v4181_v27  ;;  %v3077_v20 = vpop.permute.xlu2 %3076 }
 0x7a4   : > { %3229 = vmatpush.msrb.mxu0 %v3037_v38  ;;  %3249 = vmatpush.msrb.mxu1 %v3038_v63  ;;  %v2960_v24 = vsel %vm2209_vm5, %v4151_v32, %v4182_v53  ;;  %v2961_v52 = vsel %vm2209_vm5, %v4182_v53, %v4152_v58  ;;  %v4096_v32 = vunpack.i.l.bf16 %v5954_v34  ;;  %v2874_v38 = vsel %vm2121_vm7, %v4081_v7, %v4097_v49 }
 0x7a5   : > { %3268 = vmatpush.msrb.mxu2 %v3082_v3  ;;  %3288 = vmatpush.msrb.mxu3 %v3083_v23  ;;  %v2875_v5 = vsel %vm2121_vm7, %v4097_v49, %v4082_v43  ;;  %v4142_v63 = vunpack.i.h.bf16 %v5972_v31  ;;  %v4072_v3 = vunpack.i.h.bf16 %v5951_v1  ;;  %v4092_v31 = vunpack.i.h.bf16 %v5970_v60 }
 0x7a6   : > { %3230 = vmatpush.msrb.mxu0 %v2994_v11  ;;  %3250 = vmatpush.msrb.mxu1 %v2995_v10  ;;  %v2876_v8 = vsel %vm2121_vm7, %v4082_v43, %v4096_v32  ;;  %v2877_v58 = vsel %vm2121_vm7, %v4096_v32, %v5966_v18  ;;  %v3085_v53 = vsel %vm2033_vm13, %v4172_v12, %v3077_v20  ;;  %v4192_v11 = vunpack.i.h.bf16 %v6046_v55 }
 0x7a7   : > { %3269 = vmatpush.msrb.mxu2 %v3039_v19  ;;  %3289 = vmatpush.msrb.mxu3 %v3040_v13  ;;  %v3154_v42 = vpop.permute.xlu1 %3153  ;;  %v2921_v60 = vsel %vm2165_vm6, %v4196_v39, %v4197_v33  ;;  %v2805_v55 = vmul.f32 %v5792_v17, %v4940_v44 }
 0x7a8   : > { %v4185_v9 = vpop.permute.xlu0 %4184  ;;  %3231 = vmatpush.msrb.mxu0 %v2960_v24  ;;  %3251 = vmatpush.msrb.mxu1 %v2961_v52  ;;  %v3162_v26 = vsel %vm2410_vm1, %v4142_v63, %v3154_v42 }
 0x7a9   : > { %v4187_v25 = vunpack.i.h.bf16 %v4185_v9  ;;  %v4186_v35 = vunpack.i.l.bf16 %v4185_v9  ;;  %3270 = vmatpush.msrb.mxu2 %v2996_v40  ;;  %3290 = vmatpush.msrb.mxu3 %v2997_v14 }
 0x7ab   : > { %3271 = vmatpush.msrb.mxu2 %v2962_v2  ;;  %3291 = vmatpush.msrb.mxu3 %v2963_v45  ;;  %v2917_v15 = vsel %vm2165_vm6, %v4161_v21, %v4187_v25  ;;  %v2918_v6 = vsel %vm2165_vm6, %v4187_v25, %v4162_v50  ;;  %v2919_v34 = vsel %vm2165_vm6, %v4162_v50, %v4186_v35 }
 0x7ac   : > { %3232 = vmatpush.msrb.mxu0 %v2917_v15  ;;  %3252 = vmatpush.msrb.mxu1 %v2918_v6  ;;  %v2920_v62 = vsel %vm2165_vm6, %v4186_v35, %v4196_v39  ;;  %v2801_v21 = vmul.f32 %v5754_v47, %v4920_v37  ;;  %v2803_v37 = vmul.f32 %v5760_v41, %v4901_v4 }
 0x7ad   : > { %3272 = vmatpush.msrb.mxu2 %v2919_v34  ;;  %3292 = vmatpush.msrb.mxu3 %v2920_v62  ;;  %v2804_v47 = vmul.f32 %v5751_v16, %v4938_v61  ;;  %v3161_v4 = vsel %vm2410_vm1, %v4141_v59, %v4142_v63  ;;  %v4177_v61 = vunpack.i.h.bf16 %v6068_v0  ;;  %v3118_v16 = vsel %vm2366_vm2, %v4071_v29, %v4072_v3 }
 0x7ae   : > { %3233 = vmatpush.msrb.mxu0 %v2874_v38  ;;  %3253 = vmatpush.msrb.mxu1 %v2875_v5  ;;  %v3119_v41 = vsel %vm2366_vm2, %v4072_v3, %v5976_v57  ;;  %v3084_v59 = vsel %vm2033_vm13, %v4171_v28, %v4172_v12  ;;  %v2957_v57 = vpop.permute.xlu2 %2956  ;;  %v2998_v28 = vsel %vm2244_vm4, %v4091_v51, %v4092_v31  ;;  %vm3505_vm1 = vcmask 64512  }
 0x7af   : > { %3273 = vmatpush.msrb.mxu2 %v2876_v8  ;;  %3293 = vmatpush.msrb.mxu3 %v2877_v58  ;;  %v3034_v7 = vpop.permute.xlu1 %3033  ;;  %v3041_v1 = vsel %vm2288_vm3, %v4176_v30, %v4177_v61  ;;  %v2964_v30 = vsel %vm2209_vm5, %v4191_v54, %v4192_v11  ;;  %v2965_v24 = vsel %vm2209_vm5, %v4192_v11, %v2957_v57 }
 0x7b0   : > { %3234 = vmatpush.msrb.mxu0 %v2801_v21  ;;  %3254 = vmatpush.msrb.mxu1 %v2802_v46  ;;  %v2991_v23 = vpop.permute.xlu0 %2990  ;;  %v3042_v29 = vsel %vm2288_vm3, %v4177_v61, %v3034_v7  ;;  %v2806_v54 = vmul.f32 %v5795_v22, %v5013_v48 }
 0x7b1   : > { %3793 = vmatmul.msk.f32.vlgmr.msrb.gmra.mxu0 %vm2432_vm8, %v6060_v36  ;;  %3794 = vmatmul.msk.f32.vlgmr.msrb.gmra.mxu1 %vm2432_vm8, %v6060_v36  ;;  %v2999_v19 = vsel %vm2244_vm4, %v4092_v31, %v2991_v23 }
 0x7b2   : > { %3274 = vmatpush.msrb.mxu2 %v2803_v37  ;;  %3294 = vmatpush.msrb.mxu3 %v2804_v47 }
 0x7b3   : > { %3306 = vmatpush.msra.mxu0 %v3161_v4  ;;  %3326 = vmatpush.msra.mxu1 %v3162_v26 }
 0x7b4   : > { %3795 = vmatmul.msk.f32.vlgmr.msrb.gmra.mxu2 %vm2432_vm8, %v6060_v36  ;;  %3796 = vmatmul.msk.f32.vlgmr.msrb.gmra.mxu3 %vm2432_vm8, %v6060_v36 }
 0x7b5   : > { %3307 = vmatpush.msra.mxu0 %v3118_v16  ;;  %3327 = vmatpush.msra.mxu1 %v3119_v41 }
 0x7b6   : > { %v3174_v9 = vpop.permute.xlu2 %3173 }
 0x7b7   : > { %3308 = vmatpush.msra.mxu0 %v3084_v59  ;;  %3328 = vmatpush.msra.mxu1 %v3085_v53  ;;  %v4200_v10 = vpop.permute.xlu1 %4199 }
 0x7b8   : > { %v2914_v13 = vpop.permute.xlu0 %2913  ;;  %v4202_v0 = vunpack.i.h.bf16 %v4200_v10  ;;  %v4201_v42 = vunpack.i.l.bf16 %v4200_v10 }
 0x7b9   : > { %3309 = vmatpush.msra.mxu0 %v3041_v1  ;;  %3329 = vmatpush.msra.mxu1 %v3042_v29  ;;  %v2922_v51 = vsel %vm2165_vm6, %v4197_v33, %v2914_v13 }
 0x7ba   : > { %v2878_v52 = vsel %vm2121_vm7, %v5966_v18, %v4201_v42  ;;  %v2879_v27 = vsel %vm2121_vm7, %v4201_v42, %v4202_v0 }
 0x7bb   : > { %3310 = vmatpush.msra.mxu0 %v2998_v28  ;;  %3330 = vmatpush.msra.mxu1 %v2999_v19 }
 0x7bd   : > { %3311 = vmatpush.msra.mxu0 %v2964_v30  ;;  %3331 = vmatpush.msra.mxu1 %v2965_v24 }
 0x7bf   : > { %3312 = vmatpush.msra.mxu0 %v2921_v60  ;;  %3332 = vmatpush.msra.mxu1 %v2922_v51 }
 0x7c1   : > { %3313 = vmatpush.msra.mxu0 %v2878_v52  ;;  %3333 = vmatpush.msra.mxu1 %v2879_v27  ;;  %v3435_v27 = vpop.permute.xlu2 %3434 }
 0x7c3   : > { %3314 = vmatpush.msra.mxu0 %v2805_v55  ;;  %3334 = vmatpush.msra.mxu1 %v2806_v54 }
 0x7c4   : > { %3797 = vmatmul.msk.f32.vlgmr.msra.gmra.mxu0 %vm2432_vm8, %v6060_v36  ;;  %3798 = vmatmul.msk.f32.vlgmr.msra.gmra.mxu1 %vm2432_vm8, %v6060_v36 }
 0x823   : > { %v3196_v56 = vpop.f32.mrf.mxu2  ;;  %v3216_v18 = vpop.f32.mrf.mxu3 }
 0x824   : > { %v6206_v14 = vadd.f32 %v3196_v56, %v3174_v9  ;;  %v6208_v49 = vadd.f32 %v3216_v18, %v3174_v9 }
 0x826   : > { %v3357_v48 = vmul.f32 %v6206_v14, %v6206_v14  ;;  %v3358_v17 = vmul.f32 %v6208_v49, %v6208_v49  ;;  %v3341_v36 = vadd.f32 %v6208_v49, %v6206_v14 }
 0x828   : > { %v3365_v35 = vadd.f32 %v3358_v17, %v3357_v48 }
 0x82e   : > { %v3236_v40 = vpop.f32.mrf.mxu0  ;;  %v3256_v22 = vpop.f32.mrf.mxu1 }
 0x82f   : > { %v6210_v44 = vadd.f32 %v3236_v40, %v3174_v9  ;;  %v6221_v39 = vadd.f32 %v3256_v22, %v3174_v9 }
 0x831   : > { %v3359_v50 = vmul.f32 %v6210_v44, %v6210_v44  ;;  %v3342_v32 = vadd.f32 %v3341_v36, %v6210_v44  ;;  %v3360_v6 = vmul.f32 %v6221_v39, %v6221_v39 }
 0x833   : > { %v3366_v45 = vadd.f32 %v3365_v35, %v3359_v50  ;;  %v3343_v15 = vadd.f32 %v3342_v32, %v6221_v39 }
 0x835   : > { %v3367_v62 = vadd.f32 %v3366_v45, %v3360_v6 }
 0x837   : > { %v3276_v25 = vpop.f32.mrf.mxu2  ;;  %v3296_v43 = vpop.f32.mrf.mxu3 }
 0x838   : > { %v6223_v2 = vadd.f32 %v3276_v25, %v3174_v9  ;;  %v6231_v5 = vadd.f32 %v3296_v43, %v3174_v9 }
 0x83a   : > { %v3361_v34 = vmul.f32 %v6223_v2, %v6223_v2  ;;  %v3344_v38 = vadd.f32 %v3343_v15, %v6223_v2  ;;  %v3362_v46 = vmul.f32 %v6231_v5, %v6231_v5 }
 0x83c   : > { %v3368_v21 = vadd.f32 %v3367_v62, %v3361_v34  ;;  %v3345_v58 = vadd.f32 %v3344_v38, %v6231_v5 }
 0x83e   : > { %v3369_v47 = vadd.f32 %v3368_v21, %v3362_v46 }
 0x841   : > { %v3316_v63 = vpop.f32.mrf.mxu0  ;;  %v3336_v8 = vpop.f32.mrf.mxu1 }
 0x842   : > { %v6236_v20 = vadd.f32 %v3316_v63, %v3174_v9  ;;  %v6238_v7 = vadd.f32 %v3336_v8, %v3174_v9 }
 0x844   : > { %v3346_v3 = vadd.f32 %v3345_v58, %v6236_v20  ;;  %v3363_v37 = vmul.f32 %v6236_v20, %v6236_v20  ;;  %v3364_v12 = vmul.f32 %v6238_v7, %v6238_v7 }
 0x846   : > { %v3347_v23 = vadd.f32 %v3346_v3, %v6238_v7  ;;  %v3370_v26 = vadd.f32 %v3369_v47, %v3363_v37 }
 0x848   : > { %3348 = vadd.xlane.f32.xlu1 %v3347_v23  ;;  %v3371_v4 = vadd.f32 %v3370_v26, %v3364_v12 }
 0x84a   : > { %3372 = vadd.xlane.f32.xlu0 %v3371_v4 }
 0x8bb   : > { %v3349_v61 = vpop.xlane.xlu1 %3348 }
 0x8bc   : > { %v3350_v16 = vrot.slane %v3349_v61, 4 }
 0x8bd   : > { %v3373_v41 = vpop.xlane.xlu0 %3372 }
 0x8be   : > { %v3351_v31 = vadd.f32 %v3350_v16, %v3349_v61  ;;  %v3374_v59 = vrot.slane %v3373_v41, 4 }
 0x8c0   : > { %v3352_v53 = vrot.slane %v3351_v31, 2  ;;  %v3375_v11 = vadd.f32 %v3374_v59, %v3373_v41 }
 0x8c2   : > { %v3353_v1 = vadd.f32 %v3352_v53, %v3351_v31  ;;  %v3376_v29 = vrot.slane %v3375_v11, 2 }
 0x8c4   : > { %v3377_v57 = vadd.f32 %v3376_v29, %v3375_v11  ;;  %v3354_v10 = vrot.slane %v3353_v1, 1 }
 0x8c6   : > { %v3355_v33 = vadd.f32 %v3354_v10, %v3353_v1  ;;  %v3378_v28 = vrot.slane %v3377_v57, 1 }
 0x8c8   : > { %3835 = vpush %v3355_v33  ;;  %v3379_v19 = vadd.f32 %v3378_v28, %v3377_v57 }
 0x8ca   : > { %3837 = vpush %v3379_v19 }
 0x8f9   : > { %s3836_s27 = spop %3835 }
 0x8fa   : > { %s3389_s28 = smul.f32 %s3836_s27, %s5681_s20 }
 0x8fb   : > { %s3838_s30 = spop %3837 }
 0x8fc   : > { %s3399_s29 = smul.f32 %s3389_s28, %s3389_s28  ;;  %v3401_v55 = vstv %s3389_s28  ;;  %s619_s28 = scalar_lea.vmem %s6305_s19, %s3810_s1 }
 0x8fd   : > { %s3398_s23 = smul.f32 %s3838_s30, %s5681_s20  ;;  %v3402_v54 = vsub.f32 %v6206_v14, %v3401_v55  ;;  %v3403_v56 = vsub.f32 %v6208_v49, %v3401_v55  ;;  %v3404_v18 = vsub.f32 %v6210_v44, %v3401_v55  ;;  %v3405_v9 = vsub.f32 %v6221_v39, %v3401_v55 }
 0x8fe   : > { %v3406_v40 = vsub.f32 %v6223_v2, %v3401_v55  ;;  %v3407_v17 = vsub.f32 %v6231_v5, %v3401_v55  ;;  %v3408_v22 = vsub.f32 %v6236_v20, %v3401_v55  ;;  %v3409_v36 = vsub.f32 %v6238_v7, %v3401_v55  ;;  %v3448_v2 = vpop.permute.xlu2 %3447 }
 0x8ff   : > { %s3400_s3 = ssub.f32 %s3398_s23, %s3399_s29 }
 0x901   : > { %s3410_s21 = sadd.f32 1e-05, %s3400_s3 }
 0x903   : > { %v3411_v13 = vstv %s3410_s21 }
 0x904   : > { %4215 = vrsqrt.f32 %v3411_v13  ;;  %vm3418_vm14 = vweird.f32 %v3411_v13 }
 0x90a   : > { %v4216_v0 = vpop.eup %4215 }
 0x90b   : > { %v3413_v42 = vmul.f32 %v4216_v0, %v3411_v13  ;;  %vm3419_vm13 = vweird.f32 %v4216_v0 }
 0x90c   : > { %vm3420_vm15 = vmor %vm3418_vm14, %vm3419_vm13 }
 0x90d   : > { %v3414_v30 = vmul.f32 %v4216_v0, %v3413_v42 }
 0x90f   : > { %v3415_v24 = vmul.f32 0.5, %v3414_v30 }
 0x911   : > { %v3416_v60 = vsub.f32 1.5, %v3415_v24 }
 0x913   : > { %v3417_v51 = vmul.f32 %v4216_v0, %v3416_v60 }
 0x915   : > { %v3421_v52 = vsel %vm3420_vm15, %v4216_v0, %v3417_v51 }
 0x916   : > { %3839 = vpush %v3421_v52 }
 0x947   : > { %s3840_s20 = spop %3839 }
 0x948   : > { %v3423_v48 = vstv %s3840_s20 }
 0x949   : > { %v3424_v50 = vmul.f32 %v3423_v48, %v3402_v54  ;;  %v3425_v25 = vmul.f32 %v3423_v48, %v3403_v56  ;;  %v3426_v35 = vmul.f32 %v3423_v48, %v3404_v18  ;;  %v3427_v14 = vmul.f32 %v3423_v48, %v3405_v9 }
 0x94a   : > { %v3428_v32 = vmul.f32 %v3423_v48, %v3406_v40  ;;  %v3429_v45 = vmul.f32 %v3423_v48, %v3407_v17  ;;  %v3430_v49 = vmul.f32 %v3423_v48, %v3408_v22  ;;  %v3431_v43 = vmul.f32 %v3423_v48, %v3409_v36  ;;  %v3498_v17 = vld [vmem:[%s6303_s17] sm:$0xf] }
 0x94b   : > { %v3437_v44 = vmul.f32 %v3435_v27, %v3424_v50  ;;  %v3438_v15 = vmul.f32 %v3435_v27, %v3425_v25  ;;  %v3439_v39 = vmul.f32 %v3435_v27, %v3426_v35  ;;  %v3440_v6 = vmul.f32 %v3435_v27, %v3427_v14  ;;  %v3503_v35 = vpop.permute.xlu2 %3502 }
 0x94c   : > { %v3441_v34 = vmul.f32 %v3435_v27, %v3428_v32  ;;  %v3442_v62 = vmul.f32 %v3435_v27, %v3429_v45  ;;  %v3443_v38 = vmul.f32 %v3435_v27, %v3430_v49  ;;  %v3444_v5 = vmul.f32 %v3435_v27, %v3431_v43  ;;  %v6523_v43 = vld [vmem:[#allocation34_spill] sm:$0xff] }
 0x94d   : > { %v3450_v21 = vadd.f32 %v3448_v2, %v3437_v44  ;;  %v3451_v63 = vadd.f32 %v3448_v2, %v3438_v15  ;;  %v3452_v8 = vadd.f32 %v3448_v2, %v3439_v39  ;;  %v3453_v58 = vadd.f32 %v3448_v2, %v3440_v6  ;;  %v6524_v15 = vld [vmem:[#allocation6_spill] sm:$0xff] }
 0x94e   : > { %v3454_v46 = vadd.f32 %v3448_v2, %v3441_v34  ;;  %v3455_v20 = vadd.f32 %v3448_v2, %v3442_v62  ;;  %v3456_v7 = vadd.f32 %v3448_v2, %v3443_v38  ;;  %v3457_v3 = vadd.f32 %v3448_v2, %v3444_v5 }
 0x94f   : > { %v3458_v37 = vadd.f32 3.0, %v3450_v21  ;;  %v3459_v47 = vadd.f32 3.0, %v3451_v63  ;;  %v3460_v23 = vadd.f32 3.0, %v3452_v8  ;;  %v3461_v12 = vadd.f32 3.0, %v3453_v58 }
 0x950   : > { %v3462_v26 = vadd.f32 3.0, %v3454_v46  ;;  %v3463_v4 = vadd.f32 3.0, %v3455_v20  ;;  %v3464_v61 = vadd.f32 3.0, %v3456_v7  ;;  %v3465_v16 = vadd.f32 3.0, %v3457_v3 }
 0x951   : > { %v3466_v41 = vmax.f32 %v3458_v37, 0.0  ;;  %v3467_v31 = vmax.f32 %v3459_v47, 0.0  ;;  %v3468_v59 = vmax.f32 %v3460_v23, 0.0  ;;  %v3469_v53 = vmax.f32 %v3461_v12, 0.0  ;;  %v6527_v47 = vld [vmem:[#allocation10_spill] sm:$0xff] }
 0x952   : > { %v3470_v11 = vmax.f32 %v3462_v26, 0.0  ;;  %v3471_v1 = vmax.f32 %v3463_v4, 0.0  ;;  %v3472_v29 = vmax.f32 %v3464_v61, 0.0  ;;  %v3473_v57 = vmax.f32 %v3465_v16, 0.0  ;;  %v6528_v26 = vld [vmem:[#allocation8_spill] sm:$0xff] }
 0x953   : > { %v3474_v10 = vmin.f32 %v3466_v41, 6.0  ;;  %v3475_v33 = vmin.f32 %v3467_v31, 6.0  ;;  %v3476_v28 = vmin.f32 %v3468_v59, 6.0  ;;  %v3477_v19 = vmin.f32 %v3469_v53, 6.0 }
 0x954   : > { %v3478_v13 = vmin.f32 %v3470_v11, 6.0  ;;  %v3479_v0 = vmin.f32 %v3471_v1, 6.0  ;;  %v3480_v42 = vmin.f32 %v3472_v29, 6.0  ;;  %v3481_v30 = vmin.f32 %v3473_v57, 6.0  ;;  %v6529_v11 = vld [vmem:[#allocation35_spill] sm:$0xff] }
 0x955   : > { %v3482_v24 = vmul.f32 %v3474_v10, %v3450_v21  ;;  %v3483_v60 = vmul.f32 %v3475_v33, %v3451_v63  ;;  %v3484_v51 = vmul.f32 %v3476_v28, %v3452_v8  ;;  %v3485_v52 = vmul.f32 %v3477_v19, %v3453_v58  ;;  %v6525_v21 = vld [vmem:[#allocation33_spill] sm:$0xff]  ;;  %v6530_v29 = vld [vmem:[#allocation7_spill] sm:$0xff] }
 0x956   : > { %v3486_v27 = vmul.f32 %v3478_v13, %v3454_v46  ;;  %v3487_v55 = vmul.f32 %v3479_v0, %v3455_v20  ;;  %v3488_v54 = vmul.f32 %v3480_v42, %v3456_v7  ;;  %v3489_v56 = vmul.f32 %v3481_v30, %v3457_v3  ;;  %v6526_v7 = vld [vmem:[#allocation5_spill] sm:$0xff] }
 0x957   : > { %v3490_v18 = vmul.f32 0.16666667, %v3482_v24  ;;  %v3491_v9 = vmul.f32 0.16666667, %v3483_v60  ;;  %v3492_v40 = vmul.f32 0.16666667, %v3484_v51 }
 0x958   : > { %v3493_v48 = vmul.f32 0.16666667, %v3485_v52  ;;  %v3494_v22 = vmul.f32 0.16666667, %v3486_v27  ;;  %v3495_v36 = vmul.f32 0.16666667, %v3487_v55 }
 0x959   : > { %3524 = vmatpush.msra.mxu2 %v3490_v18  ;;  %3544 = vmatpush.msra.mxu3 %v3491_v9  ;;  %v3496_v50 = vmul.f32 0.16666667, %v3488_v54  ;;  %v3497_v25 = vmul.f32 0.16666667, %v3489_v56 }
 0x95a   : > { %3564 = vmatpush.msrb.mxu0 %v3492_v40  ;;  %3584 = vmatpush.msrb.mxu1 %v3493_v48 }
 0x95b   : > { %3799 = vmatmul.msk.f32.vlgmr.msra.gmra.mxu2 %vm3505_vm1, %v3498_v17  ;;  %3800 = vmatmul.msk.f32.vlgmr.msra.gmra.mxu3 %vm3505_vm1, %v3498_v17 }
 0x95c   : > { %3801 = vmatmul.msk.f32.vlgmr.msrb.gmra.mxu0 %vm3505_vm1, %v3498_v17  ;;  %3802 = vmatmul.msk.f32.vlgmr.msrb.gmra.mxu1 %vm3505_vm1, %v3498_v17 }
 0x95d   : > { %3604 = vmatpush.msrb.mxu2 %v3494_v22  ;;  %3624 = vmatpush.msrb.mxu3 %v3495_v36 }
 0x95e   : > { %3644 = vmatpush.msra.mxu0 %v3496_v50  ;;  %3664 = vmatpush.msra.mxu1 %v3497_v25 }
 0x963   : > { %3803 = vmatmul.msk.f32.vlgmr.msrb.gmra.mxu2 %vm3505_vm1, %v3498_v17  ;;  %3804 = vmatmul.msk.f32.vlgmr.msrb.gmra.mxu3 %vm3505_vm1, %v3498_v17 }
 0x964   : > { %3805 = vmatmul.msk.f32.vlgmr.msra.gmra.mxu0 %vm3505_vm1, %v3498_v17  ;;  %3806 = vmatmul.msk.f32.vlgmr.msra.gmra.mxu1 %vm3505_vm1, %v3498_v17 }
 0x9d9   : > { %v3566_v14 = vpop.f32.mrf.mxu0  ;;  %v3586_v32 = vpop.f32.mrf.mxu1 }
 0x9da   : > { %v3567_v45 = vadd.f32 %v3566_v14, %v3503_v35  ;;  %v3587_v49 = vadd.f32 %v3586_v32, %v3503_v35 }
 0x9dc   : > { %v3672_v44 = vadd.f32 %v3587_v49, %v6523_v43  ;;  %v3671_v39 = vadd.f32 %v3567_v45, %v6524_v15 }
 0x9de   : > { %v3686_v6 = vrot.slane %v3672_v44, 4  ;;  %v3526_v2 = vpop.f32.mrf.mxu2  ;;  %v3546_v34 = vpop.f32.mrf.mxu3 }
 0x9df   : > { %v3527_v62 = vadd.f32 %v3526_v2, %v3503_v35  ;;  %v3547_v38 = vadd.f32 %v3546_v34, %v3503_v35 }
 0x9e0   : > { %v3690_v5 = vsel %vm1212_vm0, %v3671_v39, %v3686_v6 }
 0x9e1   : > { %3698 = vst [vmem:[%s619_s28 + $0x8] sm:$0xff] %v3690_v5  ;;  %v3670_v63 = vadd.f32 %v3547_v38, %v6525_v21  ;;  %v3646_v8 = vpop.f32.mrf.mxu0  ;;  %v3666_v58 = vpop.f32.mrf.mxu1  ;;  %v3669_v3 = vadd.f32 %v3527_v62, %v6526_v7 }
 0x9e2   : > { %v3647_v46 = vadd.f32 %v3646_v8, %v3503_v35  ;;  %v3667_v20 = vadd.f32 %v3666_v58, %v3503_v35 }
 0x9e3   : > { %v3685_v37 = vrot.slane %v3670_v63, 4 }
 0x9e4   : > { %v3676_v23 = vadd.f32 %v3667_v20, %v6527_v47  ;;  %v3675_v4 = vadd.f32 %v3647_v46, %v6528_v26 }
 0x9e5   : > { %v3689_v12 = vsel %vm1212_vm0, %v3669_v3, %v3685_v37 }
 0x9e6   : > { %3697 = vst [vmem:[%s619_s28] sm:$0xff] %v3689_v12  ;;  %v3688_v61 = vrot.slane %v3676_v23, 4  ;;  %v3606_v16 = vpop.f32.mrf.mxu2  ;;  %v3626_v41 = vpop.f32.mrf.mxu3 }
 0x9e7   : > { %v3607_v31 = vadd.f32 %v3606_v16, %v3503_v35  ;;  %v3627_v59 = vadd.f32 %v3626_v41, %v3503_v35 }
 0x9e8   : > { %v3692_v53 = vsel %vm1212_vm0, %v3675_v4, %v3688_v61 }
 0x9e9   : > { %3700 = vst [vmem:[%s619_s28 + $0x18] sm:$0xff] %v3692_v53  ;;  %v3674_v1 = vadd.f32 %v3627_v59, %v6529_v11  ;;  %v3673_v57 = vadd.f32 %v3607_v31, %v6530_v29 }
 0x9eb   : > { %v3687_v10 = vrot.slane %v3674_v1, 4 }
 0x9ed   : > { %v3691_v33 = vsel %vm1212_vm0, %v3673_v57, %v3687_v10 }
 0x9ee   : > { %3699 = vst [vmem:[%s619_s28 + $0x10] sm:$0xff] %v3691_v33 }
 0x9ef PF: > { %s30_s0 = sadd.s32 1, %s4385_s0  }
 0x9f0   : > { %p27_p7 = scmp.ge.s32.totalorder %s30_s0, 4  }
 0x9f2   :  { %29 = sbr.rel (!%p27_p7) target bundleno = 6 (0x6), region = 131 }
 0x9f7   :  { %3722 = vsyncpa [#allocation3], 1 }
 0x9f8   :  { %3724 = vsyncpa [#allocation3 + $0x1], 1 }

</bundles_post_ra>
